<compile_context>
chip_gen: v5e
topology: v5e:2x2
jax: 0.10.0
libtpu: 0.0.40
codegen_flags: <defaults>
</compile_context>

<pallas_src>
import math

import jax
import jax.numpy as jnp
from jax.experimental import pallas as pl
from jax.experimental.pallas import tpu as pltpu

# ---- architecture hyper-parameters (opt.latent_dim / opt.channels / opt.img_size) ----
LATENT_DIM = 32
CHANNELS = 1
IMG_SIZE = 8
IMG_FLAT = CHANNELS * IMG_SIZE * IMG_SIZE            # 64
OUT_PAD = ((IMG_FLAT + 127) // 128) * 128            # lane-dense head width (multiple of 128)
HIDDEN = (128, 256, 512, 1024)                       # fixed by the module definition
BN_EPS = 0.8
LEAKY_SLOPE = 0.2


def _leaky_relu(x):
    return jnp.where(x > 0, x, LEAKY_SLOPE * x)


def _batchnorm(x, gamma, beta):
    # Training-mode BatchNorm1d, single pass over the activation:
    # reduce sum and sum-of-squares back-to-back, var = E[x^2] - E[x]^2 (biased).
    # Apply as a fused per-feature affine: y = x * scale + shift.
    inv_n = 1.0 / x.shape[0]
    s = jnp.sum(x, axis=0, keepdims=True)
    ss = jnp.sum(x * x, axis=0, keepdims=True)
    mean = s * inv_n
    var = ss * inv_n - mean * mean
    scale = jax.lax.rsqrt(var + BN_EPS) * gamma       # (1, F)
    shift = beta - mean * scale                       # (1, F)
    return x * scale + shift


def _dot_bf16(x, w_bf16):
    # bf16 x bf16 MXU matmul with f32 accumulation.
    return jnp.dot(x.astype(jnp.bfloat16), w_bf16, preferred_element_type=jnp.float32)


def generator_kernel(z_ref,
                     w1_ref, b1_ref,
                     w2_ref, b2_ref, g2_ref, be2_ref,
                     w3_ref, b3_ref, g3_ref, be3_ref,
                     w4_ref, b4_ref, g4_ref, be4_ref,
                     w5_ref, b5_ref,
                     out_ref):
    # Block 1: Linear + LeakyReLU (no BN)
    h = _leaky_relu(_dot_bf16(z_ref[...], w1_ref[...]) + b1_ref[...])

    # Blocks 2..4: Linear + BatchNorm (batch stats, eps=0.8) + LeakyReLU
    h = _leaky_relu(_batchnorm(_dot_bf16(h, w2_ref[...]) + b2_ref[...],
                               g2_ref[...], be2_ref[...]))
    h = _leaky_relu(_batchnorm(_dot_bf16(h, w3_ref[...]) + b3_ref[...],
                               g3_ref[...], be3_ref[...]))
    h = _leaky_relu(_batchnorm(_dot_bf16(h, w4_ref[...]) + b4_ref[...],
                               g4_ref[...], be4_ref[...]))

    # Output head: Linear (zero-padded to OUT_PAD lanes) + Tanh (EUP)
    out_ref[...] = jnp.tanh(_dot_bf16(h, w5_ref[...]) + b5_ref[...])


def init_params(key):
    """Deterministic PyTorch-style init: U(-1/sqrt(fan_in), 1/sqrt(fan_in)), f32."""
    dims = (LATENT_DIM,) + HIDDEN + (IMG_FLAT,)
    params = []
    for i in range(len(dims) - 1):
        fan_in, fan_out = dims[i], dims[i + 1]
        key, kw, kb = jax.random.split(key, 3)
        bound = 1.0 / math.sqrt(fan_in)
        w = jax.random.uniform(kw, (fan_in, fan_out), jnp.float32, -bound, bound)
        b = jax.random.uniform(kb, (1, fan_out), jnp.float32, -bound, bound)
        params.append((w, b))
    # BN params (gamma=1, beta=0) for blocks 2..4 (feature dims 256, 512, 1024)
    bn_params = []
    for f in HIDDEN[1:]:
        bn_params.append((jnp.ones((1, f), jnp.float32), jnp.zeros((1, f), jnp.float32)))
    return params, bn_params


def _prepare(params):
    """bf16 weights (halve HBM weight traffic); zero-pad the head to OUT_PAD lanes."""
    (w1, b1), (w2, b2), (w3, b3), (w4, b4), (w5, b5) = params
    pad = OUT_PAD - IMG_FLAT
    w5p = jnp.pad(w5, ((0, 0), (0, pad)))
    b5p = jnp.pad(b5, ((0, 0), (0, pad)))
    ws = tuple(w.astype(jnp.bfloat16) for w in (w1, w2, w3, w4, w5p))
    bs = (b1, b2, b3, b4, b5p)                 # biases stay f32
    return ws, bs


def generator_forward(z, params, bn_params):
    B = z.shape[0]
    (w1, w2, w3, w4, w5), (b1, b2, b3, b4, b5) = _prepare(params)
    (g2, be2), (g3, be3), (g4, be4) = bn_params

    args = (z,
            w1, b1,
            w2, b2, g2, be2,
            w3, b3, g3, be3,
            w4, b4, g4, be4,
            w5, b5)

    # Advisory cost estimate (matmul flops, bf16 weight bytes + f32 small tensors,
    # tanh + BN rsqrt transcendentals) so XLA schedules neighbors sensibly.
    dims = (LATENT_DIM,) + HIDDEN + (OUT_PAD,)
    mm_macs = sum(a * b for a, b in zip(dims[:-1], dims[1:]))
    weight_bytes = 2 * mm_macs                                     # bf16 weights
    other_bytes = 4 * (sum(dims[1:])                               # biases
                       + 2 * sum(HIDDEN[1:])                       # gamma/beta
                       + B * (LATENT_DIM + OUT_PAD))               # z in, img out
    cost = pl.CostEstimate(flops=2 * B * mm_macs,
                           transcendentals=B * OUT_PAD + sum(HIDDEN[1:]),
                           bytes_accessed=weight_bytes + other_bytes)

    vmem_spec = pl.BlockSpec(memory_space=pltpu.MemorySpace.VMEM)
    flat = pl.pallas_call(
        generator_kernel,
        out_shape=jax.ShapeDtypeStruct((B, OUT_PAD), jnp.float32),
        in_specs=[vmem_spec] * len(args),
        out_specs=vmem_spec,
        cost_estimate=cost,
    )(*args)

    # Drop the lane padding; NCHW output matching img.view(B, C, H, W).
    return flat[:, :IMG_FLAT].reshape(B, CHANNELS, IMG_SIZE, IMG_SIZE)


def generator_reference(z, params, bn_params):
    """Plain-JAX reference with identical dtype/math choices (for validation)."""
    (w1, b1), (w2, b2), (w3, b3), (w4, b4), (w5, b5) = params
    (g2, be2), (g3, be3), (g4, be4) = bn_params

    def dot(x, w):
        return jnp.dot(x.astype(jnp.bfloat16), w.astype(jnp.bfloat16),
                       preferred_element_type=jnp.float32)

    h = _leaky_relu(dot(z, w1) + b1)
    h = _leaky_relu(_batchnorm(dot(h, w2) + b2, g2, be2))
    h = _leaky_relu(_batchnorm(dot(h, w3) + b3, g3, be3))
    h = _leaky_relu(_batchnorm(dot(h, w4) + b4, g4, be4))
    img = jnp.tanh(dot(h, w5) + b5)
    return img.reshape(z.shape[0], CHANNELS, IMG_SIZE, IMG_SIZE)


if __name__ == "__main__":
    key = jax.random.PRNGKey(0)
    key, kz = jax.random.split(key)

    B = 8
    z = jax.random.normal(kz, (B, LATENT_DIM), jnp.float32)

    params, bn_params = init_params(key)

    img = generator_forward(z, params, bn_params)
    jax.block_until_ready(img)

    assert img.shape == (B, CHANNELS, IMG_SIZE, IMG_SIZE)
    assert img.dtype == jnp.float32
    assert bool(jnp.all(jnp.isfinite(img)))

    # Validate against a plain-JAX reference using the same bf16-weight / f32-accum math.
    ref = generator_reference(z, params, bn_params)
    assert bool(jnp.allclose(img, ref, atol=5e-2, rtol=0.0)), (
        "max abs diff vs reference: %f" % float(jnp.max(jnp.abs(img - ref))))

    print("KERNEL_OK")
</pallas_src>

<mosaic_0001>
module attributes {stable_mosaic.version = 11 : i64} {
  func.func @generator_kernel(%arg0: memref<8x32xf32, #tpu.memory_space<vmem>>, %arg1: memref<32x128xbf16, #tpu.memory_space<vmem>>, %arg2: memref<1x128xf32, #tpu.memory_space<vmem>>, %arg3: memref<128x256xbf16, #tpu.memory_space<vmem>>, %arg4: memref<1x256xf32, #tpu.memory_space<vmem>>, %arg5: memref<1x256xf32, #tpu.memory_space<vmem>>, %arg6: memref<1x256xf32, #tpu.memory_space<vmem>>, %arg7: memref<256x512xbf16, #tpu.memory_space<vmem>>, %arg8: memref<1x512xf32, #tpu.memory_space<vmem>>, %arg9: memref<1x512xf32, #tpu.memory_space<vmem>>, %arg10: memref<1x512xf32, #tpu.memory_space<vmem>>, %arg11: memref<512x1024xbf16, #tpu.memory_space<vmem>>, %arg12: memref<1x1024xf32, #tpu.memory_space<vmem>>, %arg13: memref<1x1024xf32, #tpu.memory_space<vmem>>, %arg14: memref<1x1024xf32, #tpu.memory_space<vmem>>, %arg15: memref<1024x128xbf16, #tpu.memory_space<vmem>>, %arg16: memref<1x128xf32, #tpu.memory_space<vmem>>, %arg17: memref<8x128xf32, #tpu.memory_space<vmem>>) attributes {dimension_semantics = [], scalar_prefetch = 0 : i64, scratch_operands = 0 : i64, tpu.core_type = #tpu.core_type<tc>} {
    %c0 = arith.constant 0 : index
    %c0_0 = arith.constant 0 : index
    %0 = vector.load %arg0[%c0, %c0_0] : memref<8x32xf32, #tpu.memory_space<vmem>>, vector<8x32xf32>
    %c0_1 = arith.constant 0 : index
    %c0_2 = arith.constant 0 : index
    %1 = vector.load %arg1[%c0_1, %c0_2] : memref<32x128xbf16, #tpu.memory_space<vmem>>, vector<32x128xbf16>
    %2 = arith.truncf %0 : vector<8x32xf32> to vector<8x32xbf16>
    %cst = arith.constant dense<0.000000e+00> : vector<8x128xf32>
    %3 = tpu.matmul %2, %1, %cst {dimension_numbers = #tpu.dot_dimension_numbers<[1], [0], [0], [1], [0, 0, 1, 1], [], []>} : vector<8x32xbf16>, vector<32x128xbf16>, vector<8x128xf32> -> vector<8x128xf32>
    %c0_3 = arith.constant 0 : index
    %c0_4 = arith.constant 0 : index
    %4 = vector.load %arg2[%c0_3, %c0_4] : memref<1x128xf32, #tpu.memory_space<vmem>>, vector<1x128xf32>
    %5 = vector.broadcast %4 : vector<1x128xf32> to vector<8x128xf32>
    %6 = arith.addf %3, %5 : vector<8x128xf32>
    %cst_5 = arith.constant 0.000000e+00 : f32
    %7 = vector.broadcast %cst_5 : f32 to vector<8x128xf32>
    %8 = arith.cmpf ogt, %6, %7 : vector<8x128xf32>
    %cst_6 = arith.constant 2.000000e-01 : f32
    %9 = vector.broadcast %cst_6 : f32 to vector<8x128xf32>
    %10 = arith.mulf %9, %6 : vector<8x128xf32>
    %11 = arith.select %8, %6, %10 : vector<8x128xi1>, vector<8x128xf32>
    %c0_7 = arith.constant 0 : index
    %c0_8 = arith.constant 0 : index
    %12 = vector.load %arg3[%c0_7, %c0_8] : memref<128x256xbf16, #tpu.memory_space<vmem>>, vector<128x256xbf16>
    %13 = arith.truncf %11 : vector<8x128xf32> to vector<8x128xbf16>
    %cst_9 = arith.constant dense<0.000000e+00> : vector<8x256xf32>
    %14 = tpu.matmul %13, %12, %cst_9 {dimension_numbers = #tpu.dot_dimension_numbers<[1], [0], [0], [1], [0, 0, 1, 1], [], []>} : vector<8x128xbf16>, vector<128x256xbf16>, vector<8x256xf32> -> vector<8x256xf32>
    %c0_10 = arith.constant 0 : index
    %c0_11 = arith.constant 0 : index
    %15 = vector.load %arg4[%c0_10, %c0_11] : memref<1x256xf32, #tpu.memory_space<vmem>>, vector<1x256xf32>
    %16 = vector.broadcast %15 : vector<1x256xf32> to vector<8x256xf32>
    %17 = arith.addf %14, %16 : vector<8x256xf32>
    %c0_12 = arith.constant 0 : index
    %c0_13 = arith.constant 0 : index
    %18 = vector.load %arg5[%c0_12, %c0_13] : memref<1x256xf32, #tpu.memory_space<vmem>>, vector<1x256xf32>
    %c0_14 = arith.constant 0 : index
    %c0_15 = arith.constant 0 : index
    %19 = vector.load %arg6[%c0_14, %c0_15] : memref<1x256xf32, #tpu.memory_space<vmem>>, vector<1x256xf32>
    %cst_16 = arith.constant dense<0.000000e+00> : vector<256xf32>
    %20 = vector.multi_reduction <add>, %17, %cst_16 [0] : vector<8x256xf32> to vector<256xf32>
    %21 = vector.shape_cast %20 : vector<256xf32> to vector<1x256xf32>
    %22 = arith.mulf %17, %17 : vector<8x256xf32>
    %cst_17 = arith.constant dense<0.000000e+00> : vector<256xf32>
    %23 = vector.multi_reduction <add>, %22, %cst_17 [0] : vector<8x256xf32> to vector<256xf32>
    %24 = vector.shape_cast %23 : vector<256xf32> to vector<1x256xf32>
    %cst_18 = arith.constant 1.250000e-01 : f32
    %25 = vector.broadcast %cst_18 : f32 to vector<1x256xf32>
    %26 = arith.mulf %21, %25 : vector<1x256xf32>
    %cst_19 = arith.constant 1.250000e-01 : f32
    %27 = vector.broadcast %cst_19 : f32 to vector<1x256xf32>
    %28 = arith.mulf %24, %27 : vector<1x256xf32>
    %29 = arith.mulf %26, %26 : vector<1x256xf32>
    %30 = arith.subf %28, %29 : vector<1x256xf32>
    %cst_20 = arith.constant 8.000000e-01 : f32
    %31 = vector.broadcast %cst_20 : f32 to vector<1x256xf32>
    %32 = arith.addf %30, %31 : vector<1x256xf32>
    %33 = math.rsqrt %32 : vector<1x256xf32>
    %34 = arith.mulf %33, %18 : vector<1x256xf32>
    %35 = arith.mulf %26, %34 : vector<1x256xf32>
    %36 = arith.subf %19, %35 : vector<1x256xf32>
    %37 = vector.broadcast %34 : vector<1x256xf32> to vector<8x256xf32>
    %38 = arith.mulf %17, %37 : vector<8x256xf32>
    %39 = vector.broadcast %36 : vector<1x256xf32> to vector<8x256xf32>
    %40 = arith.addf %38, %39 : vector<8x256xf32>
    %cst_21 = arith.constant 0.000000e+00 : f32
    %41 = vector.broadcast %cst_21 : f32 to vector<8x256xf32>
    %42 = arith.cmpf ogt, %40, %41 : vector<8x256xf32>
    %cst_22 = arith.constant 2.000000e-01 : f32
    %43 = vector.broadcast %cst_22 : f32 to vector<8x256xf32>
    %44 = arith.mulf %43, %40 : vector<8x256xf32>
    %45 = arith.select %42, %40, %44 : vector<8x256xi1>, vector<8x256xf32>
    %c0_23 = arith.constant 0 : index
    %c0_24 = arith.constant 0 : index
    %46 = vector.load %arg7[%c0_23, %c0_24] : memref<256x512xbf16, #tpu.memory_space<vmem>>, vector<256x512xbf16>
    %47 = arith.truncf %45 : vector<8x256xf32> to vector<8x256xbf16>
    %cst_25 = arith.constant dense<0.000000e+00> : vector<8x512xf32>
    %48 = tpu.matmul %47, %46, %cst_25 {dimension_numbers = #tpu.dot_dimension_numbers<[1], [0], [0], [1], [0, 0, 1, 1], [], []>} : vector<8x256xbf16>, vector<256x512xbf16>, vector<8x512xf32> -> vector<8x512xf32>
    %c0_26 = arith.constant 0 : index
    %c0_27 = arith.constant 0 : index
    %49 = vector.load %arg8[%c0_26, %c0_27] : memref<1x512xf32, #tpu.memory_space<vmem>>, vector<1x512xf32>
    %50 = vector.broadcast %49 : vector<1x512xf32> to vector<8x512xf32>
    %51 = arith.addf %48, %50 : vector<8x512xf32>
    %c0_28 = arith.constant 0 : index
    %c0_29 = arith.constant 0 : index
    %52 = vector.load %arg9[%c0_28, %c0_29] : memref<1x512xf32, #tpu.memory_space<vmem>>, vector<1x512xf32>
    %c0_30 = arith.constant 0 : index
    %c0_31 = arith.constant 0 : index
    %53 = vector.load %arg10[%c0_30, %c0_31] : memref<1x512xf32, #tpu.memory_space<vmem>>, vector<1x512xf32>
    %cst_32 = arith.constant dense<0.000000e+00> : vector<512xf32>
    %54 = vector.multi_reduction <add>, %51, %cst_32 [0] : vector<8x512xf32> to vector<512xf32>
    %55 = vector.shape_cast %54 : vector<512xf32> to vector<1x512xf32>
    %56 = arith.mulf %51, %51 : vector<8x512xf32>
    %cst_33 = arith.constant dense<0.000000e+00> : vector<512xf32>
    %57 = vector.multi_reduction <add>, %56, %cst_33 [0] : vector<8x512xf32> to vector<512xf32>
    %58 = vector.shape_cast %57 : vector<512xf32> to vector<1x512xf32>
    %cst_34 = arith.constant 1.250000e-01 : f32
    %59 = vector.broadcast %cst_34 : f32 to vector<1x512xf32>
    %60 = arith.mulf %55, %59 : vector<1x512xf32>
    %cst_35 = arith.constant 1.250000e-01 : f32
    %61 = vector.broadcast %cst_35 : f32 to vector<1x512xf32>
    %62 = arith.mulf %58, %61 : vector<1x512xf32>
    %63 = arith.mulf %60, %60 : vector<1x512xf32>
    %64 = arith.subf %62, %63 : vector<1x512xf32>
    %cst_36 = arith.constant 8.000000e-01 : f32
    %65 = vector.broadcast %cst_36 : f32 to vector<1x512xf32>
    %66 = arith.addf %64, %65 : vector<1x512xf32>
    %67 = math.rsqrt %66 : vector<1x512xf32>
    %68 = arith.mulf %67, %52 : vector<1x512xf32>
    %69 = arith.mulf %60, %68 : vector<1x512xf32>
    %70 = arith.subf %53, %69 : vector<1x512xf32>
    %71 = vector.broadcast %68 : vector<1x512xf32> to vector<8x512xf32>
    %72 = arith.mulf %51, %71 : vector<8x512xf32>
    %73 = vector.broadcast %70 : vector<1x512xf32> to vector<8x512xf32>
    %74 = arith.addf %72, %73 : vector<8x512xf32>
    %cst_37 = arith.constant 0.000000e+00 : f32
    %75 = vector.broadcast %cst_37 : f32 to vector<8x512xf32>
    %76 = arith.cmpf ogt, %74, %75 : vector<8x512xf32>
    %cst_38 = arith.constant 2.000000e-01 : f32
    %77 = vector.broadcast %cst_38 : f32 to vector<8x512xf32>
    %78 = arith.mulf %77, %74 : vector<8x512xf32>
    %79 = arith.select %76, %74, %78 : vector<8x512xi1>, vector<8x512xf32>
    %c0_39 = arith.constant 0 : index
    %c0_40 = arith.constant 0 : index
    %80 = vector.load %arg11[%c0_39, %c0_40] : memref<512x1024xbf16, #tpu.memory_space<vmem>>, vector<512x1024xbf16>
    %81 = arith.truncf %79 : vector<8x512xf32> to vector<8x512xbf16>
    %cst_41 = arith.constant dense<0.000000e+00> : vector<8x1024xf32>
    %82 = tpu.matmul %81, %80, %cst_41 {dimension_numbers = #tpu.dot_dimension_numbers<[1], [0], [0], [1], [0, 0, 1, 1], [], []>} : vector<8x512xbf16>, vector<512x1024xbf16>, vector<8x1024xf32> -> vector<8x1024xf32>
    %c0_42 = arith.constant 0 : index
    %c0_43 = arith.constant 0 : index
    %83 = vector.load %arg12[%c0_42, %c0_43] : memref<1x1024xf32, #tpu.memory_space<vmem>>, vector<1x1024xf32>
    %84 = vector.broadcast %83 : vector<1x1024xf32> to vector<8x1024xf32>
    %85 = arith.addf %82, %84 : vector<8x1024xf32>
    %c0_44 = arith.constant 0 : index
    %c0_45 = arith.constant 0 : index
    %86 = vector.load %arg13[%c0_44, %c0_45] : memref<1x1024xf32, #tpu.memory_space<vmem>>, vector<1x1024xf32>
    %c0_46 = arith.constant 0 : index
    %c0_47 = arith.constant 0 : index
    %87 = vector.load %arg14[%c0_46, %c0_47] : memref<1x1024xf32, #tpu.memory_space<vmem>>, vector<1x1024xf32>
    %cst_48 = arith.constant dense<0.000000e+00> : vector<1024xf32>
    %88 = vector.multi_reduction <add>, %85, %cst_48 [0] : vector<8x1024xf32> to vector<1024xf32>
    %89 = vector.shape_cast %88 : vector<1024xf32> to vector<1x1024xf32>
    %90 = arith.mulf %85, %85 : vector<8x1024xf32>
    %cst_49 = arith.constant dense<0.000000e+00> : vector<1024xf32>
    %91 = vector.multi_reduction <add>, %90, %cst_49 [0] : vector<8x1024xf32> to vector<1024xf32>
    %92 = vector.shape_cast %91 : vector<1024xf32> to vector<1x1024xf32>
    %cst_50 = arith.constant 1.250000e-01 : f32
    %93 = vector.broadcast %cst_50 : f32 to vector<1x1024xf32>
    %94 = arith.mulf %89, %93 : vector<1x1024xf32>
    %cst_51 = arith.constant 1.250000e-01 : f32
    %95 = vector.broadcast %cst_51 : f32 to vector<1x1024xf32>
    %96 = arith.mulf %92, %95 : vector<1x1024xf32>
    %97 = arith.mulf %94, %94 : vector<1x1024xf32>
    %98 = arith.subf %96, %97 : vector<1x1024xf32>
    %cst_52 = arith.constant 8.000000e-01 : f32
    %99 = vector.broadcast %cst_52 : f32 to vector<1x1024xf32>
    %100 = arith.addf %98, %99 : vector<1x1024xf32>
    %101 = math.rsqrt %100 : vector<1x1024xf32>
    %102 = arith.mulf %101, %86 : vector<1x1024xf32>
    %103 = arith.mulf %94, %102 : vector<1x1024xf32>
    %104 = arith.subf %87, %103 : vector<1x1024xf32>
    %105 = vector.broadcast %102 : vector<1x1024xf32> to vector<8x1024xf32>
    %106 = arith.mulf %85, %105 : vector<8x1024xf32>
    %107 = vector.broadcast %104 : vector<1x1024xf32> to vector<8x1024xf32>
    %108 = arith.addf %106, %107 : vector<8x1024xf32>
    %cst_53 = arith.constant 0.000000e+00 : f32
    %109 = vector.broadcast %cst_53 : f32 to vector<8x1024xf32>
    %110 = arith.cmpf ogt, %108, %109 : vector<8x1024xf32>
    %cst_54 = arith.constant 2.000000e-01 : f32
    %111 = vector.broadcast %cst_54 : f32 to vector<8x1024xf32>
    %112 = arith.mulf %111, %108 : vector<8x1024xf32>
    %113 = arith.select %110, %108, %112 : vector<8x1024xi1>, vector<8x1024xf32>
    %c0_55 = arith.constant 0 : index
    %c0_56 = arith.constant 0 : index
    %114 = vector.load %arg15[%c0_55, %c0_56] : memref<1024x128xbf16, #tpu.memory_space<vmem>>, vector<1024x128xbf16>
    %115 = arith.truncf %113 : vector<8x1024xf32> to vector<8x1024xbf16>
    %cst_57 = arith.constant dense<0.000000e+00> : vector<8x128xf32>
    %116 = tpu.matmul %115, %114, %cst_57 {dimension_numbers = #tpu.dot_dimension_numbers<[1], [0], [0], [1], [0, 0, 1, 1], [], []>} : vector<8x1024xbf16>, vector<1024x128xbf16>, vector<8x128xf32> -> vector<8x128xf32>
    %c0_58 = arith.constant 0 : index
    %c0_59 = arith.constant 0 : index
    %117 = vector.load %arg16[%c0_58, %c0_59] : memref<1x128xf32, #tpu.memory_space<vmem>>, vector<1x128xf32>
    %118 = vector.broadcast %117 : vector<1x128xf32> to vector<8x128xf32>
    %119 = arith.addf %116, %118 : vector<8x128xf32>
    %120 = math.tanh %119 : vector<8x128xf32>
    %c0_60 = arith.constant 0 : index
    %c0_61 = arith.constant 0 : index
    %121 = vector.load %arg17[%c0_60, %c0_61] : memref<8x128xf32, #tpu.memory_space<vmem>>, vector<8x128xf32>
    tpu.vector_store %arg17[%c0_60, %c0_61], %120 {strides = array<i32>} : memref<8x128xf32, #tpu.memory_space<vmem>>, vector<8x128xf32>,
    return
  }
}

</mosaic_0001>

<bundles_post_ra>
// kernel: tpu_custom_call.1
= control target key start
LH: loop header
LB: loop body
LE: loop exit
PB: predicated region body
PF: predicated region fallthrough
CT: control target
= control target key end

     0   :  { %s7160_s0 = inlined_call_operand.hbm [shape: f32[8,32], index: 0, kind: input, shape index: {}]   ;;  %s7161_s1 = inlined_call_operand.hbm [shape: bf16[32,128], index: 1, kind: input, shape index: {}]   ;;  %s7162_s2 = inlined_call_operand.vmem [shape: f32[1,128], index: 2, kind: input, shape index: {}]   ;;  %s7163_s3 = inlined_call_operand.hbm [shape: bf16[128,256], index: 3, kind: input, shape index: {}]   ;;  %s7164_s4 = inlined_call_operand.vmem [shape: f32[1,256], index: 4, kind: input, shape index: {}]   ;;  %s7165_s5 = inlined_call_operand.hbm [shape: f32[1,256], index: 5, kind: input, shape index: {}]   ;;  %s7166_s6 = inlined_call_operand.hbm [shape: f32[1,256], index: 6, kind: input, shape index: {}]   ;;  %s7167_s7 = inlined_call_operand.hbm [shape: bf16[256,512], index: 7, kind: input, shape index: {}]   ;;  %s7168_s8 = inlined_call_operand.hbm [shape: f32[1,512], index: 8, kind: input, shape index: {}]   ;;  %s7169_s9 = inlined_call_operand.hbm [shape: f32[1,512], index: 9, kind: input, shape index: {}]   ;;  %s7170_s10 = inlined_call_operand.hbm [shape: f32[1,512], index: 10, kind: input, shape index: {}]   ;;  %s7171_s11 = inlined_call_operand.hbm [shape: bf16[512,1024], index: 11, kind: input, shape index: {}]   ;;  %s7172_s12 = inlined_call_operand.vmem [shape: f32[1,1024], index: 12, kind: input, shape index: {}]   ;;  %s7173_s13 = inlined_call_operand.hbm [shape: f32[1,1024], index: 13, kind: input, shape index: {}]   ;;  %s7174_s14 = inlined_call_operand.hbm [shape: f32[1,1024], index: 14, kind: input, shape index: {}]   ;;  %s7175_s15 = inlined_call_operand.hbm [shape: bf16[1024,128], index: 15, kind: input, shape index: {}]   ;;  %s7176_s16 = inlined_call_operand.vmem [shape: f32[1,128], index: 16, kind: input, shape index: {}]   ;;  %s7177_s17 = inlined_call_operand.hbm [shape: f32[8,128], index: 17, kind: output, shape index: {}]  }
   0x1   :  { %7179 = sst [smem:[#allocation32_spill]] %s7160_s0 }
   0x2   :  { %7180 = sst [smem:[#allocation33_spill]] %s7161_s1 }
   0x3   :  { %7181 = sst [smem:[#allocation34_spill]] %s7177_s17 }
   0x4   :  { %22 = vsyncpa [#allocation3], 0 }
   0x5   :  { %23 = vsyncpa [#allocation6], 0 }
   0x6   :  { %24 = vsyncpa [#allocation9], 0 }
   0x7   :  { %25 = vsyncpa [#allocation12], 0 }
   0x8   :  { %26 = vsyncpa [#allocation15], 0 }
   0x9   :  { %27 = vsyncpa [#allocation18], 0 }
   0xa   :  { %28 = vsyncpa [#allocation21], 0  ;;  %s7182_s26 = sld [smem:[#allocation33_spill]] }
  0x10   :  { %s45_s27 = sshll.u32 %s7182_s26, 4  ;;  %s46_s27 = int_to_ptr.hbm [resolvable:$true] %s45_s27 }
  0x11   :  { %29 = vsyncpa [#allocation4], 0  ;;  %s6581_s28 = smov [#allocation5]   ;;  %s76_s18 = sshll.u32 %s7165_s5, 4  ;;  %s77_s18 = int_to_ptr.hbm [resolvable:$true] %s76_s18 }
  0x12   :  { %s47_s29 = sshll.u32 %s6581_s28, 4  ;;  %s7178_s19 = smov 64   ;;  %s48_s29 = int_to_ptr.vmem [resolvable:$true] %s47_s29 }
  0x13   :  { %s6583_s1 = smov 4   ;;  %s6584_s20 = smov [#allocation8]  }
  0x14   :  { %53 = dma.hbm_to_vmem [thread:$0]  %s46_s27, 256, %s48_s29, [#allocation6], %s7178_s19, %s7178_s19, %s6583_s1  }
  0x15   :  { %s78_s21 = sshll.u32 %s6584_s20, 4  ;;  %s97_s24 = sshll.u32 %s7167_s7, 4  ;;  %s79_s21 = int_to_ptr.vmem [resolvable:$true] %s78_s21  ;;  %s98_s24 = int_to_ptr.hbm [resolvable:$true] %s97_s24 }
  0x16   :  { %81 = dma.hbm_to_vmem [thread:$0]  %s77_s18, 32, %s79_s21, [#allocation9]  }
  0x17   :  { %s6585_s25 = smov [#allocation11]   ;;  %s122_s0 = sshll.u32 %s7169_s9, 4  ;;  %s123_s0 = int_to_ptr.hbm [resolvable:$true] %s122_s0 }
  0x18   :  { %s99_s26 = sshll.u32 %s6585_s25, 4  ;;  %s6586_s30 = smov 256   ;;  %s100_s26 = int_to_ptr.vmem [resolvable:$true] %s99_s26 }
  0x19   :  { %s6587_s17 = smov 16   ;;  %s6588_s27 = smov [#allocation14]  }
  0x1a   :  { %105 = dma.hbm_to_vmem [thread:$0]  %s98_s24, 8192, %s100_s26, [#allocation12], %s6586_s30, %s6586_s30, %s6587_s17  }
  0x1b   :  { %s124_s29 = sshll.u32 %s6588_s27, 4  ;;  %s143_s7 = sshll.u32 %s7171_s11, 4  ;;  %s125_s29 = int_to_ptr.vmem [resolvable:$true] %s124_s29  ;;  %s144_s7 = int_to_ptr.hbm [resolvable:$true] %s143_s7 }
  0x1c   :  { %127 = dma.hbm_to_vmem [thread:$0]  %s123_s0, 64, %s125_s29, [#allocation15]  }
  0x1d   :  { %s6589_s18 = smov [#allocation17]   ;;  %s170_s9 = sshll.u32 %s7174_s14, 4  ;;  %s171_s9 = int_to_ptr.hbm [resolvable:$true] %s170_s9 }
  0x1e   :  { %s145_s21 = sshll.u32 %s6589_s18, 4  ;;  %s6590_s25 = smov 512   ;;  %s146_s21 = int_to_ptr.vmem [resolvable:$true] %s145_s21 }
  0x1f   :  { %s6591_s5 = smov 32   ;;  %s6592_s17 = smov [#allocation20]  }
  0x20   :  { %151 = dma.hbm_to_vmem [thread:$0]  %s144_s7, 32768, %s146_s21, [#allocation18], %s6590_s25, %s6590_s25, %s6591_s5  }
  0x21   :  { %s172_s24 = sshll.u32 %s6592_s17, 4  ;;  %s7183_s19 = sld [smem:[#allocation32_spill]]  ;;  %s173_s24 = int_to_ptr.vmem [resolvable:$true] %s172_s24 }
  0x22   :  { %175 = dma.hbm_to_vmem [thread:$0]  %s171_s9, 128, %s173_s24, [#allocation21]  }
  0x23   :  { %s60_s27 = sshll.u32 %s7163_s3, 4  ;;  %s6593_s29 = smov [#allocation2]   ;;  %s61_s27 = int_to_ptr.hbm [resolvable:$true] %s60_s27 }
  0x24   :  { %s37_s20 = sshll.u32 %s6593_s29, 4  ;;  %s6594_s14 = smov [#allocation7]   ;;  %s38_s20 = int_to_ptr.vmem [resolvable:$true] %s37_s20 }
  0x25   :  { %s62_s7 = sshll.u32 %s6594_s14, 4  ;;  %s6595_s18 = smov 128   ;;  %s63_s7 = int_to_ptr.vmem [resolvable:$true] %s62_s7 }
  0x26   :  { %s6596_s21 = smov 8   ;;  %s87_s25 = sshll.u32 %s7166_s6, 4  ;;  %s88_s25 = int_to_ptr.hbm [resolvable:$true] %s87_s25 }
  0x27   :  { %s35_s11 = sshll.u32 %s7183_s19, 4  ;;  %s6597_s9 = smov [#allocation10]   ;;  %s36_s11 = int_to_ptr.hbm [resolvable:$true] %s35_s11 }
  0x28   :  { %40 = dma.hbm_to_vmem [thread:$0]  %s36_s11, 128, %s38_s20, [#allocation3]  }
  0x29   :  { %68 = dma.hbm_to_vmem [thread:$0]  %s61_s27, 2048, %s63_s7, [#allocation6], %s6595_s18, %s6595_s18, %s6596_s21  }
  0x2a   :  { %s89_s5 = sshll.u32 %s6597_s9, 4  ;;  %s111_s24 = sshll.u32 %s7168_s8, 4  ;;  %s90_s5 = int_to_ptr.vmem [resolvable:$true] %s89_s5  ;;  %s112_s24 = int_to_ptr.hbm [resolvable:$true] %s111_s24 }
  0x2b   :  { %92 = dma.hbm_to_vmem [thread:$0]  %s88_s25, 32, %s90_s5, [#allocation9]  }
  0x2c   :  { %s6598_s26 = smov [#allocation13]   ;;  %s133_s0 = sshll.u32 %s7170_s10, 4  ;;  %s134_s0 = int_to_ptr.hbm [resolvable:$true] %s133_s0 }
  0x2d   :  { %s113_s28 = sshll.u32 %s6598_s26, 4  ;;  %s159_s27 = sshll.u32 %s7173_s13, 4  ;;  %s114_s28 = int_to_ptr.vmem [resolvable:$true] %s113_s28  ;;  %s160_s27 = int_to_ptr.hbm [resolvable:$true] %s159_s27 }
  0x2e   :  { %116 = dma.hbm_to_vmem [thread:$0]  %s112_s24, 64, %s114_s28, [#allocation12]  }
  0x2f   :  { %s6599_s29 = smov [#allocation16]   ;;  %s6600_s8 = smov [#allocation19]  }
  0x30   :  { %s135_s20 = sshll.u32 %s6599_s29, 4  ;;  %s161_s14 = sshll.u32 %s6600_s8, 4  ;;  %s136_s20 = int_to_ptr.vmem [resolvable:$true] %s135_s20  ;;  %s162_s14 = int_to_ptr.vmem [resolvable:$true] %s161_s14 }
  0x31   :  { %138 = dma.hbm_to_vmem [thread:$0]  %s134_s0, 64, %s136_s20, [#allocation15]  }
  0x32   :  { %s180_s21 = sshll.u32 %s7175_s15, 4  ;;  %s6601_s10 = smov [#allocation22]   ;;  %s181_s21 = int_to_ptr.hbm [resolvable:$true] %s180_s21 }
  0x33   :  { %164 = dma.hbm_to_vmem [thread:$0]  %s160_s27, 128, %s162_s14, [#allocation18]  }
  0x34   :  { %s182_s22 = sshll.u32 %s6601_s10, 4  ;;  %s7184_s23 = smov 64   ;;  %s183_s22 = int_to_ptr.vmem [resolvable:$true] %s182_s22 }
  0x35   :  { %188 = dma.hbm_to_vmem [thread:$0]  %s181_s21, 8192, %s183_s22, [#allocation21], %s7184_s23, %s7184_s23, %s6583_s1  }
  0x36   :  { %6565 = dma.done.wait [#allocation3], 128  }
  0x37   :  { %6566 = vsyncadd [#allocation3], 4294967168 }
  0x38   :  { %6567 = dma.done.wait [#allocation6], 2304  }
  0x39   :  { %6568 = vsyncadd [#allocation6], 4294964992 }
  0x3a   :  { %6569 = dma.done.wait [#allocation9], 64  }
  0x3b   :  { %6570 = vsyncadd [#allocation9], 4294967232 }
  0x3c   :  { %6571 = dma.done.wait [#allocation12], 8256  }
  0x3d   :  { %6572 = vsyncadd [#allocation12], 4294959040 }
  0x3e   :  { %6573 = dma.done.wait [#allocation15], 128  }
  0x3f   :  { %6574 = vsyncadd [#allocation15], 4294967168 }
  0x40   :  { %6575 = dma.done.wait [#allocation18], 32896  }
  0x41   :  { %6576 = vsyncadd [#allocation18], 4294934400 }
  0x42   :  { %6577 = dma.done.wait [#allocation21], 8320  }
  0x43   :  { %6578 = vsyncadd [#allocation21], 4294958976  ;;  %v5773_v0 = vld [vmem:[#allocation5 + $0x8] sm:$0xff]  ;;  %v5772_v1 = vld [vmem:[#allocation5] sm:$0xff]  ;;  %vm266_vm0 = vcmask 261120   ;;  %vm485_vm8 = vcmask 1040384  }
  0x44   :  { %v244_v2 = vld [vmem:[#allocation2] sm:$0xff]  ;;  %v4230_v3 = vld [vmem:[#allocation7 + $0x70] sm:$0xf]  ;;  %v5789_v4 = vld [vmem:[#allocation7 + $0x74] sm:$0xf0]  ;;  %276 = vmatpush.bf16.msra.mxu0 %v5773_v0  ;;  %s7191_s28 = sld [smem:[#allocation34_spill]] }
  0x45   :  { %v5788_v5 = vld [vmem:[#allocation7 + $0x74] sm:$0xf]  ;;  %v4231_v6 = vor.u32 %v5789_v4, %v4230_v3  ;;  %v4232_v7 = vld [vmem:[#allocation7 + $0x78] sm:$0xf0]  ;;  %v4222_v8 = vld [vmem:[#allocation7 + $0x60] sm:$0xf]  ;;  %v249_v14 = vpack.c.bf16 %v244_v2, %v244_v2 }
  0x46   :  { %v5787_v9 = vld [vmem:[#allocation7 + $0x64] sm:$0xf0]  ;;  %v4235_v10 = vor.u32 %v5788_v5, %v4232_v7  ;;  %v5786_v11 = vld [vmem:[#allocation7 + $0x64] sm:$0xf]  ;;  %v4224_v12 = vld [vmem:[#allocation7 + $0x68] sm:$0xf0] }
  0x47   :  { %389 = vmatpush.bf16.msra.mxu1 %v4231_v6  ;;  %v4223_v13 = vor.u32 %v5787_v9, %v4222_v8  ;;  %v4227_v15 = vor.u32 %v5786_v11, %v4224_v12  ;;  %v4214_v16 = vld [vmem:[#allocation7 + $0x50] sm:$0xf]  ;;  %v5785_v17 = vld [vmem:[#allocation7 + $0x54] sm:$0xf0]  ;;  %v5784_v18 = vld [vmem:[#allocation7 + $0x54] sm:$0xf] }
  0x48   :  { %402 = vmatpush.bf16.msra.mxu2 %v4235_v10  ;;  %277 = vmatpush.bf16.msra.mxu0 %v5772_v1  ;;  %v4216_v19 = vld [vmem:[#allocation7 + $0x58] sm:$0xf0]  ;;  %v4215_v20 = vor.u32 %v5785_v17, %v4214_v16  ;;  %v4206_v21 = vld [vmem:[#allocation7 + $0x40] sm:$0xf]  ;;  %v5783_v23 = vld [vmem:[#allocation7 + $0x44] sm:$0xf0] }
  0x49   :  { %v4219_v22 = vor.u32 %v5784_v18, %v4216_v19  ;;  %v5782_v24 = vld [vmem:[#allocation7 + $0x44] sm:$0xf]  ;;  %v4208_v25 = vld [vmem:[#allocation7 + $0x48] sm:$0xf0]  ;;  %v4207_v26 = vor.u32 %v5783_v23, %v4206_v21  ;;  %v4198_v28 = vld [vmem:[#allocation7 + $0x30] sm:$0xf] }
  0x4a   :  { %v4211_v27 = vor.u32 %v5782_v24, %v4208_v25  ;;  %v5781_v29 = vld [vmem:[#allocation7 + $0x34] sm:$0xf0]  ;;  %v5780_v30 = vld [vmem:[#allocation7 + $0x34] sm:$0xf]  ;;  %v4200_v31 = vld [vmem:[#allocation7 + $0x38] sm:$0xf0] }
  0x4b   :  { %390 = vmatpush.bf16.msra.mxu1 %v4223_v13  ;;  %4171 = vmatmul.msk.bf16.vlgmr.msra.gmra.mxu0 %vm266_vm0, %v249_v14  ;;  %v4199_v32 = vor.u32 %v5781_v29, %v4198_v28  ;;  %v4203_v33 = vor.u32 %v5780_v30, %v4200_v31  ;;  %v4190_v34 = vld [vmem:[#allocation7 + $0x20] sm:$0xf]  ;;  %v5779_v35 = vld [vmem:[#allocation7 + $0x24] sm:$0xf0]  ;;  %v5778_v36 = vld [vmem:[#allocation7 + $0x24] sm:$0xf] }
  0x4c   :  { %403 = vmatpush.bf16.msra.mxu2 %v4227_v15  ;;  %v4192_v37 = vld [vmem:[#allocation7 + $0x28] sm:$0xf0]  ;;  %v4191_v38 = vor.u32 %v5779_v35, %v4190_v34  ;;  %v4182_v40 = vld [vmem:[#allocation7 + $0x10] sm:$0xf]  ;;  %v5777_v41 = vld [vmem:[#allocation7 + $0x14] sm:$0xf0] }
  0x4d   :  { %v4195_v39 = vor.u32 %v5778_v36, %v4192_v37  ;;  %v5776_v42 = vld [vmem:[#allocation7 + $0x14] sm:$0xf]  ;;  %v4183_v43 = vor.u32 %v5777_v41, %v4182_v40  ;;  %v4184_v44 = vld [vmem:[#allocation7 + $0x18] sm:$0xf0]  ;;  %v4174_v46 = vld [vmem:[#allocation7] sm:$0xf] }
  0x4e   :  { %v4187_v45 = vor.u32 %v5776_v42, %v4184_v44  ;;  %v5775_v47 = vld [vmem:[#allocation7 + $0x4] sm:$0xf0]  ;;  %v5774_v48 = vld [vmem:[#allocation7 + $0x4] sm:$0xf]  ;;  %v4176_v50 = vld [vmem:[#allocation7 + $0x8] sm:$0xf0] }
  0x4f   :  { %391 = vmatpush.bf16.msra.mxu1 %v4215_v20  ;;  %v4175_v49 = vor.u32 %v5775_v47, %v4174_v46  ;;  %v4179_v51 = vor.u32 %v5774_v48, %v4176_v50  ;;  %v6196_v52 = vld [vmem:[%s7162_s2] ss:$0 sm:$0xff]  ;;  %v4350_v59 = vld [vmem:[#allocation11 + $0xe0] sm:$0xf]  ;;  %v5820_v60 = vld [vmem:[#allocation11 + $0xec] sm:$0xf0] }
  0x50   :  { %404 = vmatpush.bf16.msra.mxu2 %v4219_v22  ;;  %v4478_v61 = vld [vmem:[#allocation11 + $0x1e0] sm:$0xf]  ;;  %v4351_v62 = vor.u32 %v5820_v60, %v4350_v59  ;;  %v5852_v63 = vld [vmem:[#allocation11 + $0x1ec] sm:$0xf0]  ;;  %v5818_v0 = vld [vmem:[#allocation11 + $0xe4] sm:$0xf] }
  0x51   :  { %v4352_v1 = vld [vmem:[#allocation11 + $0xf0] sm:$0xf0]  ;;  %v4479_v2 = vor.u32 %v5852_v63, %v4478_v61  ;;  %v5850_v4 = vld [vmem:[#allocation11 + $0x1e4] sm:$0xf]  ;;  %v4334_v7 = vld [vmem:[#allocation11 + $0xc0] sm:$0xf] }
  0x52   :  { %v4355_v3 = vor.u32 %v5818_v0, %v4352_v1  ;;  %v4480_v5 = vld [vmem:[#allocation11 + $0x1f0] sm:$0xf0]  ;;  %902 = vmatpush.bf16.msra.mxu3 %v4351_v62  ;;  %v5816_v8 = vld [vmem:[#allocation11 + $0xcc] sm:$0xf0]  ;;  %v4462_v9 = vld [vmem:[#allocation11 + $0x1c0] sm:$0xf] }
  0x53   :  { %392 = vmatpush.bf16.msra.mxu1 %v4207_v26  ;;  %v4483_v6 = vor.u32 %v5850_v4, %v4480_v5  ;;  %915 = vmatpush.bf16.msrb.mxu0 %v4479_v2  ;;  %v4335_v10 = vor.u32 %v5816_v8, %v4334_v7  ;;  %v5848_v11 = vld [vmem:[#allocation11 + $0x1cc] sm:$0xf0]  ;;  %v5814_v12 = vld [vmem:[#allocation11 + $0xc4] sm:$0xf]  ;;  %v4336_v13 = vld [vmem:[#allocation11 + $0xd0] sm:$0xf0] }
  0x54   :  { %405 = vmatpush.bf16.msra.mxu2 %v4211_v27  ;;  %v4463_v14 = vor.u32 %v5848_v11, %v4462_v9  ;;  %v4339_v15 = vor.u32 %v5814_v12, %v4336_v13  ;;  %v5846_v16 = vld [vmem:[#allocation11 + $0x1c4] sm:$0xf]  ;;  %v4464_v17 = vld [vmem:[#allocation11 + $0x1d0] sm:$0xf0]  ;;  %v4318_v20 = vld [vmem:[#allocation11 + $0xa0] sm:$0xf] }
  0x55   :  { %v6744_v18 = vld [vmem:[%s7164_s4] sm:$0x3]  ;;  %v4467_v19 = vor.u32 %v5846_v16, %v4464_v17  ;;  %v5812_v21 = vld [vmem:[#allocation11 + $0xac] sm:$0xf0]  ;;  %v4446_v22 = vld [vmem:[#allocation11 + $0x1a0] sm:$0xf] }
  0x56   :  { %903 = vmatpush.bf16.msra.mxu3 %v4335_v10  ;;  %v4319_v23 = vor.u32 %v5812_v21, %v4318_v20  ;;  %v5844_v24 = vld [vmem:[#allocation11 + $0x1ac] sm:$0xf0]  ;;  %v5810_v25 = vld [vmem:[#allocation11 + $0xa4] sm:$0xf]  ;;  %v4320_v26 = vld [vmem:[#allocation11 + $0xb0] sm:$0xf0] }
  0x57   :  { %393 = vmatpush.bf16.msra.mxu1 %v4199_v32  ;;  %916 = vmatpush.bf16.msrb.mxu0 %v4463_v14  ;;  %v4447_v27 = vor.u32 %v5844_v24, %v4446_v22  ;;  %v4323_v28 = vor.u32 %v5810_v25, %v4320_v26  ;;  %v5842_v29 = vld [vmem:[#allocation11 + $0x1a4] sm:$0xf]  ;;  %v4448_v30 = vld [vmem:[#allocation11 + $0x1b0] sm:$0xf0]  ;;  %v305_v31 = vperm.slane %v6744_v18, 0  ;;  %s4147_s19 = sshll.u32 %s7191_s28, 4  ;;  %s4148_s19 = int_to_ptr.hbm [resolvable:$true] %s4147_s19 }
  0x58   :  { %406 = vmatpush.bf16.msra.mxu2 %v4203_v33  ;;  %v4451_v32 = vor.u32 %v5842_v29, %v4448_v30  ;;  %v4302_v33 = vld [vmem:[#allocation11 + $0x80] sm:$0xf]  ;;  %v5808_v34 = vld [vmem:[#allocation11 + $0x8c] sm:$0xf0]  ;;  %v4432_v44 = vld [vmem:[#allocation11 + $0x190] sm:$0xf0] }
  0x59   :  { %v4430_v35 = vld [vmem:[#allocation11 + $0x180] sm:$0xf]  ;;  %v4303_v36 = vor.u32 %v5808_v34, %v4302_v33  ;;  %v5840_v37 = vld [vmem:[#allocation11 + $0x18c] sm:$0xf0]  ;;  %v4416_v59 = vld [vmem:[#allocation11 + $0x170] sm:$0xf0] }
  0x5a   :  { %904 = vmatpush.bf16.msra.mxu3 %v4319_v23  ;;  %v4431_v41 = vor.u32 %v5840_v37, %v4430_v35  ;;  %v4286_v47 = vld [vmem:[#allocation11 + $0x60] sm:$0xf]  ;;  %v5804_v48 = vld [vmem:[#allocation11 + $0x6c] sm:$0xf0]  ;;  %v5798_v8 = vld [vmem:[#allocation11 + $0x44] sm:$0xf] }
  0x5b   :  { %394 = vmatpush.bf16.msra.mxu1 %v4191_v38  ;;  %917 = vmatpush.bf16.msrb.mxu0 %v4447_v27  ;;  %v5806_v38 = vld [vmem:[#allocation11 + $0x84] sm:$0xf]  ;;  %v4270_v1 = vld [vmem:[#allocation11 + $0x40] sm:$0xf]  ;;  %v5800_v2 = vld [vmem:[#allocation11 + $0x4c] sm:$0xf0] }
  0x5c   :  { %407 = vmatpush.bf16.msra.mxu2 %v4195_v39  ;;  %v4304_v39 = vld [vmem:[#allocation11 + $0x90] sm:$0xf0]  ;;  %v5832_v7 = vld [vmem:[#allocation11 + $0x14c] sm:$0xf0]  ;;  %v4271_v10 = vor.u32 %v5800_v2, %v4270_v1  ;;  %v5830_v13 = vld [vmem:[#allocation11 + $0x144] sm:$0xf] }
  0x5d   :  { %v4307_v42 = vor.u32 %v5806_v38, %v4304_v39  ;;  %v4272_v12 = vld [vmem:[#allocation11 + $0x50] sm:$0xf0]  ;;  %v4254_v21 = vld [vmem:[#allocation11 + $0x20] sm:$0xf]  ;;  %v5796_v22 = vld [vmem:[#allocation11 + $0x2c] sm:$0xf0] }
  0x5e   :  { %905 = vmatpush.bf16.msra.mxu3 %v4303_v36  ;;  %v4400_v14 = vld [vmem:[#allocation11 + $0x150] sm:$0xf0]  ;;  %v4382_v23 = vld [vmem:[#allocation11 + $0x120] sm:$0xf]  ;;  %v5794_v29 = vld [vmem:[#allocation11 + $0x24] sm:$0xf]  ;;  %v4255_v30 = vor.u32 %v5796_v22, %v4254_v21 }
  0x5f   :  { %395 = vmatpush.bf16.msra.mxu1 %v4183_v43  ;;  %v5838_v43 = vld [vmem:[#allocation11 + $0x184] sm:$0xf]  ;;  %918 = vmatpush.bf16.msrb.mxu0 %v4431_v41  ;;  %v4403_v20 = vor.u32 %v5830_v13, %v4400_v14  ;;  %v4384_v34 = vld [vmem:[#allocation11 + $0x130] sm:$0xf0]  ;;  %v4486_v1 = vld [vmem:[#allocation11 + $0x1e8] sm:$0xf] }
  0x60   :  { %408 = vmatpush.bf16.msra.mxu2 %v4187_v45  ;;  %v4435_v46 = vor.u32 %v5838_v43, %v4432_v44  ;;  %v5826_v33 = vld [vmem:[#allocation11 + $0x124] sm:$0xf]  ;;  %v5792_v43 = vld [vmem:[#allocation11 + $0xc] sm:$0xf0]  ;;  %v5853_v2 = vld [vmem:[#allocation11 + $0x1f4] sm:$0xf0] }
  0x61   :  { %v4387_v41 = vor.u32 %v5826_v33, %v4384_v34  ;;  %v4488_v13 = vld [vmem:[#allocation11 + $0x1f8] sm:$0xf0]  ;;  %v4342_v14 = vld [vmem:[#allocation11 + $0xc8] sm:$0xf]  ;;  %v5849_v22 = vld [vmem:[#allocation11 + $0x1d4] sm:$0xf0] }
  0x62   :  { %v4470_v21 = vld [vmem:[#allocation11 + $0x1c8] sm:$0xf] }
  0x63   :  { %396 = vmatpush.bf16.msra.mxu1 %v4175_v49  ;;  %v4414_v49 = vld [vmem:[#allocation11 + $0x160] sm:$0xf] }
  0x64   :  { %409 = vmatpush.bf16.msra.mxu2 %v4179_v51 }
  0x67   :  { %928 = vmatpush.bf16.msrb.mxu1 %v4355_v3  ;;  %v4398_v3 = vld [vmem:[#allocation11 + $0x140] sm:$0xf] }
  0x68   :  { %941 = vmatpush.bf16.msrb.mxu2 %v4483_v6  ;;  %v4399_v11 = vor.u32 %v5832_v7, %v4398_v3  ;;  %v5819_v7 = vld [vmem:[#allocation11 + $0xec] sm:$0xf] }
  0x6b   :  { %929 = vmatpush.bf16.msrb.mxu1 %v4339_v15 }
  0x6c   :  { %942 = vmatpush.bf16.msrb.mxu2 %v4467_v19  ;;  %v4275_v19 = vor.u32 %v5798_v8, %v4272_v12  ;;  %v4360_v8 = vld [vmem:[#allocation11 + $0xf8] sm:$0xf0]  ;;  %v5851_v12 = vld [vmem:[#allocation11 + $0x1ec] sm:$0xf] }
  0x6f   :  { %930 = vmatpush.bf16.msrb.mxu1 %v4323_v28  ;;  %v5828_v28 = vld [vmem:[#allocation11 + $0x12c] sm:$0xf0] }
  0x70   :  { %943 = vmatpush.bf16.msrb.mxu2 %v4451_v32  ;;  %v4256_v32 = vld [vmem:[#allocation11 + $0x30] sm:$0xf0] }
  0x73   :  { %931 = vmatpush.bf16.msrb.mxu1 %v4307_v42  ;;  %v4238_v42 = vld [vmem:[#allocation11] sm:$0xf] }
  0x74   :  { %944 = vmatpush.bf16.msrb.mxu2 %v4435_v46 }
  0xc8   :  { %v279_v53 = vpop.f32.mrf.mxu0 }
  0xc9   :  { %v280_v54 = vadd.f32 %v6196_v52, %v279_v53  ;;  %v306_v52 = vperm.slane %v6744_v18, 1  ;;  %v4287_v53 = vor.u32 %v5804_v48, %v4286_v47 }
  0xcb   :  { %v284_v55 = vmul.f32 0.2, %v280_v54  ;;  %vm283_vm1 = vcmp.gt.f32.partialorder %v280_v54, 0.0  ;;  %906 = vmatpush.bf16.msra.mxu3 %v4287_v53  ;;  %v5790_v53 = vld [vmem:[#allocation11 + $0x4] sm:$0xf] }
  0xcd   :  { %v285_v56 = vsel %vm283_vm1, %v280_v54, %v284_v55  ;;  %v5836_v54 = vld [vmem:[#allocation11 + $0x16c] sm:$0xf0]  ;;  %v5802_v55 = vld [vmem:[#allocation11 + $0x64] sm:$0xf] }
  0xce   :  { %v302_v57 = vpack.c.bf16 %v285_v56, %v285_v56  ;;  %v4415_v56 = vor.u32 %v5836_v54, %v4414_v49  ;;  %v4366_v49 = vld [vmem:[#allocation11 + $0x100] sm:$0xf]  ;;  %v4240_v54 = vld [vmem:[#allocation11 + $0x10] sm:$0xf0] }
  0xcf   :  { %907 = vmatpush.bf16.msra.mxu3 %v4271_v10  ;;  %v4487_v10 = vor.u32 %v5853_v2, %v4486_v1  ;;  %v4422_v1 = vld [vmem:[#allocation11 + $0x168] sm:$0xf]  ;;  %v5837_v2 = vld [vmem:[#allocation11 + $0x174] sm:$0xf0] }
  0xd0   :  { %v281_v58 = vpop.f32.mrf.mxu0  ;;  %397 = vmatmul.bf16.vlgmr.msra.gmra.mxu1 %v302_v57  ;;  %410 = vmatmul.bf16.vlgmr.msra.gmra.mxu2 %v302_v57  ;;  %v4288_v57 = vld [vmem:[#allocation11 + $0x70] sm:$0xf0] }
  0xd1   :  { %v5834_v58 = vld [vmem:[#allocation11 + $0x164] sm:$0xf]  ;;  %v4291_v62 = vor.u32 %v5802_v55, %v4288_v57  ;;  %919 = vmatpush.bf16.msrb.mxu0 %v4415_v56 }
  0xd2   :  { %v4419_v63 = vor.u32 %v5834_v58, %v4416_v59  ;;  %v5822_v55 = vld [vmem:[#allocation11 + $0x104] sm:$0xf] }
  0xd3   :  { %932 = vmatpush.bf16.msrb.mxu1 %v4291_v62  ;;  %908 = vmatpush.bf16.msra.mxu3 %v4255_v30  ;;  %v4243_v62 = vor.u32 %v5790_v53, %v4240_v54  ;;  %v4472_v30 = vld [vmem:[#allocation11 + $0x1d8] sm:$0xf0] }
  0xd4   :  { %945 = vmatpush.bf16.msrb.mxu2 %v4419_v63  ;;  %v4312_v54 = vld [vmem:[#allocation11 + $0x98] sm:$0xf0] }
  0xd5   :  { %920 = vmatpush.bf16.msrb.mxu0 %v4399_v11  ;;  %v4363_v11 = vor.u32 %v5819_v7, %v4360_v8  ;;  %v4423_v8 = vor.u32 %v5837_v2, %v4422_v1 }
  0xd7   :  { %933 = vmatpush.bf16.msrb.mxu1 %v4275_v19  ;;  %v5817_v19 = vld [vmem:[#allocation11 + $0xd4] sm:$0xf0] }
  0xd8   :  { %946 = vmatpush.bf16.msrb.mxu2 %v4403_v20  ;;  %v4343_v20 = vor.u32 %v5817_v19, %v4342_v14  ;;  %v4278_v14 = vld [vmem:[#allocation11 + $0x48] sm:$0xf] }
  0xdc   :  { %947 = vmatpush.bf16.msrb.mxu2 %v4387_v41  ;;  %v5843_v41 = vld [vmem:[#allocation11 + $0x1ac] sm:$0xf] }
 0x14d   :  { %v398_v40 = vpop.f32.mrf.mxu1 }
 0x14e   :  { %v6747_v45 = vadd.f32 %v398_v40, %v305_v31  ;;  %v4383_v31 = vor.u32 %v5828_v28, %v4382_v23  ;;  %v4259_v40 = vor.u32 %v5794_v29, %v4256_v32  ;;  %v5815_v23 = vld [vmem:[#allocation11 + $0xcc] sm:$0xf]  ;;  %v4471_v28 = vor.u32 %v5849_v22, %v4470_v21  ;;  %v5813_v32 = vld [vmem:[#allocation11 + $0xb4] sm:$0xf0] }
 0x14f   :  { %v5833_v21 = vld [vmem:[#allocation11 + $0x154] sm:$0xf0]  ;;  %v5799_v22 = vld [vmem:[#allocation11 + $0x4c] sm:$0xf] }
 0x150   :  { %v417_v50 = vrot.slane %v6747_v45, 4  ;;  %v429_v51 = vmul.f32 %v6747_v45, %v6747_v45  ;;  %921 = vmatpush.bf16.msrb.mxu0 %v4383_v31  ;;  %934 = vmatpush.bf16.msrb.mxu1 %v4259_v40  ;;  %v4326_v31 = vld [vmem:[#allocation11 + $0xa8] sm:$0xf]  ;;  %v4328_v40 = vld [vmem:[#allocation11 + $0xb8] sm:$0xf0] }
 0x152   :  { %v418_v60 = vadd.f32 %v417_v50, %v6747_v45  ;;  %v431_v61 = vrot.slane %v429_v51, 4  ;;  %v5824_v50 = vld [vmem:[#allocation11 + $0x10c] sm:$0xf0] }
 0x153   :  { %v411_v0 = vpop.f32.mrf.mxu2 }
 0x154   :  { %v419_v4 = vrot.slane %v418_v60, 2  ;;  %v432_v5 = vadd.f32 %v431_v61, %v429_v51  ;;  %v6754_v6 = vadd.f32 %v411_v0, %v306_v52  ;;  %v4239_v51 = vor.u32 %v5792_v43, %v4238_v42  ;;  %v4358_v61 = vld [vmem:[#allocation11 + $0xe8] sm:$0xf]  ;;  %v5821_v0 = vld [vmem:[#allocation11 + $0xf4] sm:$0xf0]  ;;  %935 = vmatpush.bf16.msrb.mxu1 %v4243_v62 }
 0x155   :  { %v400_v9 = vpop.f32.mrf.mxu1  ;;  %v4367_v52 = vor.u32 %v5824_v50, %v4366_v49  ;;  %v4456_v42 = vld [vmem:[#allocation11 + $0x1b8] sm:$0xf0]  ;;  %v5809_v49 = vld [vmem:[#allocation11 + $0x94] sm:$0xf0]  ;;  %v4438_v50 = vld [vmem:[#allocation11 + $0x188] sm:$0xf] }
 0x156   :  { %v420_v15 = vadd.f32 %v419_v4, %v418_v60  ;;  %v433_v16 = vrot.slane %v432_v5, 2  ;;  %v423_v17 = vrot.slane %v6754_v6, 4  ;;  %v430_v18 = vmul.f32 %v6754_v6, %v6754_v6  ;;  %v4368_v60 = vld [vmem:[#allocation11 + $0x110] sm:$0xf0]  ;;  %909 = vmatpush.bf16.msra.mxu3 %v4239_v51  ;;  %v5841_v51 = vld [vmem:[#allocation11 + $0x194] sm:$0xf0] }
 0x157   :  { %922 = vmatpush.bf16.msrb.mxu0 %v4367_v52  ;;  %v4371_v63 = vor.u32 %v5822_v55, %v4368_v60  ;;  %v4359_v9 = vor.u32 %v5821_v0, %v4358_v61  ;;  %v5807_v52 = vld [vmem:[#allocation11 + $0x8c] sm:$0xf]  ;;  %v5805_v0 = vld [vmem:[#allocation11 + $0x74] sm:$0xf0] }
 0x158   :  { %v421_v24 = vrot.slane %v420_v15, 1  ;;  %v434_v25 = vadd.f32 %v433_v16, %v432_v5  ;;  %v424_v26 = vadd.f32 %v423_v17, %v6754_v6  ;;  %v437_v27 = vrot.slane %v430_v18, 4  ;;  %980 = vmatpush.bf16.msra.mxu1 %v4363_v11  ;;  %v5839_v55 = vld [vmem:[#allocation11 + $0x18c] sm:$0xf] }
 0x159   :  { %948 = vmatpush.bf16.msrb.mxu2 %v4371_v63  ;;  %v4315_v60 = vor.u32 %v5807_v52, %v4312_v54  ;;  %v4294_v63 = vld [vmem:[#allocation11 + $0x68] sm:$0xf]  ;;  %v5793_v52 = vld [vmem:[#allocation11 + $0x14] sm:$0xf0] }
 0x15a   :  { %v422_v35 = vadd.f32 %v421_v24, %v420_v15  ;;  %v435_v36 = vrot.slane %v434_v25, 1  ;;  %v425_v37 = vrot.slane %v424_v26, 2  ;;  %v438_v38 = vadd.f32 %v437_v27, %v430_v18  ;;  %954 = vmatpush.bf16.msrb.mxu3 %v4359_v9  ;;  %v5847_v27 = vld [vmem:[#allocation11 + $0x1cc] sm:$0xf] }
 0x15b   :  { %v413_v39 = vpop.f32.mrf.mxu2  ;;  %v4491_v18 = vor.u32 %v5851_v12, %v4488_v13  ;;  %967 = vmatpush.bf16.msra.mxu0 %v4487_v10  ;;  %v4475_v34 = vor.u32 %v5847_v27, %v4472_v30  ;;  %v4295_v7 = vor.u32 %v5805_v0, %v4294_v63  ;;  %v5835_v9 = vld [vmem:[#allocation11 + $0x16c] sm:$0xf]  ;;  %v4424_v10 = vld [vmem:[#allocation11 + $0x178] sm:$0xf0] }
 0x15c   :  { %v436_v44 = vadd.f32 %v435_v36, %v434_v25  ;;  %v6760_v46 = vmul.f32 0.125, %v422_v35  ;;  %v426_v47 = vadd.f32 %v425_v37, %v424_v26  ;;  %v439_v48 = vrot.slane %v438_v38, 2  ;;  %v4344_v26 = vld [vmem:[#allocation11 + $0xd8] sm:$0xf0]  ;;  %v4454_v35 = vld [vmem:[#allocation11 + $0x1a8] sm:$0xf] }
 0x15d   :  { %993 = vmatpush.bf16.msra.mxu2 %v4491_v18  ;;  %v4347_v29 = vor.u32 %v5815_v23, %v4344_v26  ;;  %v5845_v36 = vld [vmem:[#allocation11 + $0x1b4] sm:$0xf0]  ;;  %v5811_v37 = vld [vmem:[#allocation11 + $0xac] sm:$0xf]  ;;  %v4427_v13 = vor.u32 %v5835_v9, %v4424_v10  ;;  %v4406_v18 = vld [vmem:[#allocation11 + $0x148] sm:$0xf] }
 0x15e   :  { %v445_v56 = vmul.f32 0.125, %v436_v44  ;;  %v447_v57 = vmul.f32 %v6760_v46, %v6760_v46  ;;  %v427_v58 = vrot.slane %v426_v47, 1  ;;  %v440_v59 = vadd.f32 %v439_v48, %v438_v38  ;;  %955 = vmatpush.bf16.msrb.mxu3 %v4343_v20  ;;  %v4310_v48 = vld [vmem:[#allocation11 + $0x88] sm:$0xf]  ;;  %v415_v23 = vld [vmem:[#allocation8] sm:$0x3] }
 0x15f   :  { %968 = vmatpush.bf16.msra.mxu0 %v4471_v28  ;;  %v4327_v38 = vor.u32 %v5813_v32, %v4326_v31  ;;  %v4455_v39 = vor.u32 %v5845_v36, %v4454_v35  ;;  %981 = vmatpush.bf16.msra.mxu1 %v4347_v29  ;;  %v4331_v44 = vor.u32 %v5811_v37, %v4328_v40  ;;  %v5831_v26 = vld [vmem:[#allocation11 + $0x14c] sm:$0xf]  ;;  %v4408_v30 = vld [vmem:[#allocation11 + $0x158] sm:$0xf0]  ;;  %v4262_v31 = vld [vmem:[#allocation11 + $0x28] sm:$0xf] }
 0x160   :  { %v449_v3 = vsub.f32 %v445_v56, %v447_v57  ;;  %v428_v4 = vadd.f32 %v427_v58, %v426_v47  ;;  %v441_v5 = vrot.slane %v440_v59, 1  ;;  %v4459_v47 = vor.u32 %v5843_v41, %v4456_v42  ;;  %v4440_v56 = vld [vmem:[#allocation11 + $0x198] sm:$0xf0]  ;;  %v5797_v32 = vld [vmem:[#allocation11 + $0x34] sm:$0xf0] }
 0x161   :  { %994 = vmatpush.bf16.msra.mxu2 %v4475_v34  ;;  %v4311_v58 = vor.u32 %v5809_v49, %v4310_v48  ;;  %v4443_v61 = vor.u32 %v5839_v55, %v4440_v56  ;;  %v4407_v29 = vor.u32 %v5833_v21, %v4406_v18  ;;  %v4411_v34 = vor.u32 %v5831_v26, %v4408_v30  ;;  %v4390_v35 = vld [vmem:[#allocation11 + $0x128] sm:$0xf]  ;;  %v5829_v36 = vld [vmem:[#allocation11 + $0x134] sm:$0xf0]  ;;  %v5795_v37 = vld [vmem:[#allocation11 + $0x2c] sm:$0xf] }
 0x162   :  { %v6764_v15 = vadd.f32 0.8, %v449_v3  ;;  %v442_v16 = vadd.f32 %v441_v5, %v440_v59  ;;  %v6766_v17 = vmul.f32 0.125, %v428_v4  ;;  %956 = vmatpush.bf16.msrb.mxu3 %v4327_v38  ;;  %v4439_v59 = vor.u32 %v5841_v51, %v4438_v50  ;;  %v5803_v3 = vld [vmem:[#allocation11 + $0x6c] sm:$0xf] }
 0x163   :  { %969 = vmatpush.bf16.msra.mxu0 %v4455_v39  ;;  %982 = vmatpush.bf16.msra.mxu1 %v4331_v44  ;;  %v4296_v4 = vld [vmem:[#allocation11 + $0x78] sm:$0xf0]  ;;  %v5827_v40 = vld [vmem:[#allocation11 + $0x12c] sm:$0xf]  ;;  %v474_v42 = vperm.slane %v415_v23, 0  ;;  %v475_v44 = vperm.slane %v415_v23, 1  ;;  %v4391_v50 = vor.u32 %v5829_v36, %v4390_v35 }
 0x164   :  { %6198 = vrsqrt.f32 %v6764_v15  ;;  %v446_v24 = vmul.f32 0.125, %v442_v16  ;;  %v448_v25 = vmul.f32 %v6766_v17, %v6766_v17  ;;  %v4299_v12 = vor.u32 %v5803_v3, %v4296_v4  ;;  %v5801_v16 = vld [vmem:[#allocation11 + $0x54] sm:$0xf0]  ;;  %v4264_v39 = vld [vmem:[#allocation11 + $0x38] sm:$0xf0] }
 0x165   :  { %995 = vmatpush.bf16.msra.mxu2 %v4459_v47  ;;  %vm459_vm3 = vweird.f32 %v6764_v15  ;;  %v4392_v47 = vld [vmem:[#allocation11 + $0x138] sm:$0xf0]  ;;  %v4246_v51 = vld [vmem:[#allocation11 + $0x8] sm:$0xf]  ;;  %v4267_v54 = vor.u32 %v5795_v37, %v4264_v39  ;;  %v4686_v35 = vld [vmem:[#allocation17 + $0x180] sm:$0xf] }
 0x166   :  { %v450_v33 = vsub.f32 %v446_v24, %v448_v25  ;;  %957 = vmatpush.bf16.msrb.mxu3 %v4311_v58  ;;  %v4279_v24 = vor.u32 %v5801_v16, %v4278_v14  ;;  %v4280_v25 = vld [vmem:[#allocation11 + $0x58] sm:$0xf0]  ;;  %v4395_v55 = vor.u32 %v5827_v40, %v4392_v47  ;;  %v4374_v56 = vld [vmem:[#allocation11 + $0x108] sm:$0xf]  ;;  %v5791_v58 = vld [vmem:[#allocation11 + $0xc] sm:$0xf]  ;;  %v4247_v0 = vor.u32 %v5793_v52, %v4246_v51 }
 0x167   :  { %970 = vmatpush.bf16.msra.mxu0 %v4439_v59  ;;  %983 = vmatpush.bf16.msra.mxu1 %v4315_v60  ;;  %v4248_v60 = vld [vmem:[#allocation11 + $0x18] sm:$0xf0]  ;;  %v5906_v36 = vld [vmem:[#allocation17 + $0x19c] sm:$0xf0] }
 0x168   :  { %v6771_v43 = vadd.f32 0.8, %v450_v33  ;;  %v4283_v33 = vor.u32 %v5799_v22, %v4280_v25  ;;  %v4251_v3 = vor.u32 %v5791_v58, %v4248_v60  ;;  %v4974_v25 = vld [vmem:[#allocation17 + $0x3c0] sm:$0xf] }
 0x169   :  { %996 = vmatpush.bf16.msra.mxu2 %v4443_v61  ;;  %v4376_v61 = vld [vmem:[#allocation11 + $0x118] sm:$0xf0]  ;;  %v4942_v37 = vld [vmem:[#allocation17 + $0x380] sm:$0xf] }
 0x16a   :  { %v6773_v53 = vpop.eup %6198  ;;  %6200 = vrsqrt.f32 %v6771_v43  ;;  %958 = vmatpush.bf16.msrb.mxu3 %v4295_v7  ;;  %vm469_vm6 = vweird.f32 %v6771_v43  ;;  %v416_v7 = vld [vmem:[#allocation10] sm:$0x3]  ;;  %v5970_v39 = vld [vmem:[#allocation17 + $0x39c] sm:$0xf0] }
 0x16b   :  { %v454_v57 = vmul.f32 %v6773_v53, %v6764_v15  ;;  %vm460_vm2 = vweird.f32 %v6773_v53  ;;  %971 = vmatpush.bf16.msra.mxu0 %v4423_v8  ;;  %984 = vmatpush.bf16.msra.mxu1 %v4299_v12  ;;  %v4263_v15 = vor.u32 %v5797_v32, %v4262_v31  ;;  %v5486_v32 = vld [vmem:[#allocation17 + $0x7c0] sm:$0xf] }
 0x16c   :  { %vm6789_vm4 = vmor %vm459_vm3, %vm460_vm2  ;;  %v5198_v40 = vld [vmem:[#allocation17 + $0x580] sm:$0xf] }
 0x16d   :  { %v455_v62 = vmul.f32 %v6773_v53, %v454_v57  ;;  %997 = vmatpush.bf16.msra.mxu2 %v4427_v13  ;;  %v5825_v57 = vld [vmem:[#allocation11 + $0x114] sm:$0xf0]  ;;  %v6034_v41 = vld [vmem:[#allocation17 + $0x59c] sm:$0xf0] }
 0x16e   :  { %959 = vmatpush.bf16.msrb.mxu3 %v4279_v24  ;;  %v4375_v1 = vor.u32 %v5825_v57, %v4374_v56  ;;  %v5454_v47 = vld [vmem:[#allocation17 + $0x780] sm:$0xf] }
 0x16f   :  { %v456_v5 = vmul.f32 0.5, %v455_v62  ;;  %972 = vmatpush.bf16.msra.mxu0 %v4407_v29  ;;  %985 = vmatpush.bf16.msra.mxu1 %v4283_v33  ;;  %v6042_v29 = vld [vmem:[#allocation17 + $0x5dc] sm:$0xf0] }
 0x170   :  { %v6779_v11 = vpop.eup %6200  ;;  %v6106_v33 = vld [vmem:[#allocation17 + $0x7dc] sm:$0xf0] }
 0x171   :  { %v457_v19 = vsub.f32 1.5, %v456_v5  ;;  %v464_v20 = vmul.f32 %v6779_v11, %v6771_v43  ;;  %vm470_vm5 = vweird.f32 %v6779_v11  ;;  %998 = vmatpush.bf16.msra.mxu2 %v4411_v34  ;;  %v5487_v34 = vor.u32 %v6106_v33, %v5486_v32  ;;  %v4654_v51 = vld [vmem:[#allocation17 + $0x140] sm:$0xf] }
 0x172   :  { %vm471_vm7 = vmor %vm469_vm6, %vm470_vm5  ;;  %960 = vmatpush.bf16.msrb.mxu3 %v4263_v15  ;;  %v5898_v52 = vld [vmem:[#allocation17 + $0x15c] sm:$0xf0] }
 0x173   :  { %v458_v27 = vmul.f32 %v6773_v53, %v457_v19  ;;  %v465_v28 = vmul.f32 %v6779_v11, %v464_v20  ;;  %973 = vmatpush.bf16.msra.mxu0 %v4391_v50  ;;  %986 = vmatpush.bf16.msra.mxu1 %v4267_v54  ;;  %v4910_v54 = vld [vmem:[#allocation17 + $0x340] sm:$0xf]  ;;  %v4655_v56 = vor.u32 %v5898_v52, %v4654_v51 }
 0x174   :  { %v5962_v57 = vld [vmem:[#allocation17 + $0x35c] sm:$0xf0] }
 0x175   :  { %v466_v38 = vmul.f32 0.5, %v465_v28  ;;  %v462_v48 = vsel %vm6789_vm4, %v6773_v53, %v458_v27  ;;  %v5823_v53 = vld [vmem:[#allocation11 + $0x10c] sm:$0xf]  ;;  %999 = vmatpush.bf16.msra.mxu2 %v4395_v55 }
 0x176   :  { %v478_v62 = vmul.f32 %v474_v42, %v462_v48  ;;  %v4379_v4 = vor.u32 %v5823_v53, %v4376_v61  ;;  %961 = vmatpush.bf16.msrb.mxu3 %v4247_v0  ;;  %v5978_v27 = vld [vmem:[#allocation17 + $0x3dc] sm:$0xf0]  ;;  %v4943_v42 = vor.u32 %v5970_v39, %v4942_v37  ;;  %v4911_v53 = vor.u32 %v5962_v57, %v4910_v54 }
 0x177   :  { %v467_v49 = vsub.f32 1.5, %v466_v38  ;;  %974 = vmatpush.bf16.msra.mxu0 %v4375_v1  ;;  %987 = vmatpush.bf16.msra.mxu1 %v4251_v3  ;;  %v5230_v28 = vld [vmem:[#allocation17 + $0x5c0] sm:$0xf]  ;;  %v4975_v30 = vor.u32 %v5978_v27, %v4974_v25  ;;  %v4687_v38 = vor.u32 %v5906_v36, %v4686_v35 }
 0x178   :  { %v480_v5 = vmul.f32 %v478_v62, %v6760_v46  ;;  %v489_v9 = vperm.slane %v478_v62, 0  ;;  %v5231_v31 = vor.u32 %v6042_v29, %v5230_v28  ;;  %v6098_v48 = vld [vmem:[#allocation17 + $0x79c] sm:$0xf0] }
 0x179   :  { %v468_v59 = vmul.f32 %v6779_v11, %v467_v49  ;;  %1000 = vmatpush.bf16.msra.mxu2 %v4379_v4  ;;  %v6807_v49 = vld [vmem:[#allocation13] sm:$0xf]  ;;  %v5455_v15 = vor.u32 %v6098_v48, %v5454_v47  ;;  %v5166_v58 = vld [vmem:[#allocation17 + $0x540] sm:$0xf] }
 0x17a   :  { %v491_v13 = vmul.f32 %v489_v9, %v6747_v45  ;;  %v4718_v45 = vld [vmem:[#allocation17 + $0x1c0] sm:$0xf]  ;;  %v575_v60 = vperm.slane %v6807_v49, 1  ;;  %v574_v0 = vperm.slane %v6807_v49, 0 }
 0x17b   :  { %v472_v63 = vsel %vm471_vm7, %v6779_v11, %v468_v59  ;;  %v6026_v59 = vld [vmem:[#allocation17 + $0x55c] sm:$0xf0]  ;;  %vm1145_vm7 = vcmask 1042434  }
 0x17c   :  { %v479_v2 = vmul.f32 %v475_v44, %v472_v63  ;;  %v5199_v44 = vor.u32 %v6034_v41, %v5198_v40  ;;  %v5167_v61 = vor.u32 %v6026_v59, %v5166_v58  ;;  %v5422_v62 = vld [vmem:[#allocation17 + $0x740] sm:$0xf] }
 0x17d   :  { %v6090_v63 = vld [vmem:[#allocation17 + $0x75c] sm:$0xf0] }
 0x17e   :  { %v481_v43 = vmul.f32 %v479_v2, %v6766_v17  ;;  %v490_v10 = vperm.slane %v479_v2, 0  ;;  %v5423_v1 = vor.u32 %v6090_v63, %v5422_v62  ;;  %v4622_v2 = vld [vmem:[#allocation17 + $0x100] sm:$0xf] }
 0x17f   :  { %v5890_v3 = vld [vmem:[#allocation17 + $0x11c] sm:$0xf0] }
 0x180   :  { %v484_v8 = vrot.slane %v481_v43, 7  ;;  %v492_v14 = vmul.f32 %v490_v10, %v6754_v6  ;;  %v5914_v6 = vld [vmem:[#allocation17 + $0x1dc] sm:$0xf0]  ;;  %v4623_v43 = vor.u32 %v5890_v3, %v4622_v2 }
 0x181   :  { %v4719_v26 = vor.u32 %v5914_v6, %v4718_v45  ;;  %v4878_v4 = vld [vmem:[#allocation17 + $0x300] sm:$0xf] }
 0x182   :  { %v486_v11 = vsel %vm485_vm8, %v480_v5, %v484_v8  ;;  %v5954_v5 = vld [vmem:[#allocation17 + $0x31c] sm:$0xf0] }
 0x183   :  { %v488_v12 = vsub.f32 %v416_v7, %v486_v11  ;;  %v5134_v7 = vld [vmem:[#allocation17 + $0x500] sm:$0xf]  ;;  %v4879_v11 = vor.u32 %v5954_v5, %v4878_v4 }
 0x184   :  { %v6018_v8 = vld [vmem:[#allocation17 + $0x51c] sm:$0xf0] }
 0x185   :  { %v495_v16 = vperm.slane %v488_v12, 1  ;;  %v494_v17 = vperm.slane %v488_v12, 0  ;;  %v5135_v12 = vor.u32 %v6018_v8, %v5134_v7  ;;  %v5946_v6 = vld [vmem:[#allocation17 + $0x2dc] sm:$0xf0] }
 0x186   :  { %v5102_v25 = vld [vmem:[#allocation17 + $0x4c0] sm:$0xf] }
 0x187   :  { %v499_v18 = vadd.f32 %v495_v16, %v492_v14  ;;  %v498_v19 = vadd.f32 %v494_v17, %v491_v13  ;;  %v5390_v13 = vld [vmem:[#allocation17 + $0x700] sm:$0xf] }
 0x188   :  { %v6082_v14 = vld [vmem:[#allocation17 + $0x71c] sm:$0xf0] }
 0x189   :  { %vm500_vm9 = vcmp.gt.f32.partialorder %v498_v19, 0.0  ;;  %v502_v20 = vmul.f32 0.2, %v498_v19  ;;  %vm501_vm10 = vcmp.gt.f32.partialorder %v499_v18, 0.0  ;;  %v503_v46 = vmul.f32 0.2, %v499_v18 }
 0x18a   :  { %v6074_v32 = vld [vmem:[#allocation17 + $0x6dc] sm:$0xf0] }
 0x18b   :  { %v504_v21 = vsel %vm500_vm9, %v498_v19, %v502_v20  ;;  %v505_v22 = vsel %vm501_vm10, %v499_v18, %v503_v46  ;;  %v5391_v18 = vor.u32 %v6082_v14, %v5390_v13  ;;  %v4590_v46 = vld [vmem:[#allocation17 + $0xc0] sm:$0xf]  ;;  %vm1147_vm9 = vcmask 1041408  }
 0x18c   :  { %v570_v23 = vpack.c.bf16 %v504_v21, %v504_v21  ;;  %v571_v24 = vpack.c.bf16 %v505_v22, %v505_v22  ;;  %v5882_v21 = vld [vmem:[#allocation17 + $0xdc] sm:$0xf0] }
 0x18d   :  { %v4846_v22 = vld [vmem:[#allocation17 + $0x2c0] sm:$0xf]  ;;  %v4591_v45 = vor.u32 %v5882_v21, %v4590_v46 }
 0x18e   :  { %910 = vmatmul.bf16.vlgmr.msra.gmra.mxu3 %v570_v23  ;;  %923 = vmatmul.bf16.vlgmr.msrb.gmra.mxu0 %v571_v24  ;;  %v4847_v29 = vor.u32 %v5946_v6, %v4846_v22  ;;  %v5874_v39 = vld [vmem:[#allocation17 + $0x9c] sm:$0xf0] }
 0x18f   :  { %936 = vmatmul.bf16.vlgmr.msrb.gmra.mxu1 %v570_v23  ;;  %949 = vmatmul.bf16.vlgmr.msrb.gmra.mxu2 %v571_v24  ;;  %v5938_v47 = vld [vmem:[#allocation17 + $0x29c] sm:$0xf0] }
 0x190   :  { %2742 = vmatpush.bf16.msra.mxu3 %v4719_v26  ;;  %2755 = vmatpush.bf16.msrb.mxu0 %v4975_v30  ;;  %v6010_v26 = vld [vmem:[#allocation17 + $0x4dc] sm:$0xf0] }
 0x191   :  { %2768 = vmatpush.bf16.msrb.mxu1 %v5231_v31  ;;  %2781 = vmatpush.bf16.msrb.mxu2 %v5487_v34  ;;  %v5103_v30 = vor.u32 %v6010_v26, %v5102_v25  ;;  %v5358_v31 = vld [vmem:[#allocation17 + $0x6c0] sm:$0xf] }
 0x192   :  { %v5359_v35 = vor.u32 %v6074_v32, %v5358_v31  ;;  %v5070_v52 = vld [vmem:[#allocation17 + $0x480] sm:$0xf] }
 0x193   :  { %v6002_v54 = vld [vmem:[#allocation17 + $0x49c] sm:$0xf0] }
 0x194   :  { %2743 = vmatpush.bf16.msra.mxu3 %v4687_v38  ;;  %2756 = vmatpush.bf16.msrb.mxu0 %v4943_v42  ;;  %v4558_v38 = vld [vmem:[#allocation17 + $0x80] sm:$0xf]  ;;  %v5071_v58 = vor.u32 %v6002_v54, %v5070_v52  ;;  %v4720_v52 = vld [vmem:[#allocation17 + $0x1e0] sm:$0xf0] }
 0x195   :  { %2769 = vmatpush.bf16.msrb.mxu1 %v5199_v44  ;;  %2782 = vmatpush.bf16.msrb.mxu2 %v5455_v15  ;;  %v4559_v42 = vor.u32 %v5874_v39, %v4558_v38  ;;  %v4814_v44 = vld [vmem:[#allocation17 + $0x280] sm:$0xf] }
 0x196   :  { %v4815_v51 = vor.u32 %v5938_v47, %v4814_v44  ;;  %v5326_v59 = vld [vmem:[#allocation17 + $0x680] sm:$0xf] }
 0x197   :  { %v4782_v5 = vld [vmem:[#allocation17 + $0x240] sm:$0xf] }
 0x198   :  { %2744 = vmatpush.bf16.msra.mxu3 %v4655_v56  ;;  %2757 = vmatpush.bf16.msrb.mxu0 %v4911_v53  ;;  %v5930_v7 = vld [vmem:[#allocation17 + $0x25c] sm:$0xf0] }
 0x199   :  { %2770 = vmatpush.bf16.msrb.mxu1 %v5167_v61  ;;  %2783 = vmatpush.bf16.msrb.mxu2 %v5423_v1  ;;  %v5866_v1 = vld [vmem:[#allocation17 + $0x5c] sm:$0xf0] }
 0x19a   :  { %v5994_v13 = vld [vmem:[#allocation17 + $0x45c] sm:$0xf0] }
 0x19b   :  { %v6058_v46 = vld [vmem:[#allocation17 + $0x65c] sm:$0xf0] }
 0x19c   :  { %2745 = vmatpush.bf16.msra.mxu3 %v4623_v43  ;;  %2758 = vmatpush.bf16.msrb.mxu0 %v4879_v11  ;;  %v4783_v11 = vor.u32 %v5930_v7, %v4782_v5  ;;  %v5858_v6 = vld [vmem:[#allocation17 + $0x1c] sm:$0xf0]  ;;  %v6102_v5 = vld [vmem:[#allocation17 + $0x7c4] sm:$0xf] }
 0x19d   :  { %2771 = vmatpush.bf16.msrb.mxu1 %v5135_v12  ;;  %2784 = vmatpush.bf16.msrb.mxu2 %v5391_v18  ;;  %v5038_v12 = vld [vmem:[#allocation17 + $0x440] sm:$0xf]  ;;  %v5488_v7 = vld [vmem:[#allocation17 + $0x7e0] sm:$0xf0] }
 0x19e   :  { %962 = vmatmul.bf16.vlgmr.msrb.gmra.mxu3 %v570_v23  ;;  %975 = vmatmul.bf16.vlgmr.msra.gmra.mxu0 %v571_v24  ;;  %v5039_v18 = vor.u32 %v5994_v13, %v5038_v12  ;;  %v5902_v12 = vld [vmem:[#allocation17 + $0x184] sm:$0xf] }
 0x19f   :  { %988 = vmatmul.bf16.vlgmr.msra.gmra.mxu1 %v570_v23  ;;  %1001 = vmatmul.bf16.vlgmr.msra.gmra.mxu2 %v571_v24 }
 0x1a0   :  { %2746 = vmatpush.bf16.msra.mxu3 %v4591_v45  ;;  %2759 = vmatpush.bf16.msrb.mxu0 %v4847_v29  ;;  %v4494_v45 = vld [vmem:[#allocation17] sm:$0xf] }
 0x1a1   :  { %2772 = vmatpush.bf16.msrb.mxu1 %v5103_v30  ;;  %2785 = vmatpush.bf16.msrb.mxu2 %v5359_v35  ;;  %v5922_v29 = vld [vmem:[#allocation17 + $0x21c] sm:$0xf0] }
 0x1a2   :  { %v5986_v35 = vld [vmem:[#allocation17 + $0x41c] sm:$0xf0] }
 0x1a4   :  { %2747 = vmatpush.bf16.msra.mxu3 %v4559_v42  ;;  %2760 = vmatpush.bf16.msrb.mxu0 %v4815_v51  ;;  %v6050_v42 = vld [vmem:[#allocation17 + $0x61c] sm:$0xf0]  ;;  %v5910_v51 = vld [vmem:[#allocation17 + $0x1c4] sm:$0xf] }
 0x1a5   :  { %2773 = vmatpush.bf16.msrb.mxu1 %v5071_v58  ;;  %v4723_v58 = vor.u32 %v5910_v51, %v4720_v52 }
 0x1a8   :  { %2761 = vmatpush.bf16.msrb.mxu0 %v4783_v11  ;;  %v5491_v11 = vor.u32 %v6102_v5, %v5488_v7 }
 0x1a9   :  { %2774 = vmatpush.bf16.msrb.mxu1 %v5039_v18 }
 0x20b   :  { %v924_v50 = vpop.f32.mrf.mxu0 }
 0x20c   :  { %v937_v55 = vpop.f32.mrf.mxu1 }
 0x20d   :  { %v938_v9 = vadd.f32 %v937_v55, %v575_v60  ;;  %v6066_v60 = vld [vmem:[#allocation17 + $0x69c] sm:$0xf0] }
 0x20e   :  { %v5327_v63 = vor.u32 %v6066_v60, %v5326_v59  ;;  %v5974_v59 = vld [vmem:[#allocation17 + $0x3c4] sm:$0xf] }
 0x20f   :  { %v4976_v60 = vld [vmem:[#allocation17 + $0x3e0] sm:$0xf0] }
 0x210   :  { %2786 = vmatpush.bf16.msrb.mxu2 %v5327_v63 }
 0x211   :  { %v911_v10 = vpop.f32.mrf.mxu3 }
 0x212   :  { %v912_v16 = vadd.f32 %v911_v10, %v574_v0  ;;  %v950_v17 = vpop.f32.mrf.mxu2  ;;  %v4526_v0 = vld [vmem:[#allocation17 + $0x40] sm:$0xf]  ;;  %v577_v10 = vperm.slane %v6807_v49, 3 }
 0x213   :  { %v6811_v19 = vadd.f32 %v950_v17, %v938_v9  ;;  %v926_v20 = vpop.f32.mrf.mxu0  ;;  %v4527_v43 = vor.u32 %v5866_v1, %v4526_v0  ;;  %v576_v17 = vperm.slane %v6807_v49, 2  ;;  %v4979_v0 = vor.u32 %v5974_v59, %v4976_v60  ;;  %v6038_v1 = vld [vmem:[#allocation17 + $0x5c4] sm:$0xf] }
 0x214   :  { %v6813_v23 = vadd.f32 %v924_v50, %v912_v16  ;;  %v939_v24 = vpop.f32.mrf.mxu1  ;;  %v5294_v20 = vld [vmem:[#allocation17 + $0x640] sm:$0xf] }
 0x215   :  { %v1014_v27 = vrot.slane %v6811_v19, 4  ;;  %v1033_v28 = vmul.f32 %v6811_v19, %v6811_v19  ;;  %2748 = vmatpush.bf16.msra.mxu3 %v4527_v43  ;;  %v5295_v24 = vor.u32 %v6058_v46, %v5294_v20 }
 0x216   :  { %v1008_v33 = vrot.slane %v6813_v23, 4  ;;  %v1032_v34 = vmul.f32 %v6813_v23, %v6813_v23 }
 0x217   :  { %v1015_v36 = vadd.f32 %v1014_v27, %v6811_v19  ;;  %v1042_v37 = vrot.slane %v1033_v28, 4  ;;  %v4495_v27 = vor.u32 %v5858_v6, %v4494_v45  ;;  %2787 = vmatpush.bf16.msrb.mxu2 %v5295_v24 }
 0x218   :  { %v1009_v40 = vadd.f32 %v1008_v33, %v6813_v23  ;;  %v1036_v41 = vrot.slane %v1032_v34, 4 }
 0x219   :  { %v1016_v48 = vrot.slane %v1015_v36, 2  ;;  %v1043_v15 = vadd.f32 %v1042_v37, %v1033_v28  ;;  %v913_v50 = vpop.f32.mrf.mxu3  ;;  %v4750_v28 = vld [vmem:[#allocation17 + $0x200] sm:$0xf]  ;;  %2749 = vmatpush.bf16.msra.mxu3 %v4495_v27 }
 0x21a   :  { %v1010_v55 = vrot.slane %v1009_v40, 2  ;;  %v1037_v56 = vadd.f32 %v1036_v41, %v1032_v34  ;;  %v952_v57 = vpop.f32.mrf.mxu2  ;;  %v4751_v33 = vor.u32 %v5922_v29, %v4750_v28  ;;  %v5006_v34 = vld [vmem:[#allocation17 + $0x400] sm:$0xf]  ;;  %v6094_v29 = vld [vmem:[#allocation17 + $0x784] sm:$0xf] }
 0x21b   :  { %v1017_v53 = vadd.f32 %v1016_v48, %v1015_v36  ;;  %v1044_v61 = vrot.slane %v1043_v15, 2  ;;  %v6823_v62 = vpop.f32.mrf.mxu0  ;;  %v5262_v41 = vld [vmem:[#allocation17 + $0x600] sm:$0xf] }
 0x21c   :  { %v1011_v2 = vadd.f32 %v1010_v55, %v1009_v40  ;;  %v1038_v3 = vrot.slane %v1037_v56, 2  ;;  %v989_v4 = vpop.f32.mrf.mxu1  ;;  %v5007_v40 = vor.u32 %v5986_v35, %v5006_v34  ;;  %2762 = vmatpush.bf16.msrb.mxu0 %v4751_v33  ;;  %v5263_v50 = vor.u32 %v6050_v42, %v5262_v41  ;;  %v5456_v34 = vld [vmem:[#allocation17 + $0x7a0] sm:$0xf0] }
 0x21d   :  { %v1018_v8 = vrot.slane %v1017_v53, 1  ;;  %v1045_v9 = vadd.f32 %v1044_v61, %v1043_v15  ;;  %v990_v49 = vadd.f32 %v989_v4, %v577_v10  ;;  %2794 = vmatpush.bf16.msrb.mxu3 %v4723_v58  ;;  %v5894_v35 = vld [vmem:[#allocation17 + $0x144] sm:$0xf] }
 0x21e   :  { %v1012_v14 = vrot.slane %v1011_v2, 1  ;;  %v1039_v16 = vadd.f32 %v1038_v3, %v1037_v56  ;;  %2775 = vmatpush.bf16.msrb.mxu1 %v5007_v40  ;;  %2788 = vmatpush.bf16.msrb.mxu2 %v5263_v50  ;;  %v5459_v40 = vor.u32 %v6094_v29, %v5456_v34  ;;  %v4656_v41 = vld [vmem:[#allocation17 + $0x160] sm:$0xf0] }
 0x21f   :  { %v1019_v21 = vadd.f32 %v1018_v8, %v1017_v53  ;;  %v1046_v22 = vrot.slane %v1045_v9, 1  ;;  %v5958_v42 = vld [vmem:[#allocation17 + $0x344] sm:$0xf] }
 0x220   :  { %v1013_v25 = vadd.f32 %v1012_v14, %v1011_v2  ;;  %v1040_v26 = vrot.slane %v1039_v16, 1  ;;  %v5232_v2 = vld [vmem:[#allocation17 + $0x5e0] sm:$0xf0]  ;;  %2807 = vmatpush.bf16.msra.mxu0 %v4979_v0 }
 0x221   :  { %v1047_v30 = vadd.f32 %v1046_v22, %v1045_v9  ;;  %v6827_v31 = vmul.f32 0.125, %v1019_v21  ;;  %v963_v32 = vpop.f32.mrf.mxu3  ;;  %v5235_v43 = vor.u32 %v6038_v1, %v5232_v2  ;;  %v5966_v21 = vld [vmem:[#allocation17 + $0x384] sm:$0xf] }
 0x222   :  { %v1041_v36 = vadd.f32 %v1040_v26, %v1039_v16  ;;  %v6829_v37 = vmul.f32 0.125, %v1013_v25  ;;  %v964_v38 = vadd.f32 %v963_v32, %v576_v17  ;;  %v1002_v39 = vpop.f32.mrf.mxu2  ;;  %v4688_v17 = vld [vmem:[#allocation17 + $0x1a0] sm:$0xf0]  ;;  %2833 = vmatpush.bf16.msra.mxu2 %v5491_v11 }
 0x223   :  { %v1065_v44 = vmul.f32 0.125, %v1047_v30  ;;  %v1069_v47 = vmul.f32 %v6827_v31, %v6827_v31  ;;  %v6833_v48 = vadd.f32 %v1002_v39, %v990_v49  ;;  %v978_v15 = vpop.f32.mrf.mxu0  ;;  %2820 = vmatpush.bf16.msra.mxu1 %v5235_v43  ;;  %v4944_v22 = vld [vmem:[#allocation17 + $0x3a0] sm:$0xf0]  ;;  %v4691_v32 = vor.u32 %v5902_v12, %v4688_v17 }
 0x224   :  { %v1064_v54 = vmul.f32 0.125, %v1041_v36  ;;  %v1068_v55 = vmul.f32 %v6829_v37, %v6829_v37  ;;  %v6838_v56 = vadd.f32 %v6823_v62, %v964_v38  ;;  %v991_v57 = vpop.f32.mrf.mxu1  ;;  %v6030_v25 = vld [vmem:[#allocation17 + $0x584] sm:$0xf]  ;;  %v4947_v33 = vor.u32 %v5966_v21, %v4944_v22 }
 0x225   :  { %v1073_v53 = vsub.f32 %v1065_v44, %v1069_v47  ;;  %v1026_v61 = vrot.slane %v6833_v48, 4  ;;  %v1035_v63 = vmul.f32 %v6833_v48, %v6833_v48  ;;  %v5200_v26 = vld [vmem:[#allocation17 + $0x5a0] sm:$0xf0]  ;;  %2795 = vmatpush.bf16.msrb.mxu3 %v4691_v32  ;;  %v4659_v15 = vor.u32 %v5894_v35, %v4656_v41 }
 0x226   :  { %v1072_v3 = vsub.f32 %v1064_v54, %v1068_v55  ;;  %v1020_v4 = vrot.slane %v6838_v56, 4  ;;  %v1034_v62 = vmul.f32 %v6838_v56, %v6838_v56  ;;  %v5203_v39 = vor.u32 %v6030_v25, %v5200_v26  ;;  %2808 = vmatpush.bf16.msra.mxu0 %v4947_v33  ;;  %v4912_v50 = vld [vmem:[#allocation17 + $0x360] sm:$0xf0]  ;;  %2834 = vmatpush.bf16.msra.mxu2 %v5459_v40 }
 0x227   :  { %v6846_v8 = vadd.f32 0.8, %v1073_v53  ;;  %v1027_v9 = vadd.f32 %v1026_v61, %v6833_v48  ;;  %v1054_v10 = vrot.slane %v1035_v63, 4  ;;  %v4915_v55 = vor.u32 %v5958_v42, %v4912_v50  ;;  %v6022_v57 = vld [vmem:[#allocation17 + $0x544] sm:$0xf] }
 0x228   :  { %v6849_v13 = vadd.f32 0.8, %v1072_v3  ;;  %v1021_v14 = vadd.f32 %v1020_v4, %v6838_v56  ;;  %v1048_v16 = vrot.slane %v1034_v62, 4  ;;  %2821 = vmatpush.bf16.msra.mxu1 %v5203_v39  ;;  %v5168_v58 = vld [vmem:[#allocation17 + $0x560] sm:$0xf0] }
 0x229   :  { %6202 = vrsqrt.f32 %v6846_v8  ;;  %v1028_v18 = vrot.slane %v1027_v9, 2  ;;  %v1055_v20 = vadd.f32 %v1054_v10, %v1035_v63  ;;  %v965_v46 = vpop.f32.mrf.mxu3  ;;  %v6086_v63 = vld [vmem:[#allocation17 + $0x744] sm:$0xf]  ;;  %2796 = vmatpush.bf16.msrb.mxu3 %v4659_v15  ;;  %vm1096_vm12 = vweird.f32 %v6846_v8 }
 0x22a   :  { %6204 = vrsqrt.f32 %v6849_v13  ;;  %v1022_v24 = vrot.slane %v1021_v14, 2  ;;  %v1049_v45 = vadd.f32 %v1048_v16, %v1034_v62  ;;  %v1004_v6 = vpop.f32.mrf.mxu2  ;;  %v5424_v0 = vld [vmem:[#allocation17 + $0x760] sm:$0xf0]  ;;  %2809 = vmatpush.bf16.msra.mxu0 %v4915_v55  ;;  %vm1086_vm15 = vweird.f32 %v6849_v13 }
 0x22b   :  { %v1029_v27 = vadd.f32 %v1028_v18, %v1027_v9  ;;  %v1056_v28 = vrot.slane %v1055_v20, 2  ;;  %v5886_v4 = vld [vmem:[#allocation17 + $0x104] sm:$0xf] }
 0x22c   :  { %v1023_v30 = vadd.f32 %v1022_v24, %v1021_v14  ;;  %v1050_v49 = vrot.slane %v1049_v45, 2  ;;  %v4624_v62 = vld [vmem:[#allocation17 + $0x120] sm:$0xf0] }
 0x22d   :  { %v1030_v36 = vrot.slane %v1029_v27, 1  ;;  %v1057_v38 = vadd.f32 %v1056_v28, %v1055_v20  ;;  %v5950_v9 = vld [vmem:[#allocation17 + $0x304] sm:$0xf]  ;;  %v5171_v20 = vor.u32 %v6022_v57, %v5168_v58  ;;  %v4627_v6 = vor.u32 %v5886_v4, %v4624_v62 }
 0x22e   :  { %v1024_v44 = vrot.slane %v1023_v30, 1  ;;  %v1051_v47 = vadd.f32 %v1050_v49, %v1049_v45  ;;  %v4880_v10 = vld [vmem:[#allocation17 + $0x320] sm:$0xf0]  ;;  %v5427_v45 = vor.u32 %v6086_v63, %v5424_v0 }
 0x22f   :  { %v6854_v51 = vpop.eup %6202  ;;  %v1031_v52 = vadd.f32 %v1030_v36, %v1029_v27  ;;  %v1058_v54 = vrot.slane %v1057_v38, 1  ;;  %v6014_v14 = vld [vmem:[#allocation17 + $0x504] sm:$0xf]  ;;  %2822 = vmatpush.bf16.msra.mxu1 %v5171_v20  ;;  %v4883_v29 = vor.u32 %v5950_v9, %v4880_v10  ;;  %2797 = vmatpush.bf16.msrb.mxu3 %v4627_v6  ;;  %v4726_v6 = vld [vmem:[#allocation17 + $0x1c8] sm:$0xf] }
 0x230   :  { %v6856_v59 = vpop.eup %6204  ;;  %v1091_v60 = vmul.f32 %v6854_v51, %v6846_v8  ;;  %v1025_v53 = vadd.f32 %v1024_v44, %v1023_v30  ;;  %v1052_v61 = vrot.slane %v1051_v47, 1  ;;  %v5136_v16 = vld [vmem:[#allocation17 + $0x520] sm:$0xf0]  ;;  %2835 = vmatpush.bf16.msra.mxu2 %v5427_v45  ;;  %vm1097_vm11 = vweird.f32 %v6854_v51 }
 0x231   :  { %v1081_v1 = vmul.f32 %v6856_v59, %v6849_v13  ;;  %v1059_v2 = vadd.f32 %v1058_v54, %v1057_v38  ;;  %v6862_v3 = vmul.f32 0.125, %v1031_v52  ;;  %v6078_v46 = vld [vmem:[#allocation17 + $0x704] sm:$0xf]  ;;  %v5139_v30 = vor.u32 %v6014_v14, %v5136_v16  ;;  %2810 = vmatpush.bf16.msra.mxu0 %v4883_v29  ;;  %vm6891_vm13 = vmor %vm1096_vm12, %vm1097_vm11 }
 0x232   :  { %v1092_v43 = vmul.f32 %v6854_v51, %v1091_v60  ;;  %v1053_v5 = vadd.f32 %v1052_v61, %v1051_v47  ;;  %v6865_v7 = vmul.f32 0.125, %v1025_v53  ;;  %v5392_v21 = vld [vmem:[#allocation17 + $0x720] sm:$0xf0]  ;;  %vm1087_vm14 = vweird.f32 %v6856_v59 }
 0x233   :  { %v1067_v11 = vmul.f32 0.125, %v1059_v2  ;;  %v1071_v12 = vmul.f32 %v6862_v3, %v6862_v3  ;;  %v1082_v22 = vmul.f32 %v6856_v59, %v1081_v1  ;;  %v5878_v25 = vld [vmem:[#allocation17 + $0xc4] sm:$0xf]  ;;  %v5395_v34 = vor.u32 %v6078_v46, %v5392_v21  ;;  %2823 = vmatpush.bf16.msra.mxu1 %v5139_v30  ;;  %vm6910_vm0 = vmor %vm1086_vm15, %vm1087_vm14 }
 0x234   :  { %v1066_v17 = vmul.f32 0.125, %v1053_v5  ;;  %v1070_v18 = vmul.f32 %v6865_v7, %v6865_v7  ;;  %v4592_v26 = vld [vmem:[#allocation17 + $0xe0] sm:$0xf0]  ;;  %v1093_v27 = vmul.f32 0.5, %v1092_v43  ;;  %v6878_v43 = vld [vmem:[#allocation14] sm:$0xf] }
 0x235   :  { %v1075_v24 = vsub.f32 %v1067_v11, %v1071_v12  ;;  %v5942_v49 = vld [vmem:[#allocation17 + $0x2c4] sm:$0xf]  ;;  %v4595_v35 = vor.u32 %v5878_v25, %v4592_v26  ;;  %v1083_v15 = vmul.f32 0.5, %v1082_v22  ;;  %2836 = vmatpush.bf16.msra.mxu2 %v5395_v34  ;;  %v1122_v25 = vperm.slane %v6878_v43, 1 }
 0x236   :  { %v1074_v28 = vsub.f32 %v1066_v17, %v1070_v18  ;;  %v4848_v32 = vld [vmem:[#allocation17 + $0x2e0] sm:$0xf0]  ;;  %v1094_v50 = vsub.f32 1.5, %v1093_v27 }
 0x237   :  { %v6872_v33 = vadd.f32 0.8, %v1075_v24  ;;  %v6006_v36 = vld [vmem:[#allocation17 + $0x4c4] sm:$0xf]  ;;  %v4851_v39 = vor.u32 %v5942_v49, %v4848_v32  ;;  %2798 = vmatpush.bf16.msrb.mxu3 %v4595_v35  ;;  %v1084_v5 = vsub.f32 1.5, %v1083_v15  ;;  %v1124_v15 = vperm.slane %v6878_v43, 3 }
 0x238   :  { %v6874_v38 = vadd.f32 0.8, %v1074_v28  ;;  %v5104_v40 = vld [vmem:[#allocation17 + $0x4e0] sm:$0xf0]  ;;  %v1095_v9 = vmul.f32 %v6854_v51, %v1094_v50  ;;  %v5907_v50 = vld [vmem:[#allocation17 + $0x1a4] sm:$0xf0] }
 0x239   :  { %v6070_v41 = vld [vmem:[#allocation17 + $0x6c4] sm:$0xf]  ;;  %6206 = vrsqrt.f32 %v6872_v33  ;;  %v5107_v52 = vor.u32 %v6006_v36, %v5104_v40  ;;  %2811 = vmatpush.bf16.msra.mxu0 %v4851_v39  ;;  %v1085_v28 = vmul.f32 %v6856_v59, %v1084_v5  ;;  %vm1116_vm3 = vweird.f32 %v6872_v33 }
 0x23a   :  { %v5360_v42 = vld [vmem:[#allocation17 + $0x6e0] sm:$0xf0]  ;;  %6208 = vrsqrt.f32 %v6874_v38  ;;  %v1099_v29 = vsel %vm6891_vm13, %v6854_v51, %v1095_v9  ;;  %v1121_v51 = vperm.slane %v6878_v43, 0  ;;  %vm1106_vm4 = vweird.f32 %v6874_v38 }
 0x23b   :  { %v5870_v44 = vld [vmem:[#allocation17 + $0x84] sm:$0xf]  ;;  %v5363_v57 = vor.u32 %v6070_v41, %v5360_v42  ;;  %2824 = vmatpush.bf16.msra.mxu1 %v5107_v52  ;;  %v1130_v52 = vmul.f32 %v1122_v25, %v1099_v29  ;;  %v1089_v13 = vsel %vm6910_vm0, %v6856_v59, %v1085_v28  ;;  %v5915_v28 = vld [vmem:[#allocation17 + $0x1e4] sm:$0xf0] }
 0x23c   :  { %v4560_v47 = vld [vmem:[#allocation17 + $0xa0] sm:$0xf0]  ;;  %v1129_v59 = vmul.f32 %v1121_v51, %v1089_v13  ;;  %v4982_v29 = vld [vmem:[#allocation17 + $0x3c8] sm:$0xf] }
 0x23d   :  { %v5934_v54 = vld [vmem:[#allocation17 + $0x284] sm:$0xf]  ;;  %v4563_v58 = vor.u32 %v5870_v44, %v4560_v47  ;;  %2837 = vmatpush.bf16.msra.mxu2 %v5363_v57 }
 0x23e   :  { %v4816_v55 = vld [vmem:[#allocation17 + $0x2a0] sm:$0xf0] }
 0x23f   :  { %v5998_v60 = vld [vmem:[#allocation17 + $0x484] sm:$0xf]  ;;  %v4819_v63 = vor.u32 %v5934_v54, %v4816_v55  ;;  %v6882_v11 = vpop.eup %6206  ;;  %2799 = vmatpush.bf16.msrb.mxu3 %v4563_v58 }
 0x240   :  { %v5072_v53 = vld [vmem:[#allocation17 + $0x4a0] sm:$0xf0]  ;;  %v6884_v20 = vpop.eup %6208  ;;  %v1111_v46 = vmul.f32 %v6882_v11, %v6872_v33  ;;  %vm1117_vm1 = vweird.f32 %v6882_v11 }
 0x241   :  { %v6062_v61 = vld [vmem:[#allocation17 + $0x684] sm:$0xf]  ;;  %v5075_v10 = vor.u32 %v5998_v60, %v5072_v53  ;;  %2812 = vmatpush.bf16.msra.mxu0 %v4819_v63  ;;  %v1101_v26 = vmul.f32 %v6884_v20, %v6874_v38  ;;  %vm1107_vm2 = vweird.f32 %v6884_v20  ;;  %v1123_v60 = vperm.slane %v6878_v43, 2  ;;  %vm1118_vm5 = vmor %vm1116_vm3, %vm1117_vm1 }
 0x242   :  { %v5328_v0 = vld [vmem:[#allocation17 + $0x6a0] sm:$0xf0]  ;;  %v1112_v30 = vmul.f32 %v6882_v11, %v1111_v46  ;;  %v1134_v63 = vmul.f32 %v1130_v52, %v6827_v31  ;;  %vm1108_vm6 = vmor %vm1106_vm4, %vm1107_vm2  ;;  %v1151_v31 = vperm.slane %v1129_v59, 0 }
 0x243   :  { %v5862_v1 = vld [vmem:[#allocation17 + $0x44] sm:$0xf]  ;;  %v5331_v12 = vor.u32 %v6062_v61, %v5328_v0  ;;  %2825 = vmatpush.bf16.msra.mxu1 %v5075_v10  ;;  %v1102_v32 = vmul.f32 %v6884_v20, %v1101_v26  ;;  %v1152_v10 = vperm.slane %v1130_v52, 0 }
 0x244   :  { %v4528_v2 = vld [vmem:[#allocation17 + $0x60] sm:$0xf0]  ;;  %v1113_v40 = vmul.f32 0.5, %v1112_v30  ;;  %v1141_v38 = vrot.slane %v1134_v63, 7  ;;  %v5979_v30 = vld [vmem:[#allocation17 + $0x3e4] sm:$0xf0] }
 0x245   :  { %v5926_v4 = vld [vmem:[#allocation17 + $0x244] sm:$0xf]  ;;  %v4531_v14 = vor.u32 %v5862_v1, %v4528_v2  ;;  %2838 = vmatpush.bf16.msra.mxu2 %v5331_v12  ;;  %v1103_v47 = vmul.f32 0.5, %v1102_v32  ;;  %v1007_v12 = vld [vmem:[#allocation16] sm:$0xf] }
 0x246   :  { %v4784_v62 = vld [vmem:[#allocation17 + $0x260] sm:$0xf0]  ;;  %v1114_v54 = vsub.f32 1.5, %v1113_v40  ;;  %v5494_v32 = vld [vmem:[#allocation17 + $0x7c8] sm:$0xf]  ;;  %v4727_v40 = vor.u32 %v5915_v28, %v4726_v6 }
 0x247   :  { %v5990_v16 = vld [vmem:[#allocation17 + $0x444] sm:$0xf]  ;;  %v4787_v21 = vor.u32 %v5926_v4, %v4784_v62  ;;  %2800 = vmatpush.bf16.msrb.mxu3 %v4531_v14  ;;  %v1104_v57 = vsub.f32 1.5, %v1103_v47  ;;  %v1133_v62 = vmul.f32 %v1129_v59, %v6829_v37  ;;  %v1155_v37 = vmul.f32 %v1151_v31, %v6813_v23  ;;  %v6043_v23 = vld [vmem:[#allocation17 + $0x5e4] sm:$0xf0] }
 0x248   :  { %v5040_v17 = vld [vmem:[#allocation17 + $0x460] sm:$0xf0]  ;;  %v1115_v53 = vmul.f32 %v6882_v11, %v1114_v54  ;;  %v6099_v59 = vld [vmem:[#allocation17 + $0x7a4] sm:$0xf0] }
 0x249   :  { %v6054_v18 = vld [vmem:[#allocation17 + $0x644] sm:$0xf]  ;;  %v5043_v49 = vor.u32 %v5990_v16, %v5040_v17  ;;  %2813 = vmatpush.bf16.msra.mxu0 %v4787_v21  ;;  %v1105_v61 = vmul.f32 %v6884_v20, %v1104_v57  ;;  %v1144_v16 = vsel %vm485_vm8, %v1133_v62, %v1141_v38  ;;  %v4950_v57 = vld [vmem:[#allocation17 + $0x388] sm:$0xf] }
 0x24a   :  { %v5296_v22 = vld [vmem:[#allocation17 + $0x660] sm:$0xf0]  ;;  %v1119_v0 = vsel %vm1118_vm5, %v6882_v11, %v1115_v53  ;;  %v6035_v53 = vld [vmem:[#allocation17 + $0x5a4] sm:$0xf0] }
 0x24b   :  { %v5854_v24 = vld [vmem:[#allocation17 + $0x4] sm:$0xf]  ;;  %v5299_v34 = vor.u32 %v6054_v18, %v5296_v22  ;;  %2826 = vmatpush.bf16.msra.mxu1 %v5043_v49  ;;  %v1109_v1 = vsel %vm1108_vm6, %v6884_v20, %v1105_v61  ;;  %v1132_v2 = vmul.f32 %v1124_v15, %v1119_v0  ;;  %v5238_v49 = vld [vmem:[#allocation17 + $0x5c8] sm:$0xf] }
 0x24c   :  { %v4496_v45 = vld [vmem:[#allocation17 + $0x20] sm:$0xf0]  ;;  %v1131_v33 = vmul.f32 %v1123_v60, %v1109_v1  ;;  %v4694_v15 = vld [vmem:[#allocation17 + $0x188] sm:$0xf] }
 0x24d   :  { %v5918_v8 = vld [vmem:[#allocation17 + $0x204] sm:$0xf]  ;;  %v4499_v35 = vor.u32 %v5854_v24, %v4496_v45  ;;  %2839 = vmatpush.bf16.msra.mxu2 %v5299_v34  ;;  %v1136_v4 = vmul.f32 %v1132_v2, %v6862_v3  ;;  %v1154_v14 = vperm.slane %v1132_v2, 0  ;;  %v5206_v60 = vld [vmem:[#allocation17 + $0x588] sm:$0xf]  ;;  %v4695_v63 = vor.u32 %v5907_v50, %v4694_v15 }
 0x24e   :  { %v4752_v27 = vld [vmem:[#allocation17 + $0x220] sm:$0xf0]  ;;  %v1135_v43 = vmul.f32 %v1131_v33, %v6865_v7  ;;  %v1153_v11 = vperm.slane %v1131_v33, 0  ;;  %v1156_v7 = vmul.f32 %v1152_v10, %v6811_v19  ;;  %v6107_v19 = vld [vmem:[#allocation17 + $0x7e4] sm:$0xf0]  ;;  %v5207_v33 = vor.u32 %v6035_v53, %v5206_v60 }
 0x24f   :  { %v5982_v36 = vld [vmem:[#allocation17 + $0x404] sm:$0xf]  ;;  %v4755_v41 = vor.u32 %v5918_v8, %v4752_v27  ;;  %2801 = vmatpush.bf16.msrb.mxu3 %v4499_v35  ;;  %v1143_v9 = vrot.slane %v1136_v4, 5  ;;  %v1158_v46 = vmul.f32 %v1154_v14, %v6833_v48  ;;  %v5495_v13 = vor.u32 %v6107_v19, %v5494_v32  ;;  %v5462_v61 = vld [vmem:[#allocation17 + $0x788] sm:$0xf] }
 0x250   :  { %v5008_v39 = vld [vmem:[#allocation17 + $0x420] sm:$0xf0]  ;;  %v1142_v5 = vrot.slane %v1135_v43, 6  ;;  %v1157_v20 = vmul.f32 %v1153_v11, %v6838_v56  ;;  %v4662_v1 = vld [vmem:[#allocation17 + $0x148] sm:$0xf]  ;;  %v5463_v4 = vor.u32 %v6099_v59, %v5462_v61 }
 0x251   :  { %v6046_v42 = vld [vmem:[#allocation17 + $0x604] sm:$0xf]  ;;  %v5011_v55 = vor.u32 %v5982_v36, %v5008_v39  ;;  %2814 = vmatpush.bf16.msra.mxu0 %v4755_v41  ;;  %v4983_v41 = vor.u32 %v5979_v30, %v4982_v29  ;;  %v5899_v2 = vld [vmem:[#allocation17 + $0x164] sm:$0xf0] }
 0x252   :  { %v5264_v44 = vld [vmem:[#allocation17 + $0x620] sm:$0xf0]  ;;  %v1146_v17 = vsel %vm1145_vm7, %v1142_v5, %v1143_v9  ;;  %v4918_v62 = vld [vmem:[#allocation17 + $0x348] sm:$0xf]  ;;  %v4663_v10 = vor.u32 %v5899_v2, %v4662_v1 }
 0x253   :  { %v5267_v58 = vor.u32 %v6046_v42, %v5264_v44  ;;  %2827 = vmatpush.bf16.msra.mxu1 %v5011_v55  ;;  %v1148_v3 = vsel %vm1147_vm9, %v1144_v16, %v1146_v17  ;;  %v5239_v55 = vor.u32 %v6043_v23, %v5238_v49  ;;  %v5963_v38 = vld [vmem:[#allocation17 + $0x364] sm:$0xf0] }
 0x254   :  { %v1150_v18 = vsub.f32 %v1007_v12, %v1148_v3  ;;  %v5174_v43 = vld [vmem:[#allocation17 + $0x548] sm:$0xf]  ;;  %v4919_v11 = vor.u32 %v5963_v38, %v4918_v62 }
 0x255   :  { %2840 = vmatpush.bf16.msra.mxu2 %v5267_v58  ;;  %v5971_v58 = vld [vmem:[#allocation17 + $0x3a4] sm:$0xf0] }
 0x256   :  { %v1160_v21 = vperm.slane %v1150_v18, 0  ;;  %v1161_v22 = vperm.slane %v1150_v18, 1  ;;  %v1162_v24 = vperm.slane %v1150_v18, 2  ;;  %v1163_v45 = vperm.slane %v1150_v18, 3  ;;  %v6027_v5 = vld [vmem:[#allocation17 + $0x564] sm:$0xf0] }
 0x257   :  { %v4951_v0 = vor.u32 %v5971_v58, %v4950_v57  ;;  %v5430_v9 = vld [vmem:[#allocation17 + $0x748] sm:$0xf]  ;;  %v5175_v16 = vor.u32 %v6027_v5, %v5174_v43 }
 0x258   :  { %v1168_v25 = vadd.f32 %v1160_v21, %v1155_v37  ;;  %v1169_v26 = vadd.f32 %v1161_v22, %v1156_v7  ;;  %v1170_v8 = vadd.f32 %v1162_v24, %v1157_v20  ;;  %v1171_v27 = vadd.f32 %v1163_v45, %v1158_v46  ;;  %v6091_v31 = vld [vmem:[#allocation17 + $0x764] sm:$0xf0] }
 0x259   :  { %v4630_v12 = vld [vmem:[#allocation17 + $0x108] sm:$0xf]  ;;  %v5431_v17 = vor.u32 %v6091_v31, %v5430_v9 }
 0x25a   :  { %vm1175_vm10 = vcmp.gt.f32.partialorder %v1171_v27, 0.0  ;;  %v1176_v56 = vmul.f32 0.2, %v1168_v25  ;;  %v1177_v34 = vmul.f32 0.2, %v1169_v26  ;;  %vm1172_vm11 = vcmp.gt.f32.partialorder %v1168_v25, 0.0 }
 0x25b   :  { %v1178_v48 = vmul.f32 0.2, %v1170_v8  ;;  %v1179_v35 = vmul.f32 0.2, %v1171_v27  ;;  %vm1173_vm12 = vcmp.gt.f32.partialorder %v1169_v26, 0.0  ;;  %vm1174_vm13 = vcmp.gt.f32.partialorder %v1170_v8, 0.0 }
 0x25c   :  { %v1180_v36 = vsel %vm1172_vm11, %v1168_v25, %v1176_v56  ;;  %v1181_v39 = vsel %vm1173_vm12, %v1169_v26, %v1177_v34  ;;  %v5891_v14 = vld [vmem:[#allocation17 + $0x124] sm:$0xf0] }
 0x25d   :  { %v1183_v42 = vsel %vm1175_vm10, %v1171_v27, %v1179_v35  ;;  %v6939_v44 = vpack.c.bf16 %v1180_v36, %v1180_v36  ;;  %v6941_v51 = vpack.c.bf16 %v1181_v39, %v1181_v39  ;;  %v1182_v47 = vsel %vm1174_vm13, %v1170_v8, %v1178_v48  ;;  %v4886_v3 = vld [vmem:[#allocation17 + $0x308] sm:$0xf] }
 0x25e   :  { %v6943_v52 = vpack.c.bf16 %v1183_v42, %v1183_v42  ;;  %v6945_v54 = vpack.c.bf16 %v1182_v47, %v1182_v47  ;;  %v5955_v18 = vld [vmem:[#allocation17 + $0x324] sm:$0xf0]  ;;  %v4631_v21 = vor.u32 %v5891_v14, %v4630_v12  ;;  %v5975_v12 = vld [vmem:[#allocation17 + $0x3cc] sm:$0xf] }
 0x25f   :  { %2750 = vmatmul.bf16.vlgmr.msra.gmra.mxu3 %v6939_v44  ;;  %2763 = vmatmul.bf16.vlgmr.msrb.gmra.mxu0 %v6941_v51  ;;  %v5142_v37 = vld [vmem:[#allocation17 + $0x508] sm:$0xf]  ;;  %v4887_v22 = vor.u32 %v5955_v18, %v4886_v3  ;;  %v4984_v14 = vld [vmem:[#allocation17 + $0x3e8] sm:$0xf0] }
 0x260   :  { %2776 = vmatmul.bf16.vlgmr.msrb.gmra.mxu1 %v6945_v54  ;;  %2789 = vmatmul.bf16.vlgmr.msrb.gmra.mxu2 %v6943_v52  ;;  %v6019_v7 = vld [vmem:[#allocation17 + $0x524] sm:$0xf0]  ;;  %v5240_v18 = vld [vmem:[#allocation17 + $0x5e8] sm:$0xf0] }
 0x261   :  { %2846 = vmatpush.bf16.msra.mxu3 %v4727_v40  ;;  %2859 = vmatpush.bf16.msrb.mxu0 %v4983_v41  ;;  %v5398_v20 = vld [vmem:[#allocation17 + $0x708] sm:$0xf]  ;;  %v5143_v6 = vor.u32 %v6019_v7, %v5142_v37  ;;  %v6103_v37 = vld [vmem:[#allocation17 + $0x7cc] sm:$0xf] }
 0x262   :  { %2872 = vmatpush.bf16.msrb.mxu1 %v5239_v55  ;;  %2885 = vmatpush.bf16.msrb.mxu2 %v5495_v13  ;;  %v6083_v46 = vld [vmem:[#allocation17 + $0x724] sm:$0xf0]  ;;  %v5496_v7 = vld [vmem:[#allocation17 + $0x7e8] sm:$0xf0] }
 0x263   :  { %v4598_v24 = vld [vmem:[#allocation17 + $0xc8] sm:$0xf]  ;;  %v5399_v25 = vor.u32 %v6083_v46, %v5398_v20 }
 0x264   :  { %v5883_v45 = vld [vmem:[#allocation17 + $0xe4] sm:$0xf0] }
 0x265   :  { %2847 = vmatpush.bf16.msra.mxu3 %v4695_v63  ;;  %2860 = vmatpush.bf16.msrb.mxu0 %v4951_v0  ;;  %v4854_v26 = vld [vmem:[#allocation17 + $0x2c8] sm:$0xf]  ;;  %v4599_v49 = vor.u32 %v5883_v45, %v4598_v24  ;;  %v5903_v24 = vld [vmem:[#allocation17 + $0x18c] sm:$0xf] }
 0x266   :  { %2873 = vmatpush.bf16.msrb.mxu1 %v5207_v33  ;;  %2886 = vmatpush.bf16.msrb.mxu2 %v5463_v4  ;;  %v5947_v8 = vld [vmem:[#allocation17 + $0x2e4] sm:$0xf0]  ;;  %v4696_v45 = vld [vmem:[#allocation17 + $0x1a8] sm:$0xf0] }
 0x267   :  { %v5110_v27 = vld [vmem:[#allocation17 + $0x4c8] sm:$0xf]  ;;  %v4855_v23 = vor.u32 %v5947_v8, %v4854_v26  ;;  %v5967_v26 = vld [vmem:[#allocation17 + $0x38c] sm:$0xf] }
 0x268   :  { %v6011_v28 = vld [vmem:[#allocation17 + $0x4e4] sm:$0xf0]  ;;  %v4952_v8 = vld [vmem:[#allocation17 + $0x3a8] sm:$0xf0] }
 0x269   :  { %2848 = vmatpush.bf16.msra.mxu3 %v4663_v10  ;;  %2861 = vmatpush.bf16.msrb.mxu0 %v4919_v11  ;;  %v5366_v29 = vld [vmem:[#allocation17 + $0x6c8] sm:$0xf]  ;;  %v5111_v56 = vor.u32 %v6011_v28, %v5110_v27  ;;  %v5911_v10 = vld [vmem:[#allocation17 + $0x1cc] sm:$0xf] }
 0x26a   :  { %2874 = vmatpush.bf16.msrb.mxu1 %v5175_v16  ;;  %2887 = vmatpush.bf16.msrb.mxu2 %v5431_v17  ;;  %v6075_v30 = vld [vmem:[#allocation17 + $0x6e4] sm:$0xf0]  ;;  %v4728_v11 = vld [vmem:[#allocation17 + $0x1e8] sm:$0xf0] }
 0x26b   :  { %v4566_v32 = vld [vmem:[#allocation17 + $0x88] sm:$0xf]  ;;  %v5367_v34 = vor.u32 %v6075_v30, %v5366_v29  ;;  %v6039_v16 = vld [vmem:[#allocation17 + $0x5cc] sm:$0xf] }
 0x26c   :  { %v5875_v19 = vld [vmem:[#allocation17 + $0xa4] sm:$0xf0]  ;;  %v6031_v27 = vld [vmem:[#allocation17 + $0x58c] sm:$0xf] }
 0x26d   :  { %2849 = vmatpush.bf16.msra.mxu3 %v4631_v21  ;;  %2862 = vmatpush.bf16.msrb.mxu0 %v4887_v22  ;;  %v4822_v48 = vld [vmem:[#allocation17 + $0x288] sm:$0xf]  ;;  %v4567_v42 = vor.u32 %v5875_v19, %v4566_v32  ;;  %v4731_v21 = vor.u32 %v5911_v10, %v4728_v11  ;;  %v4987_v22 = vor.u32 %v5975_v12, %v4984_v14  ;;  %v5208_v28 = vld [vmem:[#allocation17 + $0x5a8] sm:$0xf0] }
 0x26e   :  { %2875 = vmatpush.bf16.msrb.mxu1 %v5143_v6  ;;  %2888 = vmatpush.bf16.msrb.mxu2 %v5399_v25  ;;  %v5939_v35 = vld [vmem:[#allocation17 + $0x2a4] sm:$0xf0]  ;;  %v5243_v6 = vor.u32 %v6039_v16, %v5240_v18  ;;  %v5499_v25 = vor.u32 %v6103_v37, %v5496_v7  ;;  %v6095_v29 = vld [vmem:[#allocation17 + $0x78c] sm:$0xf] }
 0x26f   :  { %v5078_v36 = vld [vmem:[#allocation17 + $0x488] sm:$0xf]  ;;  %2802 = vmatmul.bf16.vlgmr.msrb.gmra.mxu3 %v6939_v44  ;;  %2815 = vmatmul.bf16.vlgmr.msra.gmra.mxu0 %v6941_v51  ;;  %v4823_v47 = vor.u32 %v5939_v35, %v4822_v48  ;;  %v5464_v30 = vld [vmem:[#allocation17 + $0x7a8] sm:$0xf0] }
 0x270   :  { %v6003_v39 = vld [vmem:[#allocation17 + $0x4a4] sm:$0xf0]  ;;  %2828 = vmatmul.bf16.vlgmr.msra.gmra.mxu1 %v6945_v54  ;;  %2841 = vmatmul.bf16.vlgmr.msra.gmra.mxu2 %v6943_v52  ;;  %v5895_v32 = vld [vmem:[#allocation17 + $0x14c] sm:$0xf] }
 0x271   :  { %v5334_v40 = vld [vmem:[#allocation17 + $0x688] sm:$0xf]  ;;  %2850 = vmatpush.bf16.msra.mxu3 %v4599_v49  ;;  %2863 = vmatpush.bf16.msrb.mxu0 %v4855_v23  ;;  %v5079_v55 = vor.u32 %v6003_v39, %v5078_v36  ;;  %v4699_v49 = vor.u32 %v5903_v24, %v4696_v45  ;;  %v4955_v23 = vor.u32 %v5967_v26, %v4952_v8  ;;  %v4664_v19 = vld [vmem:[#allocation17 + $0x168] sm:$0xf0] }
 0x272   :  { %v6067_v41 = vld [vmem:[#allocation17 + $0x6a4] sm:$0xf0]  ;;  %2876 = vmatpush.bf16.msrb.mxu1 %v5111_v56  ;;  %2889 = vmatpush.bf16.msrb.mxu2 %v5367_v34  ;;  %v5211_v56 = vor.u32 %v6031_v27, %v5208_v28  ;;  %v5467_v34 = vor.u32 %v6095_v29, %v5464_v30  ;;  %v5959_v48 = vld [vmem:[#allocation17 + $0x34c] sm:$0xf] }
 0x273   :  { %v4534_v15 = vld [vmem:[#allocation17 + $0x48] sm:$0xf]  ;;  %v5335_v13 = vor.u32 %v6067_v41, %v5334_v40  ;;  %v4920_v35 = vld [vmem:[#allocation17 + $0x368] sm:$0xf0] }
 0x274   :  { %v5867_v50 = vld [vmem:[#allocation17 + $0x64] sm:$0xf0]  ;;  %v6023_v36 = vld [vmem:[#allocation17 + $0x54c] sm:$0xf] }
 0x275   :  { %v4790_v57 = vld [vmem:[#allocation17 + $0x248] sm:$0xf]  ;;  %2851 = vmatpush.bf16.msra.mxu3 %v4567_v42  ;;  %2864 = vmatpush.bf16.msrb.mxu0 %v4823_v47  ;;  %v4535_v0 = vor.u32 %v5867_v50, %v4534_v15  ;;  %v5176_v39 = vld [vmem:[#allocation17 + $0x568] sm:$0xf0]  ;;  %v4667_v42 = vor.u32 %v5895_v32, %v4664_v19  ;;  %v4923_v47 = vor.u32 %v5959_v48, %v4920_v35 }
 0x276   :  { %v5931_v58 = vld [vmem:[#allocation17 + $0x264] sm:$0xf0]  ;;  %2877 = vmatpush.bf16.msrb.mxu1 %v5079_v55  ;;  %2890 = vmatpush.bf16.msrb.mxu2 %v5335_v13  ;;  %v6087_v40 = vld [vmem:[#allocation17 + $0x74c] sm:$0xf]  ;;  %v5179_v55 = vor.u32 %v6023_v36, %v5176_v39 }
 0x277   :  { %v5046_v60 = vld [vmem:[#allocation17 + $0x448] sm:$0xf]  ;;  %v4791_v1 = vor.u32 %v5931_v58, %v4790_v57  ;;  %v5432_v41 = vld [vmem:[#allocation17 + $0x768] sm:$0xf0] }
 0x278   :  { %v5995_v53 = vld [vmem:[#allocation17 + $0x464] sm:$0xf0]  ;;  %v5887_v15 = vld [vmem:[#allocation17 + $0x10c] sm:$0xf]  ;;  %v5435_v13 = vor.u32 %v6087_v40, %v5432_v41 }
 0x279   :  { %v5302_v61 = vld [vmem:[#allocation17 + $0x648] sm:$0xf]  ;;  %v5047_v62 = vor.u32 %v5995_v53, %v5046_v60  ;;  %2852 = vmatpush.bf16.msra.mxu3 %v4535_v0  ;;  %2865 = vmatpush.bf16.msrb.mxu0 %v4791_v1  ;;  %v4632_v50 = vld [vmem:[#allocation17 + $0x128] sm:$0xf0] }
 0x27a   :  { %v6059_v59 = vld [vmem:[#allocation17 + $0x664] sm:$0xf0]  ;;  %v5951_v57 = vld [vmem:[#allocation17 + $0x30c] sm:$0xf] }
 0x27b   :  { %v4502_v63 = vld [vmem:[#allocation17 + $0x8] sm:$0xf]  ;;  %v5303_v38 = vor.u32 %v6059_v59, %v5302_v61  ;;  %2878 = vmatpush.bf16.msrb.mxu1 %v5047_v62  ;;  %v4888_v58 = vld [vmem:[#allocation17 + $0x328] sm:$0xf0] }
 0x27c   :  { %v5859_v2 = vld [vmem:[#allocation17 + $0x24] sm:$0xf0]  ;;  %v6015_v60 = vld [vmem:[#allocation17 + $0x50c] sm:$0xf]  ;;  %v4891_v0 = vor.u32 %v5951_v57, %v4888_v58  ;;  %v6044_v58 = vld [vmem:[#allocation17 + $0x5ec] sm:$0xf0] }
 0x27d   :  { %v4758_v33 = vld [vmem:[#allocation17 + $0x208] sm:$0xf]  ;;  %v4503_v17 = vor.u32 %v5859_v2, %v4502_v63  ;;  %2891 = vmatpush.bf16.msrb.mxu2 %v5303_v38  ;;  %v5144_v53 = vld [vmem:[#allocation17 + $0x528] sm:$0xf0]  ;;  %v4635_v63 = vor.u32 %v5887_v15, %v4632_v50  ;;  %v4990_v15 = vld [vmem:[#allocation17 + $0x3d0] sm:$0xf] }
 0x27e   :  { %v5923_v4 = vld [vmem:[#allocation17 + $0x224] sm:$0xf0]  ;;  %v6079_v61 = vld [vmem:[#allocation17 + $0x70c] sm:$0xf]  ;;  %v5980_v50 = vld [vmem:[#allocation17 + $0x3ec] sm:$0xf0] }
 0x27f   :  { %v5014_v43 = vld [vmem:[#allocation17 + $0x408] sm:$0xf]  ;;  %v4759_v3 = vor.u32 %v5923_v4, %v4758_v33  ;;  %2853 = vmatpush.bf16.msra.mxu3 %v4503_v17  ;;  %v5400_v59 = vld [vmem:[#allocation17 + $0x728] sm:$0xf0]  ;;  %v5147_v33 = vor.u32 %v6015_v60, %v5144_v53  ;;  %v5502_v60 = vld [vmem:[#allocation17 + $0x7d0] sm:$0xf] }
 0x280   :  { %v5987_v5 = vld [vmem:[#allocation17 + $0x424] sm:$0xf0]  ;;  %v5879_v1 = vld [vmem:[#allocation17 + $0xcc] sm:$0xf]  ;;  %v5403_v4 = vor.u32 %v6079_v61, %v5400_v59  ;;  %v6108_v53 = vld [vmem:[#allocation17 + $0x7ec] sm:$0xf0] }
 0x281   :  { %v5270_v9 = vld [vmem:[#allocation17 + $0x608] sm:$0xf]  ;;  %v5015_v20 = vor.u32 %v5987_v5, %v5014_v43  ;;  %2866 = vmatpush.bf16.msrb.mxu0 %v4759_v3  ;;  %v4600_v2 = vld [vmem:[#allocation17 + $0xe8] sm:$0xf0] }
 0x282   :  { %v6051_v31 = vld [vmem:[#allocation17 + $0x624] sm:$0xf0]  ;;  %2854 = vmatmul.bf16.vlgmr.msra.gmra.mxu3 %v6939_v44  ;;  %v5943_v62 = vld [vmem:[#allocation17 + $0x2cc] sm:$0xf]  ;;  %v4603_v10 = vor.u32 %v5879_v1, %v4600_v2  ;;  %v4702_v1 = vld [vmem:[#allocation17 + $0x190] sm:$0xf] }
 0x283   :  { %v5271_v46 = vor.u32 %v6051_v31, %v5270_v9  ;;  %2879 = vmatpush.bf16.msrb.mxu1 %v5015_v20  ;;  %2898 = vmatpush.bf16.msrb.mxu3 %v4731_v21  ;;  %v4856_v38 = vld [vmem:[#allocation17 + $0x2e8] sm:$0xf0]  ;;  %v5908_v2 = vld [vmem:[#allocation17 + $0x1ac] sm:$0xf0] }
 0x284   :  { %2867 = vmatmul.bf16.vlgmr.msrb.gmra.mxu0 %v6941_v51  ;;  %v6007_v43 = vld [vmem:[#allocation17 + $0x4cc] sm:$0xf]  ;;  %v4859_v11 = vor.u32 %v5943_v62, %v4856_v38  ;;  %v4958_v62 = vld [vmem:[#allocation17 + $0x390] sm:$0xf] }
 0x285   :  { %2892 = vmatpush.bf16.msrb.mxu2 %v5271_v46  ;;  %2911 = vmatpush.bf16.msra.mxu0 %v4987_v22  ;;  %v5112_v5 = vld [vmem:[#allocation17 + $0x4e8] sm:$0xf0]  ;;  %v5972_v38 = vld [vmem:[#allocation17 + $0x3ac] sm:$0xf0] }
 0x286   :  { %2880 = vmatmul.bf16.vlgmr.msrb.gmra.mxu1 %v6945_v54  ;;  %v6071_v9 = vld [vmem:[#allocation17 + $0x6cc] sm:$0xf]  ;;  %v5115_v16 = vor.u32 %v6007_v43, %v5112_v5  ;;  %v5214_v43 = vld [vmem:[#allocation17 + $0x590] sm:$0xf] }
 0x287   :  { %2924 = vmatpush.bf16.msra.mxu1 %v5243_v6  ;;  %2899 = vmatpush.bf16.msrb.mxu3 %v4699_v49  ;;  %v5368_v31 = vld [vmem:[#allocation17 + $0x6e8] sm:$0xf0]  ;;  %v6036_v5 = vld [vmem:[#allocation17 + $0x5ac] sm:$0xf0] }
 0x288   :  { %2893 = vmatmul.bf16.vlgmr.msrb.gmra.mxu2 %v6943_v52  ;;  %v5871_v12 = vld [vmem:[#allocation17 + $0x8c] sm:$0xf]  ;;  %v5371_v17 = vor.u32 %v6071_v9, %v5368_v31  ;;  %v5470_v9 = vld [vmem:[#allocation17 + $0x790] sm:$0xf] }
 0x289   :  { %2937 = vmatpush.bf16.msra.mxu2 %v5499_v25  ;;  %2912 = vmatpush.bf16.msra.mxu0 %v4955_v23  ;;  %v4568_v14 = vld [vmem:[#allocation17 + $0xa8] sm:$0xf0]  ;;  %v6100_v31 = vld [vmem:[#allocation17 + $0x7ac] sm:$0xf0] }
 0x28a   :  { %v5935_v3 = vld [vmem:[#allocation17 + $0x28c] sm:$0xf]  ;;  %v4571_v21 = vor.u32 %v5871_v12, %v4568_v14  ;;  %v4670_v12 = vld [vmem:[#allocation17 + $0x150] sm:$0xf] }
 0x28b   :  { %2925 = vmatpush.bf16.msra.mxu1 %v5211_v56  ;;  %2900 = vmatpush.bf16.msrb.mxu3 %v4667_v42  ;;  %v4824_v18 = vld [vmem:[#allocation17 + $0x2a8] sm:$0xf0]  ;;  %v4734_v42 = vld [vmem:[#allocation17 + $0x1d0] sm:$0xf] }
 0x28c   :  { %v5999_v37 = vld [vmem:[#allocation17 + $0x48c] sm:$0xf]  ;;  %v4827_v22 = vor.u32 %v5935_v3, %v4824_v18  ;;  %v5900_v14 = vld [vmem:[#allocation17 + $0x16c] sm:$0xf0] }
 0x28d   :  { %2938 = vmatpush.bf16.msra.mxu2 %v5467_v34  ;;  %2913 = vmatpush.bf16.msra.mxu0 %v4923_v47  ;;  %v5080_v7 = vld [vmem:[#allocation17 + $0x4a8] sm:$0xf0]  ;;  %v5916_v47 = vld [vmem:[#allocation17 + $0x1ec] sm:$0xf0] }
 0x28e   :  { %v6063_v20 = vld [vmem:[#allocation17 + $0x68c] sm:$0xf]  ;;  %v5083_v6 = vor.u32 %v5999_v37, %v5080_v7  ;;  %v4926_v3 = vld [vmem:[#allocation17 + $0x350] sm:$0xf] }
 0x28f   :  { %2926 = vmatpush.bf16.msra.mxu1 %v5179_v55  ;;  %2901 = vmatpush.bf16.msrb.mxu3 %v4635_v63  ;;  %v5336_v46 = vld [vmem:[#allocation17 + $0x6a8] sm:$0xf0]  ;;  %v5246_v55 = vld [vmem:[#allocation17 + $0x5d0] sm:$0xf]  ;;  %v4735_v63 = vor.u32 %v5916_v47, %v4734_v42 }
 0x290   :  { %v5863_v24 = vld [vmem:[#allocation17 + $0x4c] sm:$0xf]  ;;  %v5339_v25 = vor.u32 %v6063_v20, %v5336_v46  ;;  %v5964_v18 = vld [vmem:[#allocation17 + $0x36c] sm:$0xf0] }
 0x291   :  { %2939 = vmatpush.bf16.msra.mxu2 %v5435_v13  ;;  %2914 = vmatpush.bf16.msra.mxu0 %v4891_v0  ;;  %v4536_v45 = vld [vmem:[#allocation17 + $0x68] sm:$0xf0]  ;;  %v4991_v0 = vor.u32 %v5980_v50, %v4990_v15  ;;  %v5182_v37 = vld [vmem:[#allocation17 + $0x550] sm:$0xf] }
 0x292   :  { %v5927_v26 = vld [vmem:[#allocation17 + $0x24c] sm:$0xf]  ;;  %v4539_v23 = vor.u32 %v5863_v24, %v4536_v45  ;;  %v6028_v7 = vld [vmem:[#allocation17 + $0x56c] sm:$0xf0] }
 0x293   :  { %2927 = vmatpush.bf16.msra.mxu1 %v5147_v33  ;;  %2902 = vmatpush.bf16.msrb.mxu3 %v4603_v10  ;;  %v4792_v8 = vld [vmem:[#allocation17 + $0x268] sm:$0xf0]  ;;  %v5247_v33 = vor.u32 %v6044_v58, %v5246_v55  ;;  %v4703_v10 = vor.u32 %v5908_v2, %v4702_v1  ;;  %v5438_v20 = vld [vmem:[#allocation17 + $0x750] sm:$0xf] }
 0x294   :  { %v5991_v27 = vld [vmem:[#allocation17 + $0x44c] sm:$0xf]  ;;  %v4795_v32 = vor.u32 %v5927_v26, %v4792_v8  ;;  %v6092_v46 = vld [vmem:[#allocation17 + $0x76c] sm:$0xf0] }
 0x295   :  { %2940 = vmatpush.bf16.msra.mxu2 %v5403_v4  ;;  %2915 = vmatpush.bf16.msra.mxu0 %v4859_v11  ;;  %v5048_v28 = vld [vmem:[#allocation17 + $0x468] sm:$0xf0]  ;;  %v5503_v4 = vor.u32 %v6108_v53, %v5502_v60  ;;  %v4959_v11 = vor.u32 %v5972_v38, %v4958_v62  ;;  %v4638_v24 = vld [vmem:[#allocation17 + $0x110] sm:$0xf] }
 0x296   :  { %v6055_v29 = vld [vmem:[#allocation17 + $0x64c] sm:$0xf]  ;;  %v5051_v48 = vor.u32 %v5991_v27, %v5048_v28  ;;  %v5892_v45 = vld [vmem:[#allocation17 + $0x12c] sm:$0xf0] }
 0x297   :  { %2928 = vmatpush.bf16.msra.mxu1 %v5115_v16  ;;  %v5304_v30 = vld [vmem:[#allocation17 + $0x668] sm:$0xf0]  ;;  %2903 = vmatpush.bf16.msrb.mxu3 %v4571_v21  ;;  %v5215_v16 = vor.u32 %v6036_v5, %v5214_v43  ;;  %v4671_v21 = vor.u32 %v5900_v14, %v4670_v12  ;;  %v4894_v26 = vld [vmem:[#allocation17 + $0x310] sm:$0xf] }
 0x298   :  { %v5855_v49 = vld [vmem:[#allocation17 + $0xc] sm:$0xf]  ;;  %v5307_v35 = vor.u32 %v6055_v29, %v5304_v30  ;;  %v5956_v8 = vld [vmem:[#allocation17 + $0x32c] sm:$0xf0] }
 0x299   :  { %2941 = vmatpush.bf16.msra.mxu2 %v5371_v17  ;;  %2916 = vmatpush.bf16.msra.mxu0 %v4827_v22  ;;  %v4504_v19 = vld [vmem:[#allocation17 + $0x28] sm:$0xf0]  ;;  %v5471_v17 = vor.u32 %v6100_v31, %v5470_v9  ;;  %v4927_v22 = vor.u32 %v5964_v18, %v4926_v3  ;;  %v5150_v27 = vld [vmem:[#allocation17 + $0x510] sm:$0xf] }
 0x29a   :  { %v5919_v56 = vld [vmem:[#allocation17 + $0x20c] sm:$0xf]  ;;  %v4507_v13 = vor.u32 %v5855_v49, %v4504_v19  ;;  %v6020_v28 = vld [vmem:[#allocation17 + $0x52c] sm:$0xf0]  ;;  %v4639_v49 = vor.u32 %v5892_v45, %v4638_v24  ;;  %v5976_v24 = vld [vmem:[#allocation17 + $0x3d4] sm:$0xf] }
 0x29b   :  { %v4760_v34 = vld [vmem:[#allocation17 + $0x228] sm:$0xf0]  ;;  %2929 = vmatpush.bf16.msra.mxu1 %v5083_v6  ;;  %2904 = vmatpush.bf16.msrb.mxu3 %v4539_v23  ;;  %v5183_v6 = vor.u32 %v6028_v7, %v5182_v37  ;;  %v5406_v29 = vld [vmem:[#allocation17 + $0x710] sm:$0xf]  ;;  %v4895_v23 = vor.u32 %v5956_v8, %v4894_v26  ;;  %v4992_v45 = vld [vmem:[#allocation17 + $0x3f0] sm:$0xf0] }
 0x29c   :  { %v5983_v36 = vld [vmem:[#allocation17 + $0x40c] sm:$0xf]  ;;  %v4763_v57 = vor.u32 %v5919_v56, %v4760_v34  ;;  %v6084_v30 = vld [vmem:[#allocation17 + $0x72c] sm:$0xf0]  ;;  %v5151_v56 = vor.u32 %v6020_v28, %v5150_v27  ;;  %v5248_v8 = vld [vmem:[#allocation17 + $0x5f0] sm:$0xf0] }
 0x29d   :  { %2942 = vmatpush.bf16.msra.mxu2 %v5339_v25  ;;  %v5016_v39 = vld [vmem:[#allocation17 + $0x428] sm:$0xf0]  ;;  %2917 = vmatpush.bf16.msra.mxu0 %v4795_v32  ;;  %v5439_v25 = vor.u32 %v6092_v46, %v5438_v20  ;;  %v4606_v32 = vld [vmem:[#allocation17 + $0xd0] sm:$0xf]  ;;  %v5407_v34 = vor.u32 %v6084_v30, %v5406_v29  ;;  %v6104_v27 = vld [vmem:[#allocation17 + $0x7d4] sm:$0xf] }
 0x29e   :  { %v6047_v40 = vld [vmem:[#allocation17 + $0x60c] sm:$0xf]  ;;  %v5019_v61 = vor.u32 %v5983_v36, %v5016_v39  ;;  %v5884_v19 = vld [vmem:[#allocation17 + $0xec] sm:$0xf0]  ;;  %v5504_v28 = vld [vmem:[#allocation17 + $0x7f0] sm:$0xf0] }
 0x29f   :  { %v5272_v41 = vld [vmem:[#allocation17 + $0x628] sm:$0xf0]  ;;  %2930 = vmatpush.bf16.msra.mxu1 %v5051_v48  ;;  %2905 = vmatpush.bf16.msrb.mxu3 %v4507_v13  ;;  %v4862_v48 = vld [vmem:[#allocation17 + $0x2d0] sm:$0xf]  ;;  %v4607_v42 = vor.u32 %v5884_v19, %v4606_v32  ;;  %v5904_v32 = vld [vmem:[#allocation17 + $0x194] sm:$0xf] }
 0x2a0   :  { %v5275_v59 = vor.u32 %v6047_v40, %v5272_v41  ;;  %v5118_v36 = vld [vmem:[#allocation17 + $0x4d0] sm:$0xf]  ;;  %v4704_v19 = vld [vmem:[#allocation17 + $0x1b0] sm:$0xf0] }
 0x2a1   :  { %2943 = vmatpush.bf16.msra.mxu2 %v5307_v35  ;;  %2918 = vmatpush.bf16.msra.mxu0 %v4763_v57  ;;  %v5948_v35 = vld [vmem:[#allocation17 + $0x2ec] sm:$0xf0] }
 0x2a2   :  { %2906 = vmatmul.bf16.vlgmr.msrb.gmra.mxu3 %v6939_v44  ;;  %v6012_v39 = vld [vmem:[#allocation17 + $0x4ec] sm:$0xf0]  ;;  %v4863_v47 = vor.u32 %v5948_v35, %v4862_v48  ;;  %v5968_v48 = vld [vmem:[#allocation17 + $0x394] sm:$0xf] }
 0x2a3   :  { %2931 = vmatpush.bf16.msra.mxu1 %v5019_v61  ;;  %2950 = vmatpush.bf16.msra.mxu3 %v4735_v63  ;;  %v5374_v40 = vld [vmem:[#allocation17 + $0x6d0] sm:$0xf]  ;;  %v5119_v55 = vor.u32 %v6012_v39, %v5118_v36  ;;  %v4960_v35 = vld [vmem:[#allocation17 + $0x3b0] sm:$0xf0] }
 0x2a4   :  { %2919 = vmatmul.bf16.vlgmr.msra.gmra.mxu0 %v6941_v51  ;;  %v6076_v41 = vld [vmem:[#allocation17 + $0x6ec] sm:$0xf0]  ;;  %v6032_v36 = vld [vmem:[#allocation17 + $0x594] sm:$0xf] }
 0x2a5   :  { %2944 = vmatpush.bf16.msra.mxu2 %v5275_v59  ;;  %2963 = vmatpush.bf16.msrb.mxu0 %v4991_v0  ;;  %v4574_v15 = vld [vmem:[#allocation17 + $0x90] sm:$0xf]  ;;  %v5375_v13 = vor.u32 %v6076_v41, %v5374_v40  ;;  %v5216_v39 = vld [vmem:[#allocation17 + $0x5b0] sm:$0xf0] }
 0x2a6   :  { %2932 = vmatmul.bf16.vlgmr.msra.gmra.mxu1 %v6945_v54  ;;  %v5876_v50 = vld [vmem:[#allocation17 + $0xac] sm:$0xf0]  ;;  %v6096_v40 = vld [vmem:[#allocation17 + $0x794] sm:$0xf] }
 0x2a7   :  { %2976 = vmatpush.bf16.msrb.mxu1 %v5247_v33  ;;  %2951 = vmatpush.bf16.msra.mxu3 %v4703_v10  ;;  %v4830_v57 = vld [vmem:[#allocation17 + $0x290] sm:$0xf]  ;;  %v4575_v63 = vor.u32 %v5876_v50, %v4574_v15  ;;  %v5472_v41 = vld [vmem:[#allocation17 + $0x7b0] sm:$0xf0] }
 0x2a8   :  { %2945 = vmatmul.bf16.vlgmr.msra.gmra.mxu2 %v6943_v52  ;;  %v5940_v58 = vld [vmem:[#allocation17 + $0x2ac] sm:$0xf0]  ;;  %v5896_v15 = vld [vmem:[#allocation17 + $0x154] sm:$0xf] }
 0x2a9   :  { %2989 = vmatpush.bf16.msrb.mxu2 %v5503_v4  ;;  %2964 = vmatpush.bf16.msrb.mxu0 %v4959_v11  ;;  %v5086_v60 = vld [vmem:[#allocation17 + $0x490] sm:$0xf]  ;;  %v4831_v0 = vor.u32 %v5940_v58, %v4830_v57  ;;  %v4672_v50 = vld [vmem:[#allocation17 + $0x170] sm:$0xf0] }
 0x2aa   :  { %v6004_v53 = vld [vmem:[#allocation17 + $0x4ac] sm:$0xf0]  ;;  %v5960_v57 = vld [vmem:[#allocation17 + $0x354] sm:$0xf] }
 0x2ab   :  { %2977 = vmatpush.bf16.msrb.mxu1 %v5215_v16  ;;  %2952 = vmatpush.bf16.msra.mxu3 %v4671_v21  ;;  %v5342_v61 = vld [vmem:[#allocation17 + $0x690] sm:$0xf]  ;;  %v5087_v33 = vor.u32 %v6004_v53, %v5086_v60  ;;  %v5912_v21 = vld [vmem:[#allocation17 + $0x1d4] sm:$0xf] }
 0x2ac   :  { %v6068_v59 = vld [vmem:[#allocation17 + $0x6ac] sm:$0xf0]  ;;  %v4928_v58 = vld [vmem:[#allocation17 + $0x370] sm:$0xf0] }
 0x2ad   :  { %2990 = vmatpush.bf16.msrb.mxu2 %v5471_v17  ;;  %2965 = vmatpush.bf16.msrb.mxu0 %v4927_v22  ;;  %v4542_v1 = vld [vmem:[#allocation17 + $0x50] sm:$0xf]  ;;  %v5343_v4 = vor.u32 %v6068_v59, %v5342_v61  ;;  %v4736_v22 = vld [vmem:[#allocation17 + $0x1f0] sm:$0xf0] }
 0x2ae   :  { %v5868_v2 = vld [vmem:[#allocation17 + $0x6c] sm:$0xf0]  ;;  %v6024_v60 = vld [vmem:[#allocation17 + $0x554] sm:$0xf] }
 0x2af   :  { %2978 = vmatpush.bf16.msrb.mxu1 %v5183_v6  ;;  %2953 = vmatpush.bf16.msra.mxu3 %v4639_v49  ;;  %v4798_v62 = vld [vmem:[#allocation17 + $0x250] sm:$0xf]  ;;  %v4543_v11 = vor.u32 %v5868_v2, %v4542_v1  ;;  %v6040_v6 = vld [vmem:[#allocation17 + $0x5d4] sm:$0xf]  ;;  %v4739_v49 = vor.u32 %v5912_v21, %v4736_v22 }
 0x2b0   :  { %v5932_v38 = vld [vmem:[#allocation17 + $0x26c] sm:$0xf0]  ;;  %v5184_v53 = vld [vmem:[#allocation17 + $0x570] sm:$0xf0] }
 0x2b1   :  { %2991 = vmatpush.bf16.msrb.mxu2 %v5439_v25  ;;  %2966 = vmatpush.bf16.msrb.mxu0 %v4895_v23  ;;  %v5054_v43 = vld [vmem:[#allocation17 + $0x450] sm:$0xf]  ;;  %v4799_v12 = vor.u32 %v5932_v38, %v4798_v62  ;;  %v4995_v23 = vor.u32 %v5976_v24, %v4992_v45  ;;  %v6088_v61 = vld [vmem:[#allocation17 + $0x754] sm:$0xf] }
 0x2b2   :  { %v5996_v5 = vld [vmem:[#allocation17 + $0x46c] sm:$0xf0]  ;;  %v5440_v59 = vld [vmem:[#allocation17 + $0x770] sm:$0xf0] }
 0x2b3   :  { %2979 = vmatpush.bf16.msrb.mxu1 %v5151_v56  ;;  %2954 = vmatpush.bf16.msra.mxu3 %v4607_v42  ;;  %v5310_v9 = vld [vmem:[#allocation17 + $0x650] sm:$0xf]  ;;  %v5055_v3 = vor.u32 %v5996_v5, %v5054_v43  ;;  %v5251_v56 = vor.u32 %v6040_v6, %v5248_v8  ;;  %v4707_v42 = vor.u32 %v5904_v32, %v4704_v19  ;;  %v5888_v1 = vld [vmem:[#allocation17 + $0x114] sm:$0xf] }
 0x2b4   :  { %v6060_v31 = vld [vmem:[#allocation17 + $0x66c] sm:$0xf0]  ;;  %v4640_v2 = vld [vmem:[#allocation17 + $0x130] sm:$0xf0] }
 0x2b5   :  { %2992 = vmatpush.bf16.msrb.mxu2 %v5407_v34  ;;  %2967 = vmatpush.bf16.msrb.mxu0 %v4863_v47  ;;  %v4510_v10 = vld [vmem:[#allocation17 + $0x10] sm:$0xf]  ;;  %v5311_v18 = vor.u32 %v6060_v31, %v5310_v9  ;;  %v5507_v34 = vor.u32 %v6104_v27, %v5504_v28  ;;  %v4963_v47 = vor.u32 %v5968_v48, %v4960_v35  ;;  %v5952_v62 = vld [vmem:[#allocation17 + $0x314] sm:$0xf] }
 0x2b6   :  { %v5860_v14 = vld [vmem:[#allocation17 + $0x2c] sm:$0xf0]  ;;  %v4896_v38 = vld [vmem:[#allocation17 + $0x330] sm:$0xf0] }
 0x2b7   :  { %2980 = vmatpush.bf16.msrb.mxu1 %v5119_v55  ;;  %2955 = vmatpush.bf16.msra.mxu3 %v4575_v63  ;;  %v4766_v16 = vld [vmem:[#allocation17 + $0x210] sm:$0xf]  ;;  %v4511_v25 = vor.u32 %v5860_v14, %v4510_v10  ;;  %v5219_v55 = vor.u32 %v6032_v36, %v5216_v39  ;;  %v4675_v63 = vor.u32 %v5896_v15, %v4672_v50  ;;  %v6016_v43 = vld [vmem:[#allocation17 + $0x514] sm:$0xf] }
 0x2b8   :  { %v5924_v17 = vld [vmem:[#allocation17 + $0x22c] sm:$0xf0]  ;;  %v5152_v5 = vld [vmem:[#allocation17 + $0x530] sm:$0xf0]  ;;  %v4643_v10 = vor.u32 %v5888_v1, %v4640_v2  ;;  %v4998_v1 = vld [vmem:[#allocation17 + $0x3d8] sm:$0xf] }
 0x2b9   :  { %2993 = vmatpush.bf16.msrb.mxu2 %v5375_v13  ;;  %2968 = vmatpush.bf16.msrb.mxu0 %v4831_v0  ;;  %v5022_v37 = vld [vmem:[#allocation17 + $0x410] sm:$0xf]  ;;  %v4767_v26 = vor.u32 %v5924_v17, %v4766_v16  ;;  %v5475_v13 = vor.u32 %v6096_v40, %v5472_v41  ;;  %v4931_v0 = vor.u32 %v5960_v57, %v4928_v58  ;;  %v6080_v9 = vld [vmem:[#allocation17 + $0x714] sm:$0xf]  ;;  %v5981_v2 = vld [vmem:[#allocation17 + $0x3f4] sm:$0xf0] }
 0x2ba   :  { %v5988_v7 = vld [vmem:[#allocation17 + $0x42c] sm:$0xf0]  ;;  %v5408_v31 = vld [vmem:[#allocation17 + $0x730] sm:$0xf0]  ;;  %v5155_v16 = vor.u32 %v6016_v43, %v5152_v5  ;;  %v5510_v43 = vld [vmem:[#allocation17 + $0x7d8] sm:$0xf] }
 0x2bb   :  { %2981 = vmatpush.bf16.msrb.mxu1 %v5087_v33  ;;  %v5278_v20 = vld [vmem:[#allocation17 + $0x610] sm:$0xf]  ;;  %2956 = vmatpush.bf16.msra.mxu3 %v4543_v11  ;;  %v5023_v29 = vor.u32 %v5988_v7, %v5022_v37  ;;  %v5187_v33 = vor.u32 %v6024_v60, %v5184_v53  ;;  %v4899_v11 = vor.u32 %v5952_v62, %v4896_v38  ;;  %v4608_v14 = vld [vmem:[#allocation17 + $0xf0] sm:$0xf0]  ;;  %v6045_v38 = vld [vmem:[#allocation17 + $0x5f4] sm:$0xf0] }
 0x2bc   :  { %v6052_v46 = vld [vmem:[#allocation17 + $0x62c] sm:$0xf0]  ;;  %v5411_v17 = vor.u32 %v6080_v9, %v5408_v31  ;;  %v6008_v37 = vld [vmem:[#allocation17 + $0x4d4] sm:$0xf]  ;;  %v6109_v5 = vld [vmem:[#allocation17 + $0x7f4] sm:$0xf0] }
 0x2bd   :  { %2994 = vmatpush.bf16.msrb.mxu2 %v5343_v4  ;;  %2969 = vmatpush.bf16.msrb.mxu0 %v4799_v12  ;;  %v5279_v30 = vor.u32 %v6052_v46, %v5278_v20  ;;  %v5443_v4 = vor.u32 %v6088_v61, %v5440_v59  ;;  %v5880_v12 = vld [vmem:[#allocation17 + $0xd4] sm:$0xf] }
 0x2be   :  { %v5120_v7 = vld [vmem:[#allocation17 + $0x4f0] sm:$0xf0]  ;;  %v4611_v21 = vor.u32 %v5880_v12, %v4608_v14  ;;  %v4710_v12 = vld [vmem:[#allocation17 + $0x198] sm:$0xf] }
 0x2bf   :  { %2982 = vmatpush.bf16.msrb.mxu1 %v5055_v3  ;;  %2957 = vmatpush.bf16.msra.mxu3 %v4511_v25  ;;  %v5944_v3 = vld [vmem:[#allocation17 + $0x2d4] sm:$0xf]  ;;  %v5123_v6 = vor.u32 %v6008_v37, %v5120_v7  ;;  %v5909_v14 = vld [vmem:[#allocation17 + $0x1b4] sm:$0xf0] }
 0x2c0   :  { %v6072_v20 = vld [vmem:[#allocation17 + $0x6d4] sm:$0xf]  ;;  %v5222_v37 = vld [vmem:[#allocation17 + $0x598] sm:$0xf] }
 0x2c1   :  { %2995 = vmatpush.bf16.msrb.mxu2 %v5311_v18  ;;  %2970 = vmatpush.bf16.msrb.mxu0 %v4767_v26  ;;  %v4864_v18 = vld [vmem:[#allocation17 + $0x2f0] sm:$0xf0]  ;;  %v6037_v7 = vld [vmem:[#allocation17 + $0x5b4] sm:$0xf0] }
 0x2c2   :  { %2958 = vmatmul.bf16.vlgmr.msra.gmra.mxu3 %v6939_v44  ;;  %v5376_v46 = vld [vmem:[#allocation17 + $0x6f0] sm:$0xf0]  ;;  %v4867_v22 = vor.u32 %v5944_v3, %v4864_v18  ;;  %v4966_v3 = vld [vmem:[#allocation17 + $0x398] sm:$0xf] }
 0x2c3   :  { %2983 = vmatpush.bf16.msrb.mxu1 %v5023_v29  ;;  %3002 = vmatpush.bf16.msrb.mxu3 %v4739_v49  ;;  %v5872_v24 = vld [vmem:[#allocation17 + $0x94] sm:$0xf]  ;;  %v5379_v25 = vor.u32 %v6072_v20, %v5376_v46  ;;  %v5973_v18 = vld [vmem:[#allocation17 + $0x3b4] sm:$0xf0] }
 0x2c4   :  { %2971 = vmatmul.bf16.vlgmr.msrb.gmra.mxu0 %v6941_v51  ;;  %v4576_v45 = vld [vmem:[#allocation17 + $0xb0] sm:$0xf0]  ;;  %v5478_v20 = vld [vmem:[#allocation17 + $0x798] sm:$0xf] }
 0x2c5   :  { %2996 = vmatpush.bf16.msrb.mxu2 %v5279_v30  ;;  %3015 = vmatpush.bf16.msra.mxu0 %v4995_v23  ;;  %v5936_v26 = vld [vmem:[#allocation17 + $0x294] sm:$0xf]  ;;  %v4579_v49 = vor.u32 %v5872_v24, %v4576_v45  ;;  %v6101_v46 = vld [vmem:[#allocation17 + $0x7b4] sm:$0xf0] }
 0x2c6   :  { %2984 = vmatmul.bf16.vlgmr.msrb.gmra.mxu1 %v6945_v54  ;;  %v4832_v8 = vld [vmem:[#allocation17 + $0x2b0] sm:$0xf0]  ;;  %v4678_v24 = vld [vmem:[#allocation17 + $0x158] sm:$0xf] }
 0x2c7   :  { %3028 = vmatpush.bf16.msra.mxu1 %v5251_v56  ;;  %3003 = vmatpush.bf16.msrb.mxu3 %v4707_v42  ;;  %v6000_v27 = vld [vmem:[#allocation17 + $0x494] sm:$0xf]  ;;  %v4835_v23 = vor.u32 %v5936_v26, %v4832_v8  ;;  %v5901_v45 = vld [vmem:[#allocation17 + $0x174] sm:$0xf0] }
 0x2c8   :  { %2997 = vmatmul.bf16.vlgmr.msrb.gmra.mxu2 %v6943_v52  ;;  %v5088_v28 = vld [vmem:[#allocation17 + $0x4b0] sm:$0xf0]  ;;  %v4934_v26 = vld [vmem:[#allocation17 + $0x358] sm:$0xf] }
 0x2c9   :  { %3041 = vmatpush.bf16.msra.mxu2 %v5507_v34  ;;  %3016 = vmatpush.bf16.msra.mxu0 %v4963_v47  ;;  %v6064_v29 = vld [vmem:[#allocation17 + $0x694] sm:$0xf]  ;;  %v5091_v56 = vor.u32 %v6000_v27, %v5088_v28  ;;  %v5965_v8 = vld [vmem:[#allocation17 + $0x374] sm:$0xf0] }
 0x2ca   :  { %v5344_v30 = vld [vmem:[#allocation17 + $0x6b0] sm:$0xf0]  ;;  %v5190_v27 = vld [vmem:[#allocation17 + $0x558] sm:$0xf] }
 0x2cb   :  { %3029 = vmatpush.bf16.msra.mxu1 %v5219_v55  ;;  %3004 = vmatpush.bf16.msrb.mxu3 %v4675_v63  ;;  %v5864_v32 = vld [vmem:[#allocation17 + $0x54] sm:$0xf]  ;;  %v5347_v34 = vor.u32 %v6064_v29, %v5344_v30  ;;  %v4742_v63 = vld [vmem:[#allocation17 + $0x1d8] sm:$0xf] }
 0x2cc   :  { %v4544_v19 = vld [vmem:[#allocation17 + $0x70] sm:$0xf0]  ;;  %v6029_v28 = vld [vmem:[#allocation17 + $0x574] sm:$0xf0] }
 0x2cd   :  { %3042 = vmatpush.bf16.msra.mxu2 %v5475_v13  ;;  %3017 = vmatpush.bf16.msra.mxu0 %v4931_v0  ;;  %v5928_v48 = vld [vmem:[#allocation17 + $0x254] sm:$0xf]  ;;  %v4547_v47 = vor.u32 %v5864_v32, %v4544_v19  ;;  %v5917_v0 = vld [vmem:[#allocation17 + $0x1f4] sm:$0xf0]  ;;  %v4679_v32 = vor.u32 %v5901_v45, %v4678_v24  ;;  %v4935_v19 = vor.u32 %v5965_v8, %v4934_v26 }
 0x2ce   :  { %v4800_v35 = vld [vmem:[#allocation17 + $0x270] sm:$0xf0]  ;;  %v5446_v29 = vld [vmem:[#allocation17 + $0x758] sm:$0xf] }
 0x2cf   :  { %3030 = vmatpush.bf16.msra.mxu1 %v5187_v33  ;;  %3005 = vmatpush.bf16.msrb.mxu3 %v4643_v10  ;;  %v5992_v36 = vld [vmem:[#allocation17 + $0x454] sm:$0xf]  ;;  %v4803_v15 = vor.u32 %v5928_v48, %v4800_v35  ;;  %v5254_v33 = vld [vmem:[#allocation17 + $0x5d8] sm:$0xf]  ;;  %v4743_v10 = vor.u32 %v5917_v0, %v4742_v63 }
 0x2d0   :  { %v5056_v39 = vld [vmem:[#allocation17 + $0x470] sm:$0xf0]  ;;  %v6093_v30 = vld [vmem:[#allocation17 + $0x774] sm:$0xf0] }
 0x2d1   :  { %3043 = vmatpush.bf16.msra.mxu2 %v5443_v4  ;;  %3018 = vmatpush.bf16.msra.mxu0 %v4899_v11  ;;  %v6056_v40 = vld [vmem:[#allocation17 + $0x654] sm:$0xf]  ;;  %v5059_v57 = vor.u32 %v5992_v36, %v5056_v39  ;;  %v4999_v11 = vor.u32 %v5981_v2, %v4998_v1  ;;  %v5893_v48 = vld [vmem:[#allocation17 + $0x134] sm:$0xf0]  ;;  %v5191_v36 = vor.u32 %v6029_v28, %v5190_v27 }
 0x2d2   :  { %v5312_v41 = vld [vmem:[#allocation17 + $0x670] sm:$0xf0]  ;;  %v4902_v35 = vld [vmem:[#allocation17 + $0x318] sm:$0xf]  ;;  %v5447_v39 = vor.u32 %v6093_v30, %v5446_v29 }
 0x2d3   :  { %3031 = vmatpush.bf16.msra.mxu1 %v5155_v16  ;;  %3006 = vmatpush.bf16.msrb.mxu3 %v4611_v21  ;;  %v5856_v42 = vld [vmem:[#allocation17 + $0x14] sm:$0xf]  ;;  %v5315_v58 = vor.u32 %v6056_v40, %v5312_v41  ;;  %v5255_v16 = vor.u32 %v6045_v38, %v5254_v33  ;;  %v4711_v21 = vor.u32 %v5909_v14, %v4710_v12  ;;  %v5957_v40 = vld [vmem:[#allocation17 + $0x334] sm:$0xf0] }
 0x2d4   :  { %v4512_v50 = vld [vmem:[#allocation17 + $0x30] sm:$0xf0]  ;;  %v5158_v41 = vld [vmem:[#allocation17 + $0x518] sm:$0xf] }
 0x2d5   :  { %3044 = vmatpush.bf16.msra.mxu2 %v5411_v17  ;;  %3019 = vmatpush.bf16.msra.mxu0 %v4867_v22  ;;  %v5920_v55 = vld [vmem:[#allocation17 + $0x214] sm:$0xf]  ;;  %v4515_v4 = vor.u32 %v5856_v42, %v4512_v50  ;;  %v5511_v17 = vor.u32 %v6109_v5, %v5510_v43  ;;  %v4967_v22 = vor.u32 %v5973_v18, %v4966_v3  ;;  %v6021_v42 = vld [vmem:[#allocation17 + $0x534] sm:$0xf0] }
 0x2d6   :  { %v4768_v13 = vld [vmem:[#allocation17 + $0x230] sm:$0xf0]  ;;  %v5949_v63 = vld [vmem:[#allocation17 + $0x2f4] sm:$0xf0] }
 0x2d7   :  { %3032 = vmatpush.bf16.msra.mxu1 %v5123_v6  ;;  %3007 = vmatpush.bf16.msrb.mxu3 %v4579_v49  ;;  %v5984_v60 = vld [vmem:[#allocation17 + $0x414] sm:$0xf]  ;;  %v4771_v62 = vor.u32 %v5920_v55, %v4768_v13  ;;  %v5223_v6 = vor.u32 %v6037_v7, %v5222_v37  ;;  %v4903_v13 = vor.u32 %v5957_v40, %v4902_v35  ;;  %v5126_v0 = vld [vmem:[#allocation17 + $0x4d8] sm:$0xf] }
 0x2d8   :  { %v5024_v53 = vld [vmem:[#allocation17 + $0x430] sm:$0xf0]  ;;  %v6013_v33 = vld [vmem:[#allocation17 + $0x4f4] sm:$0xf0] }
 0x2d9   :  { %3045 = vmatpush.bf16.msra.mxu2 %v5379_v25  ;;  %3020 = vmatpush.bf16.msra.mxu0 %v4835_v23  ;;  %v6048_v61 = vld [vmem:[#allocation17 + $0x614] sm:$0xf]  ;;  %v5027_v9 = vor.u32 %v5984_v60, %v5024_v53  ;;  %v5479_v25 = vor.u32 %v6101_v46, %v5478_v20  ;;  %v6974_v23 = vld [vmem:[%s7172_s12] sm:$0xff]  ;;  %v5159_v60 = vor.u32 %v6021_v42, %v5158_v41 }
 0x2da   :  { %v5280_v59 = vld [vmem:[#allocation17 + $0x630] sm:$0xf0]  ;;  %v1446_v50 = vperm.slane %v6974_v23, 0  ;;  %v5127_v12 = vor.u32 %v6013_v33, %v5126_v0  ;;  %v5094_v3 = vld [vmem:[#allocation17 + $0x498] sm:$0xf] }
 0x2db   :  { %3033 = vmatpush.bf16.msra.mxu1 %v5091_v56  ;;  %3008 = vmatpush.bf16.msrb.mxu3 %v4547_v47  ;;  %v5283_v31 = vor.u32 %v6048_v61, %v5280_v59  ;;  %v5414_v47 = vld [vmem:[#allocation17 + $0x718] sm:$0xf]  ;;  %v5977_v0 = vld [vmem:[#allocation17 + $0x3dc] sm:$0xf] }
 0x2dc   :  { %v2764_v49 = vpop.f32.mrf.mxu0  ;;  %v4870_v59 = vld [vmem:[#allocation17 + $0x2d8] sm:$0xf]  ;;  %v6041_v33 = vld [vmem:[#allocation17 + $0x5dc] sm:$0xf] }
 0x2dd   :  { %3046 = vmatpush.bf16.msra.mxu2 %v5347_v34  ;;  %3021 = vmatpush.bf16.msra.mxu0 %v4803_v15  ;;  %v2777_v56 = vpop.f32.mrf.mxu1  ;;  %v4646_v34 = vld [vmem:[#allocation17 + $0x118] sm:$0xf] }
 0x2de   :  { %v6085_v15 = vld [vmem:[#allocation17 + $0x734] sm:$0xf0]  ;;  %v4647_v55 = vor.u32 %v5893_v48, %v4646_v34 }
 0x2df   :  { %3034 = vmatpush.bf16.msra.mxu1 %v5059_v57  ;;  %3009 = vmatpush.bf16.msrb.mxu3 %v4515_v4  ;;  %v4614_v57 = vld [vmem:[#allocation17 + $0xd8] sm:$0xf]  ;;  %v5415_v53 = vor.u32 %v6085_v15, %v5414_v47 }
 0x2e0   :  { %v5382_v4 = vld [vmem:[#allocation17 + $0x6d8] sm:$0xf] }
 0x2e1   :  { %3047 = vmatpush.bf16.msra.mxu2 %v5315_v58  ;;  %3022 = vmatpush.bf16.msra.mxu0 %v4771_v62  ;;  %v5885_v58 = vld [vmem:[#allocation17 + $0xf4] sm:$0xf0] }
 0x2e2   :  { %3010 = vmatmul.bf16.vlgmr.msrb.gmra.mxu3 %v6939_v44  ;;  %v2751_v61 = vpop.f32.mrf.mxu3  ;;  %v6077_v62 = vld [vmem:[#allocation17 + $0x6f4] sm:$0xf0]  ;;  %v4615_v5 = vor.u32 %v5885_v58, %v4614_v57 }
 0x2e3   :  { %3035 = vmatpush.bf16.msra.mxu1 %v5027_v9  ;;  %3054 = vmatpush.bf16.msra.mxu3 %v4743_v10  ;;  %v2752_v1 = vadd.f32 %v2751_v61, %v1446_v50  ;;  %v2790_v2 = vpop.f32.mrf.mxu2  ;;  %v4871_v9 = vor.u32 %v5949_v63, %v4870_v59  ;;  %v4582_v10 = vld [vmem:[#allocation17 + $0x98] sm:$0xf]  ;;  %v5383_v14 = vor.u32 %v6077_v62, %v5382_v4  ;;  %v4744_v63 = vld [vmem:[#allocation17 + $0x1f8] sm:$0xf0] }
 0x2e4   :  { %3023 = vmatmul.bf16.vlgmr.msra.gmra.mxu0 %v6941_v51  ;;  %v2766_v38 = vpop.f32.mrf.mxu0  ;;  %v6005_v37 = vld [vmem:[#allocation17 + $0x4b4] sm:$0xf0]  ;;  %v5256_v4 = vld [vmem:[#allocation17 + $0x5f8] sm:$0xf0] }
 0x2e5   :  { %3048 = vmatpush.bf16.msra.mxu2 %v5283_v31  ;;  %3067 = vmatpush.bf16.msrb.mxu0 %v4999_v11  ;;  %v2765_v43 = vadd.f32 %v2764_v49, %v2752_v1  ;;  %v2779_v31 = vpop.f32.mrf.mxu1  ;;  %v5877_v11 = vld [vmem:[#allocation17 + $0xb4] sm:$0xf0]  ;;  %v1447_v1 = vperm.slane %v6974_v23, 1 }
 0x2e6   :  { %3036 = vmatmul.bf16.vlgmr.msra.gmra.mxu1 %v6945_v54  ;;  %v5350_v7 = vld [vmem:[#allocation17 + $0x698] sm:$0xf]  ;;  %v5512_v31 = vld [vmem:[#allocation17 + $0x7f8] sm:$0xf0] }
 0x2e7   :  { %3080 = vmatpush.bf16.msrb.mxu1 %v5255_v16  ;;  %3055 = vmatpush.bf16.msra.mxu3 %v4711_v21  ;;  %v4838_v16 = vld [vmem:[#allocation17 + $0x298] sm:$0xf]  ;;  %v2778_v18 = vadd.f32 %v2777_v56, %v2765_v43  ;;  %v4583_v21 = vor.u32 %v5877_v11, %v4582_v10 }
 0x2e8   :  { %3049 = vmatmul.bf16.vlgmr.msra.gmra.mxu2 %v6943_v52  ;;  %v6069_v20 = vld [vmem:[#allocation17 + $0x6b4] sm:$0xf0] }
 0x2e9   :  { %3093 = vmatpush.bf16.msrb.mxu2 %v5511_v17  ;;  %3068 = vmatpush.bf16.msrb.mxu0 %v4967_v22  ;;  %v5941_v17 = vld [vmem:[#allocation17 + $0x2b4] sm:$0xf0]  ;;  %v6977_v46 = vadd.f32 %v2790_v2, %v2778_v18  ;;  %v5351_v26 = vor.u32 %v6069_v20, %v5350_v7  ;;  %v5000_v2 = vld [vmem:[#allocation17 + $0x3f8] sm:$0xf0] }
 0x2ea   :  { %v4839_v22 = vor.u32 %v5941_v17, %v4838_v16  ;;  %v4550_v24 = vld [vmem:[#allocation17 + $0x58] sm:$0xf]  ;;  %v2753_v8 = vpop.f32.mrf.mxu3  ;;  %v5905_v16 = vld [vmem:[#allocation17 + $0x19c] sm:$0xf]  ;;  %v5003_v18 = vor.u32 %v5977_v0, %v5000_v2 }
 0x2eb   :  { %3081 = vmatpush.bf16.msrb.mxu1 %v5223_v6  ;;  %3056 = vmatpush.bf16.msra.mxu3 %v4679_v32  ;;  %v5869_v45 = vld [vmem:[#allocation17 + $0x74] sm:$0xf0]  ;;  %v3160_v30 = vrot.slane %v6977_v46, 4  ;;  %v3208_v49 = vmul.f32 %v6977_v46, %v6977_v46  ;;  %v2792_v32 = vpop.f32.mrf.mxu2  ;;  %v4712_v20 = vld [vmem:[#allocation17 + $0x1b8] sm:$0xf0] }
 0x2ec   :  { %v4806_v6 = vld [vmem:[#allocation17 + $0x258] sm:$0xf]  ;;  %v2816_v34 = vpop.f32.mrf.mxu0  ;;  %v4551_v42 = vor.u32 %v5869_v45, %v4550_v24  ;;  %v4715_v32 = vor.u32 %v5905_v16, %v4712_v20 }
 0x2ed   :  { %3094 = vmatpush.bf16.msrb.mxu2 %v5479_v25  ;;  %3069 = vmatpush.bf16.msrb.mxu0 %v4935_v19  ;;  %v5095_v25 = vor.u32 %v6005_v37, %v5094_v3  ;;  %v5933_v27 = vld [vmem:[#allocation17 + $0x274] sm:$0xf0]  ;;  %v3161_v40 = vadd.f32 %v3160_v30, %v6977_v46  ;;  %v3216_v41 = vrot.slane %v3208_v49, 4  ;;  %v2829_v15 = vpop.f32.mrf.mxu1  ;;  %v6097_v30 = vld [vmem:[#allocation17 + $0x79c] sm:$0xf] }
 0x2ee   :  { %v5062_v28 = vld [vmem:[#allocation17 + $0x458] sm:$0xf]  ;;  %v4807_v47 = vor.u32 %v5933_v27, %v4806_v6  ;;  %v4968_v6 = vld [vmem:[#allocation17 + $0x3b8] sm:$0xf0] }
 0x2ef   :  { %3082 = vmatpush.bf16.msrb.mxu1 %v5191_v36  ;;  %3057 = vmatpush.bf16.msra.mxu3 %v4647_v55  ;;  %v5997_v29 = vld [vmem:[#allocation17 + $0x474] sm:$0xf0]  ;;  %v3162_v61 = vrot.slane %v3161_v40, 2  ;;  %v3217_v59 = vadd.f32 %v3216_v41, %v3208_v49  ;;  %v5480_v49 = vld [vmem:[#allocation17 + $0x7b8] sm:$0xf0] }
 0x2f0   :  { %v5318_v19 = vld [vmem:[#allocation17 + $0x658] sm:$0xf] }
 0x2f1   :  { %3095 = vmatpush.bf16.msrb.mxu2 %v5447_v39  ;;  %3070 = vmatpush.bf16.msrb.mxu0 %v4903_v13  ;;  %v6061_v56 = vld [vmem:[#allocation17 + $0x674] sm:$0xf0]  ;;  %v5063_v13 = vor.u32 %v5997_v29, %v5062_v28  ;;  %v3163_v62 = vadd.f32 %v3162_v61, %v3161_v40  ;;  %v3218_v38 = vrot.slane %v3217_v59, 2  ;;  %v5961_v40 = vld [vmem:[#allocation17 + $0x35c] sm:$0xf] }
 0x2f2   :  { %v4518_v48 = vld [vmem:[#allocation17 + $0x18] sm:$0xf]  ;;  %v5319_v57 = vor.u32 %v6061_v56, %v5318_v19  ;;  %v5897_v19 = vld [vmem:[#allocation17 + $0x15c] sm:$0xf] }
 0x2f3   :  { %3083 = vmatpush.bf16.msrb.mxu1 %v5159_v60  ;;  %3058 = vmatpush.bf16.msra.mxu3 %v4615_v5  ;;  %v5861_v35 = vld [vmem:[#allocation17 + $0x34] sm:$0xf0]  ;;  %v3164_v17 = vrot.slane %v3163_v62, 1  ;;  %v3219_v3 = vadd.f32 %v3218_v38, %v3217_v59  ;;  %v2842_v7 = vpop.f32.mrf.mxu2  ;;  %v5889_v61 = vld [vmem:[#allocation17 + $0x11c] sm:$0xf] }
 0x2f4   :  { %v4774_v36 = vld [vmem:[#allocation17 + $0x218] sm:$0xf]  ;;  %v4519_v43 = vor.u32 %v5861_v35, %v4518_v48  ;;  %v2818_v45 = vpop.f32.mrf.mxu0  ;;  %v4648_v59 = vld [vmem:[#allocation17 + $0x138] sm:$0xf0] }
 0x2f5   :  { %3096 = vmatpush.bf16.msrb.mxu2 %v5415_v53  ;;  %3071 = vmatpush.bf16.msrb.mxu0 %v4871_v9  ;;  %v5925_v39 = vld [vmem:[#allocation17 + $0x234] sm:$0xf0]  ;;  %v5913_v53 = vld [vmem:[#allocation17 + $0x1dc] sm:$0xf]  ;;  %v3165_v8 = vadd.f32 %v3164_v17, %v3163_v62  ;;  %v3220_v27 = vrot.slane %v3219_v3, 1  ;;  %v2831_v29 = vpop.f32.mrf.mxu1 }
 0x2f6   :  { %v5030_v50 = vld [vmem:[#allocation17 + $0x418] sm:$0xf]  ;;  %v4775_v5 = vor.u32 %v5925_v39, %v4774_v36  ;;  %v6105_v9 = vld [vmem:[#allocation17 + $0x7dc] sm:$0xf] }
 0x2f7   :  { %3084 = vmatpush.bf16.msrb.mxu1 %v5127_v12  ;;  %3059 = vmatpush.bf16.msra.mxu3 %v4583_v21  ;;  %v5989_v55 = vld [vmem:[#allocation17 + $0x434] sm:$0xf0]  ;;  %v4747_v12 = vor.u32 %v5913_v53, %v4744_v63  ;;  %v5969_v21 = vld [vmem:[#allocation17 + $0x39c] sm:$0xf]  ;;  %v5515_v24 = vor.u32 %v6105_v9, %v5512_v31  ;;  %v3221_v56 = vadd.f32 %v3220_v27, %v3219_v3  ;;  %v6984_v48 = vmul.f32 0.125, %v3165_v8 }
 0x2f8   :  { %v5286_v58 = vld [vmem:[#allocation17 + $0x618] sm:$0xf]  ;;  %v5031_v10 = vor.u32 %v5989_v55, %v5030_v50  ;;  %v4971_v36 = vor.u32 %v5969_v21, %v4968_v6  ;;  %v4680_v39 = vld [vmem:[#allocation17 + $0x178] sm:$0xf0] }
 0x2f9   :  { %3097 = vmatpush.bf16.msrb.mxu2 %v5383_v14  ;;  %3072 = vmatpush.bf16.msrb.mxu0 %v4839_v22  ;;  %v6053_v60 = vld [vmem:[#allocation17 + $0x634] sm:$0xf0]  ;;  %v2803_v14 = vpop.f32.mrf.mxu3  ;;  %v5259_v22 = vor.u32 %v6041_v33, %v5256_v4  ;;  %v5192_v50 = vld [vmem:[#allocation17 + $0x578] sm:$0xf0]  ;;  %v3272_v55 = vmul.f32 0.125, %v3221_v56 }
 0x2fa   :  { %v5287_v11 = vor.u32 %v6053_v60, %v5286_v58  ;;  %v2804_v37 = vadd.f32 %v2803_v14, %v1447_v1  ;;  %v5448_v58 = vld [vmem:[#allocation17 + $0x778] sm:$0xf0]  ;;  %v4683_v60 = vor.u32 %v5897_v19, %v4680_v39 }
 0x2fb   :  { %3085 = vmatpush.bf16.msrb.mxu1 %v5095_v25  ;;  %3060 = vmatpush.bf16.msra.mxu3 %v4551_v42  ;;  %v6033_v25 = vld [vmem:[#allocation17 + $0x59c] sm:$0xf]  ;;  %v2844_v33 = vpop.f32.mrf.mxu2 }
 0x2fc   :  { %v2817_v28 = vadd.f32 %v2816_v34, %v2804_v37  ;;  %v5483_v34 = vor.u32 %v6097_v30, %v5480_v49  ;;  %v4936_v42 = vld [vmem:[#allocation17 + $0x378] sm:$0xf0]  ;;  %v1448_v30 = vperm.slane %v6974_v23, 2 }
 0x2fd   :  { %3098 = vmatpush.bf16.msrb.mxu2 %v5351_v26  ;;  %3073 = vmatpush.bf16.msrb.mxu0 %v4807_v47  ;;  %v5224_v26 = vld [vmem:[#allocation17 + $0x5b8] sm:$0xf0]  ;;  %v4939_v2 = vor.u32 %v5961_v40, %v4936_v42 }
 0x2fe   :  { %v2830_v35 = vadd.f32 %v2829_v15, %v2817_v28  ;;  %v5227_v41 = vor.u32 %v6033_v25, %v5224_v26  ;;  %v6025_v47 = vld [vmem:[#allocation17 + $0x55c] sm:$0xf] }
 0x2ff   :  { %3086 = vmatpush.bf16.msrb.mxu1 %v5063_v13  ;;  %3061 = vmatpush.bf16.msra.mxu3 %v4519_v43  ;;  %v3280_v13 = vmul.f32 %v6984_v48, %v6984_v48  ;;  %v6089_v15 = vld [vmem:[#allocation17 + $0x75c] sm:$0xf]  ;;  %v5195_v38 = vor.u32 %v6025_v47, %v5192_v50 }
 0x300   :  { %v5953_v4 = vld [vmem:[#allocation17 + $0x31c] sm:$0xf]  ;;  %v5451_v43 = vor.u32 %v6089_v15, %v5448_v58 }
 0x301   :  { %3099 = vmatpush.bf16.msrb.mxu2 %v5319_v57  ;;  %3074 = vmatpush.bf16.msrb.mxu0 %v4775_v5  ;;  %v6988_v57 = vadd.f32 %v2842_v7, %v2830_v35  ;;  %v2805_v53 = vpop.f32.mrf.mxu3  ;;  %v3288_v63 = vsub.f32 %v3272_v55, %v3280_v13  ;;  %v4904_v62 = vld [vmem:[#allocation17 + $0x338] sm:$0xf0]  ;;  %v2868_v16 = vpop.f32.mrf.mxu0  ;;  %v4651_v7 = vor.u32 %v5889_v61, %v4648_v59 }
 0x302   :  { %3062 = vmatmul.bf16.vlgmr.msra.gmra.mxu3 %v6939_v44  ;;  %v6017_v5 = vld [vmem:[#allocation17 + $0x51c] sm:$0xf]  ;;  %v4907_v20 = vor.u32 %v5953_v4, %v4904_v62 }
 0x303   :  { %3087 = vmatpush.bf16.msrb.mxu1 %v5031_v10  ;;  %3106 = vmatpush.bf16.msrb.mxu3 %v4747_v12  ;;  %v3166_v0 = vrot.slane %v6988_v57, 4  ;;  %v3209_v1 = vmul.f32 %v6988_v57, %v6988_v57  ;;  %v5160_v9 = vld [vmem:[#allocation17 + $0x538] sm:$0xf0]  ;;  %v6997_v10 = vadd.f32 0.8, %v3288_v63  ;;  %v7000_v37 = vpop.f32.mrf.mxu1 }
 0x304   :  { %3075 = vmatmul.bf16.vlgmr.msrb.gmra.mxu0 %v6941_v51  ;;  %v6081_v31 = vld [vmem:[#allocation17 + $0x71c] sm:$0xf] }
 0x305   :  { %3100 = vmatpush.bf16.msrb.mxu2 %v5287_v11  ;;  %3119 = vmatpush.bf16.msra.mxu0 %v5003_v18  ;;  %v3167_v11 = vadd.f32 %v3166_v0, %v6988_v57  ;;  %v3222_v12 = vrot.slane %v3209_v1, 4  ;;  %v5416_v14 = vld [vmem:[#allocation17 + $0x738] sm:$0xf0]  ;;  %6210 = vrsqrt.f32 %v6997_v10  ;;  %vm3310_vm15 = vweird.f32 %v6997_v10 }
 0x306   :  { %3088 = vmatmul.bf16.vlgmr.msrb.gmra.mxu1 %v6945_v54  ;;  %v5881_v17 = vld [vmem:[#allocation17 + $0xdc] sm:$0xf]  ;;  %v5419_v45 = vor.u32 %v6081_v31, %v5416_v14 }
 0x307   :  { %3132 = vmatpush.bf16.msra.mxu1 %v5259_v22  ;;  %3107 = vmatpush.bf16.msrb.mxu3 %v4715_v32  ;;  %v3168_v3 = vrot.slane %v3167_v11, 2  ;;  %v3223_v18 = vadd.f32 %v3222_v12, %v3209_v1  ;;  %v4616_v21 = vld [vmem:[#allocation17 + $0xf8] sm:$0xf0] }
 0x308   :  { %3101 = vmatmul.bf16.vlgmr.msrb.gmra.mxu2 %v6943_v52  ;;  %v5945_v22 = vld [vmem:[#allocation17 + $0x2dc] sm:$0xf]  ;;  %v4619_v56 = vor.u32 %v5881_v17, %v4616_v21 }
 0x309   :  { %3145 = vmatpush.bf16.msra.mxu2 %v5515_v24  ;;  %3120 = vmatpush.bf16.msra.mxu0 %v4971_v36  ;;  %v5163_v24 = vor.u32 %v6017_v5, %v5160_v9  ;;  %v4872_v6 = vld [vmem:[#allocation17 + $0x2f8] sm:$0xf0]  ;;  %v3169_v8 = vadd.f32 %v3168_v3, %v3167_v11  ;;  %v3224_v27 = vrot.slane %v3223_v18, 2  ;;  %v2870_v61 = vpop.f32.mrf.mxu0 }
 0x30a   :  { %v6009_v25 = vld [vmem:[#allocation17 + $0x4dc] sm:$0xf]  ;;  %v4875_v35 = vor.u32 %v5945_v22, %v4872_v6 }
 0x30b   :  { %3133 = vmatpush.bf16.msra.mxu1 %v5227_v41  ;;  %3108 = vmatpush.bf16.msrb.mxu3 %v4683_v60  ;;  %v5128_v26 = vld [vmem:[#allocation17 + $0x4f8] sm:$0xf0]  ;;  %v3170_v32 = vrot.slane %v3169_v8, 1  ;;  %v3225_v19 = vadd.f32 %v3224_v27, %v3223_v18  ;;  %v2894_v58 = vpop.f32.mrf.mxu2  ;;  %v7004_v0 = vpop.eup %6210 }
 0x30c   :  { %v6073_v28 = vld [vmem:[#allocation17 + $0x6dc] sm:$0xf]  ;;  %v5131_v40 = vor.u32 %v6009_v25, %v5128_v26  ;;  %v2883_v4 = vpop.f32.mrf.mxu1  ;;  %vm3311_vm14 = vweird.f32 %v7004_v0 }
 0x30d   :  { %3146 = vmatpush.bf16.msra.mxu2 %v5483_v34  ;;  %3121 = vmatpush.bf16.msra.mxu0 %v4939_v2  ;;  %v5384_v29 = vld [vmem:[#allocation17 + $0x6f8] sm:$0xf0]  ;;  %v2855_v34 = vpop.f32.mrf.mxu3  ;;  %v3171_v55 = vadd.f32 %v3170_v32, %v3169_v8  ;;  %v3226_v13 = vrot.slane %v3225_v19, 1  ;;  %vm3312_vm1 = vmor %vm3310_vm15, %vm3311_vm14 }
 0x30e   :  { %v5873_v49 = vld [vmem:[#allocation17 + $0x9c] sm:$0xf]  ;;  %v5387_v41 = vor.u32 %v6073_v28, %v5384_v29  ;;  %v2856_v15 = vadd.f32 %v2855_v34, %v1448_v30 }
 0x30f   :  { %3134 = vmatpush.bf16.msra.mxu1 %v5195_v38  ;;  %3109 = vmatpush.bf16.msrb.mxu3 %v4651_v7  ;;  %v4584_v36 = vld [vmem:[#allocation17 + $0xb8] sm:$0xf0]  ;;  %v3227_v1 = vadd.f32 %v3226_v13, %v3225_v19  ;;  %v7006_v2 = vmul.f32 0.125, %v3171_v55 }
 0x310   :  { %v5937_v39 = vld [vmem:[#allocation17 + $0x29c] sm:$0xf]  ;;  %v4587_v59 = vor.u32 %v5873_v49, %v4584_v36  ;;  %v2869_v33 = vadd.f32 %v2868_v16, %v2856_v15  ;;  %v3305_v16 = vmul.f32 %v7004_v0, %v6997_v10 }
 0x311   :  { %3147 = vmatpush.bf16.msra.mxu2 %v5451_v43  ;;  %3122 = vmatpush.bf16.msra.mxu0 %v4907_v20  ;;  %v4840_v42 = vld [vmem:[#allocation17 + $0x2b8] sm:$0xf0]  ;;  %v3273_v14 = vmul.f32 0.125, %v3227_v1  ;;  %v3281_v17 = vmul.f32 %v7006_v2, %v7006_v2 }
 0x312   :  { %v6001_v47 = vld [vmem:[#allocation17 + $0x49c] sm:$0xf]  ;;  %v4843_v62 = vor.u32 %v5937_v39, %v4840_v42  ;;  %v2882_v3 = vadd.f32 %v7000_v37, %v2869_v33  ;;  %v3306_v36 = vmul.f32 %v7004_v0, %v3305_v16 }
 0x313   :  { %3135 = vmatpush.bf16.msra.mxu1 %v5163_v24  ;;  %v5096_v50 = vld [vmem:[#allocation17 + $0x4b8] sm:$0xf0]  ;;  %3110 = vmatpush.bf16.msrb.mxu3 %v4619_v56  ;;  %v3289_v22 = vsub.f32 %v3273_v14, %v3281_v17  ;;  %v2896_v56 = vpop.f32.mrf.mxu2  ;;  %v1449_v14 = vperm.slane %v6974_v23, 3 }
 0x314   :  { %v6065_v60 = vld [vmem:[#allocation17 + $0x69c] sm:$0xf]  ;;  %v5099_v5 = vor.u32 %v6001_v47, %v5096_v50  ;;  %v7013_v24 = vadd.f32 %v2894_v58, %v2882_v3  ;;  %v3307_v13 = vmul.f32 0.5, %v3306_v36 }
 0x315   :  { %3148 = vmatpush.bf16.msra.mxu2 %v5419_v45  ;;  %v5352_v53 = vld [vmem:[#allocation17 + $0x6b8] sm:$0xf0]  ;;  %3123 = vmatpush.bf16.msra.mxu0 %v4875_v35  ;;  %v2857_v27 = vpop.f32.mrf.mxu3  ;;  %v3297_v49 = vadd.f32 0.8, %v3289_v22 }
 0x316   :  { %v5865_v63 = vld [vmem:[#allocation17 + $0x5c] sm:$0xf]  ;;  %v5355_v9 = vor.u32 %v6065_v60, %v5352_v53  ;;  %v3172_v32 = vrot.slane %v7013_v24, 4  ;;  %v3210_v19 = vmul.f32 %v7013_v24, %v7013_v24 }
 0x317   :  { %v4552_v38 = vld [vmem:[#allocation17 + $0x78] sm:$0xf0]  ;;  %3136 = vmatpush.bf16.msra.mxu1 %v5131_v40  ;;  %3111 = vmatpush.bf16.msrb.mxu3 %v4587_v59  ;;  %6212 = vrsqrt.f32 %v3297_v49  ;;  %v3308_v59 = vsub.f32 1.5, %v3307_v13  ;;  %vm3320_vm2 = vweird.f32 %v3297_v49 }
 0x318   :  { %v5929_v43 = vld [vmem:[#allocation17 + $0x25c] sm:$0xf]  ;;  %v4555_v20 = vor.u32 %v5865_v63, %v4552_v38  ;;  %v3173_v40 = vadd.f32 %v3172_v32, %v7013_v24 }
 0x319   :  { %3149 = vmatpush.bf16.msra.mxu2 %v5387_v41  ;;  %v4808_v31 = vld [vmem:[#allocation17 + $0x278] sm:$0xf0]  ;;  %3124 = vmatpush.bf16.msra.mxu0 %v4843_v62  ;;  %v3228_v41 = vrot.slane %v3210_v19, 4  ;;  %v7024_v62 = vld [vmem:[#allocation19] sm:$0xff]  ;;  %v3309_v38 = vmul.f32 %v7004_v0, %v3308_v59 }
 0x31a   :  { %v5993_v11 = vld [vmem:[#allocation17 + $0x45c] sm:$0xf]  ;;  %v4811_v45 = vor.u32 %v5929_v43, %v4808_v31  ;;  %v3174_v50 = vrot.slane %v3173_v40, 2 }
 0x31b   :  { %v5064_v12 = vld [vmem:[#allocation17 + $0x478] sm:$0xf0]  ;;  %3137 = vmatpush.bf16.msra.mxu1 %v5099_v5  ;;  %3112 = vmatpush.bf16.msrb.mxu3 %v4555_v20  ;;  %v3229_v55 = vadd.f32 %v3228_v41, %v3210_v19 }
 0x31c   :  { %v6057_v18 = vld [vmem:[#allocation17 + $0x65c] sm:$0xf]  ;;  %v5067_v8 = vor.u32 %v5993_v11, %v5064_v12  ;;  %v3175_v15 = vadd.f32 %v3174_v50, %v3173_v40  ;;  %v3313_v11 = vsel %vm3312_vm1, %v7004_v0, %v3309_v38 }
 0x31d   :  { %v5320_v7 = vld [vmem:[#allocation17 + $0x678] sm:$0xf0]  ;;  %3150 = vmatpush.bf16.msra.mxu2 %v5355_v9  ;;  %3125 = vmatpush.bf16.msra.mxu0 %v4811_v45  ;;  %v3230_v58 = vrot.slane %v3229_v55, 2  ;;  %v6213_v60 = vpop.eup %6212 }
 0x31e   :  { %v5857_v21 = vld [vmem:[#allocation17 + $0x1c] sm:$0xf]  ;;  %v5323_v37 = vor.u32 %v6057_v18, %v5320_v7  ;;  %v3176_v53 = vrot.slane %v3175_v15, 1  ;;  %v3315_v63 = vmul.f32 %v6213_v60, %v3297_v49  ;;  %vm3321_vm0 = vweird.f32 %v6213_v60 }
 0x31f   :  { %v4520_v6 = vld [vmem:[#allocation17 + $0x38] sm:$0xf0]  ;;  %3138 = vmatpush.bf16.msra.mxu1 %v5067_v8  ;;  %v3231_v61 = vadd.f32 %v3230_v58, %v3229_v55  ;;  %vm3322_vm3 = vmor %vm3320_vm2, %vm3321_vm0  ;;  %vm3435_vm0 = vcmask 1044484  }
 0x320   :  { %v5921_v25 = vld [vmem:[#allocation17 + $0x21c] sm:$0xf]  ;;  %v4523_v39 = vor.u32 %v5857_v21, %v4520_v6  ;;  %v3316_v1 = vmul.f32 %v6213_v60, %v3315_v63  ;;  %v3177_v33 = vadd.f32 %v3176_v53, %v3175_v15 }
 0x321   :  { %v4776_v26 = vld [vmem:[#allocation17 + $0x238] sm:$0xf0]  ;;  %3151 = vmatpush.bf16.msra.mxu2 %v5323_v37  ;;  %v3232_v4 = vrot.slane %v3231_v61, 1 }
 0x322   :  { %v5985_v28 = vld [vmem:[#allocation17 + $0x41c] sm:$0xf]  ;;  %v4779_v34 = vor.u32 %v5921_v25, %v4776_v26  ;;  %3113 = vmatpush.bf16.msrb.mxu3 %v4523_v39  ;;  %v3317_v43 = vmul.f32 0.5, %v3316_v1  ;;  %v7031_v9 = vmul.f32 0.125, %v3177_v33  ;;  %v1450_v1 = vperm.slane %v6974_v23, 4 }
 0x323   :  { %v5032_v29 = vld [vmem:[#allocation17 + $0x438] sm:$0xf0]  ;;  %v2933_v31 = vpop.f32.mrf.mxu1 }
 0x324   :  { %v6049_v30 = vld [vmem:[#allocation17 + $0x61c] sm:$0xf]  ;;  %v5035_v42 = vor.u32 %v5985_v28, %v5032_v29  ;;  %3126 = vmatpush.bf16.msra.mxu0 %v4779_v34  ;;  %v3318_v5 = vsub.f32 1.5, %v3317_v43  ;;  %v3282_v7 = vmul.f32 %v7031_v9, %v7031_v9 }
 0x325   :  { %v5288_v35 = vld [vmem:[#allocation17 + $0x638] sm:$0xf0]  ;;  %3114 = vmatmul.bf16.vlgmr.msrb.gmra.mxu3 %v6939_v44  ;;  %v2920_v44 = vpop.f32.mrf.mxu0  ;;  %v2907_v16 = vpop.f32.mrf.mxu3 }
 0x326   :  { %v5291_v47 = vor.u32 %v6049_v30, %v5288_v35  ;;  %3139 = vmatpush.bf16.msra.mxu1 %v5035_v42  ;;  %v3319_v12 = vmul.f32 %v6213_v60, %v3318_v5  ;;  %v2908_v21 = vadd.f32 %v2907_v16, %v1449_v14 }
 0x327   :  { %3127 = vmatmul.bf16.vlgmr.msra.gmra.mxu0 %v6941_v51  ;;  %v3385_v51 = vperm.slane %v7024_v62, 0 }
 0x328   :  { %3152 = vmatpush.bf16.msra.mxu2 %v5291_v47  ;;  %v3323_v10 = vsel %vm3322_vm3, %v6213_v60, %v3319_v12  ;;  %v2921_v26 = vadd.f32 %v2920_v44, %v2908_v21 }
 0x329   :  { %3140 = vmatmul.bf16.vlgmr.msra.gmra.mxu1 %v6945_v54  ;;  %v3233_v54 = vadd.f32 %v3232_v4, %v3231_v61  ;;  %v7035_v17 = vmul.f32 %v3385_v51, %v3313_v11 }
 0x32a   :  { %v2934_v27 = vadd.f32 %v2933_v31, %v2921_v26 }
 0x32b   :  { %3153 = vmatmul.bf16.vlgmr.msra.gmra.mxu2 %v6943_v52  ;;  %v3386_v52 = vperm.slane %v7024_v62, 1  ;;  %v3274_v18 = vmul.f32 0.125, %v3233_v54  ;;  %v2946_v0 = vpop.f32.mrf.mxu2  ;;  %v3409_v45 = vmul.f32 %v7035_v17, %v6984_v48  ;;  %v2935_v8 = vpop.f32.mrf.mxu1 }
 0x32c   :  { %v7048_v29 = vadd.f32 %v2946_v0, %v2934_v27  ;;  %v3388_v8 = vperm.slane %v7024_v62, 3 }
 0x32d   :  { %v7037_v3 = vmul.f32 %v3386_v52, %v3323_v10  ;;  %v2922_v22 = vpop.f32.mrf.mxu0  ;;  %v3290_v25 = vsub.f32 %v3274_v18, %v3282_v7  ;;  %v2909_v30 = vpop.f32.mrf.mxu3  ;;  %v3387_v7 = vperm.slane %v7024_v62, 2 }
 0x32e   :  { %v3211_v49 = vmul.f32 %v7048_v29, %v7048_v29 }
 0x32f   :  { %v3410_v20 = vmul.f32 %v7037_v3, %v7006_v2  ;;  %v3298_v28 = vadd.f32 0.8, %v3290_v25  ;;  %v3178_v2 = vrot.slane %v7048_v29, 4 }
 0x330   :  { %v3234_v19 = vrot.slane %v3211_v49, 4 }
 0x331   :  { %v3425_v6 = vrot.slane %v3410_v20, 7  ;;  %6214 = vrsqrt.f32 %v3298_v28  ;;  %v3179_v48 = vadd.f32 %v3178_v2, %v7048_v29  ;;  %vm3330_vm4 = vweird.f32 %v3298_v28 }
 0x332   :  { %v3235_v35 = vadd.f32 %v3234_v19, %v3211_v49 }
 0x333   :  { %v7046_v37 = vsel %vm485_vm8, %v3409_v45, %v3425_v6  ;;  %v2948_v32 = vpop.f32.mrf.mxu2  ;;  %v3180_v56 = vrot.slane %v3179_v48, 2 }
 0x334   :  { %v3236_v39 = vrot.slane %v3235_v35, 2 }
 0x335   :  { %v3181_v36 = vadd.f32 %v3180_v56, %v3179_v48 }
 0x336   :  { %v3237_v34 = vadd.f32 %v3236_v39, %v3235_v35 }
 0x337   :  { %v6215_v40 = vpop.eup %6214  ;;  %v3182_v41 = vrot.slane %v3181_v36, 1 }
 0x338   :  { %v3238_v47 = vrot.slane %v3237_v34, 1  ;;  %v3325_v50 = vmul.f32 %v6215_v40, %v3298_v28  ;;  %vm3331_vm8 = vweird.f32 %v6215_v40 }
 0x339   :  { %v3183_v42 = vadd.f32 %v3182_v41, %v3181_v36  ;;  %vm3332_vm5 = vmor %vm3330_vm4, %vm3331_vm8 }
 0x33a   :  { %v3239_v55 = vadd.f32 %v3238_v47, %v3237_v34  ;;  %v3326_v60 = vmul.f32 %v6215_v40, %v3325_v50 }
 0x33b   :  { %v3267_v13 = vmul.f32 0.125, %v3183_v42 }
 0x33c   :  { %v3275_v15 = vmul.f32 0.125, %v3239_v55  ;;  %v3327_v33 = vmul.f32 0.5, %v3326_v60 }
 0x33d   :  { %v3283_v58 = vmul.f32 %v3267_v13, %v3267_v13 }
 0x33e   :  { %v3328_v5 = vsub.f32 1.5, %v3327_v33 }
 0x33f   :  { %v3291_v61 = vsub.f32 %v3275_v15, %v3283_v58  ;;  %v1451_v58 = vperm.slane %v6974_v23, 5 }
 0x340   :  { %v3329_v11 = vmul.f32 %v6215_v40, %v3328_v5 }
 0x341   :  { %v2972_v53 = vpop.f32.mrf.mxu0  ;;  %v3299_v63 = vadd.f32 0.8, %v3291_v61 }
 0x342   :  { %v3333_v0 = vsel %vm3332_vm5, %v6215_v40, %v3329_v11 }
 0x343   :  { %v2985_v59 = vpop.f32.mrf.mxu1  ;;  %6216 = vrsqrt.f32 %v3299_v63  ;;  %v7062_v26 = vmul.f32 %v3387_v7, %v3333_v0  ;;  %vm3340_vm10 = vweird.f32 %v3299_v63 }
 0x345   :  { %v2959_v4 = vpop.f32.mrf.mxu3  ;;  %v3411_v48 = vmul.f32 %v7062_v26, %v7031_v9 }
 0x346   :  { %v2960_v38 = vadd.f32 %v2959_v4, %v1450_v1 }
 0x347   :  { %v3426_v39 = vrot.slane %v3411_v48, 6 }
 0x348   :  { %v2973_v51 = vadd.f32 %v2972_v53, %v2960_v38 }
 0x349   :  { %v2974_v44 = vpop.f32.mrf.mxu0  ;;  %v6217_v54 = vpop.eup %6216 }
 0x34a   :  { %v2986_v31 = vadd.f32 %v2985_v59, %v2973_v51  ;;  %v3335_v12 = vmul.f32 %v6217_v54, %v3299_v63  ;;  %vm3341_vm6 = vweird.f32 %v6217_v54 }
 0x34b   :  { %v2998_v43 = vpop.f32.mrf.mxu2  ;;  %v2987_v52 = vpop.f32.mrf.mxu1  ;;  %vm3342_vm11 = vmor %vm3340_vm10, %vm3341_vm6  ;;  %vm3437_vm6 = vcmask 1046534   ;;  %vm3439_vm10 = vcmask 1045508  }
 0x34c   :  { %v7055_v14 = vadd.f32 %v2998_v43, %v2986_v31  ;;  %v3336_v10 = vmul.f32 %v6217_v54, %v3335_v12 }
 0x34d   :  { %v2961_v18 = vpop.f32.mrf.mxu3 }
 0x34e   :  { %v3184_v16 = vrot.slane %v7055_v14, 4  ;;  %v3212_v20 = vmul.f32 %v7055_v14, %v7055_v14  ;;  %v3337_v22 = vmul.f32 0.5, %v3336_v10 }
 0x350   :  { %v3185_v45 = vadd.f32 %v3184_v16, %v7055_v14  ;;  %v3240_v6 = vrot.slane %v3212_v20, 4  ;;  %v3338_v25 = vsub.f32 1.5, %v3337_v22 }
 0x352   :  { %v3186_v27 = vrot.slane %v3185_v45, 2  ;;  %v3241_v28 = vadd.f32 %v3240_v6, %v3212_v20  ;;  %v3339_v30 = vmul.f32 %v6217_v54, %v3338_v25 }
 0x353   :  { %v3000_v21 = vpop.f32.mrf.mxu2 }
 0x354   :  { %v3187_v2 = vadd.f32 %v3186_v27, %v3185_v45  ;;  %v3242_v49 = vrot.slane %v3241_v28, 2  ;;  %v3343_v32 = vsel %vm3342_vm11, %v6217_v54, %v3339_v30  ;;  %vm3441_vm11 = vcmask 1043456  }
 0x355   :  { %v7067_v19 = vmul.f32 %v3388_v8, %v3343_v32  ;;  %v1452_v32 = vperm.slane %v6974_v23, 6  ;;  %v3389_v23 = vperm.slane %v7024_v62, 4 }
 0x356   :  { %v3188_v56 = vrot.slane %v3187_v2, 1  ;;  %v3243_v35 = vadd.f32 %v3242_v49, %v3241_v28 }
 0x357   :  { %v3412_v36 = vmul.f32 %v7067_v19, %v3267_v13 }
 0x358   :  { %v3189_v41 = vadd.f32 %v3188_v56, %v3187_v2  ;;  %v3244_v34 = vrot.slane %v3243_v35, 1 }
 0x359   :  { %v3427_v40 = vrot.slane %v3412_v36, 5 }
 0x35a   :  { %v3245_v55 = vadd.f32 %v3244_v34, %v3243_v35  ;;  %v7075_v15 = vmul.f32 0.125, %v3189_v41 }
 0x35b   :  { %v3433_v42 = vsel %vm1145_vm7, %v3426_v39, %v3427_v40 }
 0x35c   :  { %v7073_v47 = vsel %vm1147_vm9, %v7046_v37, %v3433_v42  ;;  %v3276_v60 = vmul.f32 0.125, %v3245_v55  ;;  %v3284_v13 = vmul.f32 %v7075_v15, %v7075_v15 }
 0x35e   :  { %v3292_v1 = vsub.f32 %v3276_v60, %v3284_v13 }
 0x360   :  { %v3300_v38 = vadd.f32 0.8, %v3292_v1 }
 0x361   :  { %v3024_v50 = vpop.f32.mrf.mxu0 }
 0x362   :  { %6218 = vrsqrt.f32 %v3300_v38  ;;  %vm3350_vm9 = vweird.f32 %v3300_v38 }
 0x363   :  { %v3037_v9 = vpop.f32.mrf.mxu1 }
 0x365   :  { %v3011_v53 = vpop.f32.mrf.mxu3 }
 0x366   :  { %v3012_v61 = vadd.f32 %v3011_v53, %v1451_v58 }
 0x368   :  { %v3025_v33 = vadd.f32 %v3024_v50, %v3012_v61  ;;  %v6219_v7 = vpop.eup %6218 }
 0x369   :  { %v3026_v63 = vpop.f32.mrf.mxu0  ;;  %v3345_v22 = vmul.f32 %v6219_v7, %v3300_v38  ;;  %vm3351_vm7 = vweird.f32 %v6219_v7  ;;  %v3390_v38 = vperm.slane %v7024_v62, 5 }
 0x36a   :  { %v3038_v37 = vadd.f32 %v3037_v9, %v3025_v33  ;;  %vm3352_vm12 = vmor %vm3350_vm9, %vm3351_vm7 }
 0x36b   :  { %v3050_v59 = vpop.f32.mrf.mxu2  ;;  %v3039_v4 = vpop.f32.mrf.mxu1  ;;  %v3346_v27 = vmul.f32 %v6219_v7, %v3345_v22 }
 0x36c   :  { %v7080_v43 = vadd.f32 %v3050_v59, %v3038_v37 }
 0x36d   :  { %v3013_v5 = vpop.f32.mrf.mxu3  ;;  %v3347_v48 = vmul.f32 0.5, %v3346_v27 }
 0x36e   :  { %v3190_v44 = vrot.slane %v7080_v43, 4  ;;  %v3213_v51 = vmul.f32 %v7080_v43, %v7080_v43 }
 0x36f   :  { %v3348_v39 = vsub.f32 1.5, %v3347_v48 }
 0x370   :  { %v3191_v54 = vadd.f32 %v3190_v44, %v7080_v43  ;;  %v3246_v31 = vrot.slane %v3213_v51, 4 }
 0x371   :  { %v3349_v55 = vmul.f32 %v6219_v7, %v3348_v39  ;;  %v6115_v39 = vld [vmem:[#allocation22 + $0x28] sm:$0xff] }
 0x372   :  { %v3192_v11 = vrot.slane %v3191_v54, 2  ;;  %v3247_v12 = vadd.f32 %v3246_v31, %v3213_v51 }
 0x373   :  { %v3052_v52 = vpop.f32.mrf.mxu2  ;;  %v3353_v63 = vsel %vm3352_vm12, %v6219_v7, %v3349_v55 }
 0x374   :  { %v3193_v10 = vadd.f32 %v3192_v11, %v3191_v54  ;;  %v3248_v18 = vrot.slane %v3247_v12, 2  ;;  %v7094_v5 = vmul.f32 %v3389_v23, %v3353_v63  ;;  %v6114_v23 = vld [vmem:[#allocation22 + $0x20] sm:$0xff] }
 0x376   :  { %v3194_v16 = vrot.slane %v3193_v10, 1  ;;  %v3249_v20 = vadd.f32 %v3248_v18, %v3247_v12  ;;  %v3413_v12 = vmul.f32 %v7094_v5, %v7075_v15 }
 0x378   :  { %v3195_v21 = vadd.f32 %v3194_v16, %v3193_v10  ;;  %v3250_v0 = vrot.slane %v3249_v20, 1 }
 0x37a   :  { %v3251_v45 = vadd.f32 %v3250_v0, %v3249_v20  ;;  %v3269_v6 = vmul.f32 0.125, %v3195_v21  ;;  %v6117_v20 = vld [vmem:[#allocation22 + $0x38] sm:$0xff] }
 0x37b   :  { %v6125_v21 = vld [vmem:[#allocation22 + $0x78] sm:$0xff]  ;;  %4034 = vmatpush.bf16.msra.mxu3 %v6117_v20  ;;  %v6128_v20 = vld [vmem:[#allocation22 + $0x90] sm:$0xff] }
 0x37c   :  { %v3277_v25 = vmul.f32 0.125, %v3251_v45  ;;  %v3285_v8 = vmul.f32 %v3269_v6, %v3269_v6  ;;  %v6133_v45 = vld [vmem:[#allocation22 + $0xb8] sm:$0xff]  ;;  %4047 = vmatpush.bf16.msrb.mxu0 %v6125_v21 }
 0x37d   :  { %4060 = vmatpush.bf16.msrb.mxu1 %v6133_v45 }
 0x37e   :  { %v3293_v30 = vsub.f32 %v3277_v25, %v3285_v8  ;;  %v6141_v25 = vld [vmem:[#allocation22 + $0xf8] sm:$0xff]  ;;  %v3428_v8 = vrot.slane %v3413_v12, 4 }
 0x37f   :  { %4073 = vmatpush.bf16.msrb.mxu2 %v6141_v25 }
 0x380   :  { %v3301_v49 = vadd.f32 0.8, %v3293_v30  ;;  %v6116_v30 = vld [vmem:[#allocation22 + $0x30] sm:$0xff] }
 0x381   :  { %v3076_v28 = vpop.f32.mrf.mxu0  ;;  %4035 = vmatpush.bf16.msra.mxu3 %v6116_v30 }
 0x382   :  { %6220 = vrsqrt.f32 %v3301_v49  ;;  %vm3360_vm14 = vweird.f32 %v3301_v49 }
 0x383   :  { %v3089_v2 = vpop.f32.mrf.mxu1 }
 0x385   :  { %v3063_v56 = vpop.f32.mrf.mxu3  ;;  %4036 = vmatpush.bf16.msra.mxu3 %v6115_v39  ;;  %v6126_v39 = vld [vmem:[#allocation22 + $0x80] sm:$0xff] }
 0x386   :  { %v3064_v35 = vadd.f32 %v3063_v56, %v1452_v32  ;;  %v6140_v56 = vld [vmem:[#allocation22 + $0xf0] sm:$0xff] }
 0x387   :  { %4074 = vmatpush.bf16.msrb.mxu2 %v6140_v56 }
 0x388   :  { %v3077_v41 = vadd.f32 %v3076_v28, %v3064_v35  ;;  %v6221_v42 = vpop.eup %6220  ;;  %v6228_v35 = vld [vmem:[%s7172_s12] sm:$0xff] }
 0x389   :  { %v3078_v40 = vpop.f32.mrf.mxu0  ;;  %v3355_v9 = vmul.f32 %v6221_v42, %v3301_v49  ;;  %vm3361_vm13 = vweird.f32 %v6221_v42  ;;  %v6132_v49 = vld [vmem:[#allocation22 + $0xb0] sm:$0xff]  ;;  %4037 = vmatpush.bf16.msra.mxu3 %v6114_v23 }
 0x38a   :  { %v3090_v50 = vadd.f32 %v3089_v2, %v3077_v41  ;;  %vm3362_vm15 = vmor %vm3360_vm14, %vm3361_vm13  ;;  %v6124_v2 = vld [vmem:[#allocation22 + $0x70] sm:$0xff]  ;;  %4061 = vmatpush.bf16.msrb.mxu1 %v6132_v49  ;;  %v6123_v40 = vld [vmem:[#allocation22 + $0x68] sm:$0xff] }
 0x38b   :  { %v3102_v36 = vpop.f32.mrf.mxu2  ;;  %v3091_v34 = vpop.f32.mrf.mxu1  ;;  %v3356_v60 = vmul.f32 %v6221_v42, %v3355_v9  ;;  %4048 = vmatpush.bf16.msrb.mxu0 %v6124_v2  ;;  %v6131_v41 = vld [vmem:[#allocation22 + $0xa8] sm:$0xff] }
 0x38c   :  { %v7087_v58 = vadd.f32 %v3102_v36, %v3090_v50  ;;  %v1453_v36 = vperm.slane %v6228_v35, 7  ;;  %v6139_v50 = vld [vmem:[#allocation22 + $0xe8] sm:$0xff]  ;;  %v6110_v35 = vld [vmem:[#allocation22] sm:$0xff] }
 0x38d   :  { %v3065_v13 = vpop.f32.mrf.mxu3  ;;  %v3357_v1 = vmul.f32 0.5, %v3356_v60  ;;  %4075 = vmatpush.bf16.msrb.mxu2 %v6139_v50  ;;  %v6135_v49 = vld [vmem:[#allocation22 + $0xc8] sm:$0xff]  ;;  %v6157_v50 = vld [vmem:[#allocation22 + $0x178] sm:$0xff] }
 0x38e   :  { %v3196_v53 = vrot.slane %v7087_v58, 4  ;;  %v3214_v61 = vmul.f32 %v7087_v58, %v7087_v58  ;;  %4062 = vmatpush.bf16.msrb.mxu1 %v6131_v41 }
 0x38f   :  { %v3358_v37 = vsub.f32 1.5, %v3357_v1  ;;  %4049 = vmatpush.bf16.msrb.mxu0 %v6123_v40 }
 0x390   :  { %v3197_v33 = vadd.f32 %v3196_v53, %v7087_v58  ;;  %v3252_v4 = vrot.slane %v3214_v61, 4  ;;  %v6122_v53 = vld [vmem:[#allocation22 + $0x60] sm:$0xff] }
 0x391   :  { %v3359_v52 = vmul.f32 %v6221_v42, %v3358_v37  ;;  %v6113_v37 = vld [vmem:[#allocation22 + $0x18] sm:$0xff] }
 0x392   :  { %v3198_v44 = vrot.slane %v3197_v33, 2  ;;  %v3253_v51 = vadd.f32 %v3252_v4, %v3214_v61  ;;  %v6130_v61 = vld [vmem:[#allocation22 + $0xa0] sm:$0xff]  ;;  %4038 = vmatpush.bf16.msra.mxu3 %v6113_v37 }
 0x393   :  { %v3104_v59 = vpop.f32.mrf.mxu2  ;;  %v3363_v11 = vsel %vm3362_vm15, %v6221_v42, %v3359_v52  ;;  %4050 = vmatpush.bf16.msrb.mxu0 %v6122_v53  ;;  %4063 = vmatpush.bf16.msrb.mxu1 %v6130_v61 }
 0x394   :  { %v3199_v54 = vadd.f32 %v3198_v44, %v3197_v33  ;;  %v3254_v31 = vrot.slane %v3253_v51, 2  ;;  %v7099_v10 = vmul.f32 %v3390_v38, %v3363_v11  ;;  %v6138_v33 = vld [vmem:[#allocation22 + $0xe0] sm:$0xff]  ;;  %v6121_v38 = vld [vmem:[#allocation22 + $0x58] sm:$0xff] }
 0x395   :  { %4076 = vmatpush.bf16.msrb.mxu2 %v6138_v33  ;;  %v6129_v44 = vld [vmem:[#allocation22 + $0x98] sm:$0xff] }
 0x396   :  { %v3200_v18 = vrot.slane %v3199_v54, 1  ;;  %v3255_v7 = vadd.f32 %v3254_v31, %v3253_v51  ;;  %v3414_v16 = vmul.f32 %v7099_v10, %v3269_v6 }
 0x397   :  { %4051 = vmatpush.bf16.msrb.mxu0 %v6121_v38  ;;  %4064 = vmatpush.bf16.msrb.mxu1 %v6129_v44  ;;  %v6147_v44 = vld [vmem:[#allocation22 + $0x128] sm:$0xff] }
 0x398   :  { %v3201_v0 = vadd.f32 %v3200_v18, %v3199_v54  ;;  %v3256_v22 = vrot.slane %v3255_v7, 1  ;;  %v3429_v27 = vrot.slane %v3414_v16, 3  ;;  %v6137_v54 = vld [vmem:[#allocation22 + $0xd8] sm:$0xff]  ;;  %v6120_v16 = vld [vmem:[#allocation22 + $0x50] sm:$0xff] }
 0x399   :  { %4077 = vmatpush.bf16.msrb.mxu2 %v6137_v54  ;;  %v6155_v54 = vld [vmem:[#allocation22 + $0x168] sm:$0xff] }
 0x39a   :  { %v7102_v15 = vsel %vm3435_vm0, %v3428_v8, %v3429_v27  ;;  %v3257_v6 = vadd.f32 %v3256_v22, %v3255_v7  ;;  %v7104_v32 = vmul.f32 0.125, %v3201_v0  ;;  %v6112_v7 = vld [vmem:[#allocation22 + $0x10] sm:$0xff]  ;;  %v6111_v8 = vld [vmem:[#allocation22 + $0x8] sm:$0xff] }
 0x39b   :  { %v6136_v22 = vld [vmem:[#allocation22 + $0xd0] sm:$0xff]  ;;  %4039 = vmatpush.bf16.msra.mxu3 %v6112_v7  ;;  %4052 = vmatpush.bf16.msrb.mxu0 %v6120_v16  ;;  %v6119_v27 = vld [vmem:[#allocation22 + $0x48] sm:$0xff]  ;;  %v6154_v7 = vld [vmem:[#allocation22 + $0x160] sm:$0xff] }
 0x39c   :  { %v3278_v34 = vmul.f32 0.125, %v3257_v6  ;;  %v3286_v42 = vmul.f32 %v7104_v32, %v7104_v32  ;;  %4065 = vmatpush.bf16.msrb.mxu1 %v6128_v20  ;;  %v6162_v16 = vld [vmem:[#allocation22 + $0x1a0] sm:$0xff] }
 0x39d   :  { %4078 = vmatpush.bf16.msrb.mxu2 %v6136_v22  ;;  %v6170_v20 = vld [vmem:[#allocation22 + $0x1e0] sm:$0xff] }
 0x39e   :  { %v3294_v59 = vsub.f32 %v3278_v34, %v3286_v42  ;;  %v6134_v34 = vld [vmem:[#allocation22 + $0xc0] sm:$0xff]  ;;  %v6149_v42 = vld [vmem:[#allocation22 + $0x138] sm:$0xff] }
 0x39f   :  { %4040 = vmatpush.bf16.msra.mxu3 %v6111_v8  ;;  %4053 = vmatpush.bf16.msrb.mxu0 %v6119_v27  ;;  %v6153_v8 = vld [vmem:[#allocation22 + $0x158] sm:$0xff] }
 0x3a0   :  { %v7111_v51 = vadd.f32 0.8, %v3294_v59  ;;  %v6148_v59 = vld [vmem:[#allocation22 + $0x130] sm:$0xff]  ;;  %v6161_v27 = vld [vmem:[#allocation22 + $0x198] sm:$0xff] }
 0x3a1   :  { %4079 = vmatpush.bf16.msrb.mxu2 %v6135_v49  ;;  %v6152_v49 = vld [vmem:[#allocation22 + $0x150] sm:$0xff] }
 0x3a2   :  { %6222 = vrsqrt.f32 %v7111_v51  ;;  %vm3370_vm2 = vweird.f32 %v7111_v51 }
 0x3a3   :  { %4041 = vmatpush.bf16.msra.mxu3 %v6110_v35  ;;  %v6168_v35 = vld [vmem:[#allocation22 + $0x1d0] sm:$0xff] }
 0x3a4   :  { %v3128_v28 = vpop.f32.mrf.mxu0 }
 0x3a5   :  { %4080 = vmatpush.bf16.msrb.mxu2 %v6134_v34 }
 0x3a6   :  { %v3141_v48 = vpop.f32.mrf.mxu1 }
 0x3a7   :  { %4086 = vmatpush.bf16.msrb.mxu3 %v6149_v42  ;;  %v3392_v42 = vperm.slane %v7024_v62, 7 }
 0x3a8   :  { %v3115_v55 = vpop.f32.mrf.mxu3  ;;  %v7120_v6 = vpop.eup %6222 }
 0x3a9   :  { %v3116_v9 = vadd.f32 %v3115_v55, %v1453_v36  ;;  %v6118_v36 = vld [vmem:[#allocation22 + $0x40] sm:$0xff]  ;;  %v3365_v55 = vmul.f32 %v7120_v6, %v7111_v51  ;;  %vm3371_vm1 = vweird.f32 %v7120_v6  ;;  %v6143_v51 = vld [vmem:[#allocation22 + $0x108] sm:$0xff] }
 0x3aa   :  { %4054 = vmatpush.bf16.msrb.mxu0 %v6118_v36  ;;  %vm3372_vm3 = vmor %vm3370_vm2, %vm3371_vm1 }
 0x3ab   :  { %v3129_v63 = vadd.f32 %v3128_v28, %v3116_v9  ;;  %v6127_v28 = vld [vmem:[#allocation22 + $0x88] sm:$0xff]  ;;  %v6165_v9 = vld [vmem:[#allocation22 + $0x1b8] sm:$0xff]  ;;  %v3366_v33 = vmul.f32 %v7120_v6, %v3365_v55  ;;  %4087 = vmatpush.bf16.msrb.mxu3 %v6148_v59  ;;  %v6158_v59 = vld [vmem:[#allocation22 + $0x180] sm:$0xff] }
 0x3ac   :  { %v3130_v13 = vpop.f32.mrf.mxu0  ;;  %4066 = vmatpush.bf16.msrb.mxu1 %v6127_v28  ;;  %v6169_v28 = vld [vmem:[#allocation22 + $0x1d8] sm:$0xff]  ;;  %v6167_v55 = vld [vmem:[#allocation22 + $0x1c8] sm:$0xff] }
 0x3ad   :  { %v3142_v4 = vadd.f32 %v3141_v48, %v3129_v63  ;;  %v6156_v63 = vld [vmem:[#allocation22 + $0x170] sm:$0xff] }
 0x3ae   :  { %v3154_v60 = vpop.f32.mrf.mxu2  ;;  %v3143_v1 = vpop.f32.mrf.mxu1  ;;  %4099 = vmatpush.bf16.msra.mxu0 %v6157_v50  ;;  %v6159_v50 = vld [vmem:[#allocation22 + $0x188] sm:$0xff] }
 0x3af   :  { %v7113_v52 = vadd.f32 %v3154_v60, %v3142_v4  ;;  %v6173_v60 = vld [vmem:[#allocation22 + $0x1f8] sm:$0xff]  ;;  %v6164_v1 = vld [vmem:[#allocation22 + $0x1b0] sm:$0xff]  ;;  %4088 = vmatpush.bf16.msrb.mxu3 %v6147_v44  ;;  %v3449_v44 = vperm.slane %v7094_v5, 0 }
 0x3b0   :  { %v3117_v31 = vpop.f32.mrf.mxu3  ;;  %4067 = vmatpush.bf16.msrb.mxu1 %v6126_v39  ;;  %4125 = vmatpush.bf16.msra.mxu2 %v6173_v60  ;;  %v6172_v4 = vld [vmem:[#allocation22 + $0x1f0] sm:$0xff] }
 0x3b1   :  { %v3202_v11 = vrot.slane %v7113_v52, 4  ;;  %v3215_v12 = vmul.f32 %v7113_v52, %v7113_v52  ;;  %v6163_v31 = vld [vmem:[#allocation22 + $0x1a8] sm:$0xff] }
 0x3b2   :  { %4100 = vmatpush.bf16.msra.mxu0 %v6156_v63  ;;  %v6166_v63 = vld [vmem:[#allocation22 + $0x1c0] sm:$0xff] }
 0x3b3   :  { %v3203_v21 = vadd.f32 %v3202_v11, %v7113_v52  ;;  %v3258_v0 = vrot.slane %v3215_v12, 4  ;;  %v3367_v11 = vmul.f32 0.5, %v3366_v33  ;;  %v3446_v33 = vperm.slane %v7037_v3, 0 }
 0x3b4   :  { %4112 = vmatpush.bf16.msra.mxu1 %v6165_v9  ;;  %4126 = vmatpush.bf16.msra.mxu2 %v6172_v4 }
 0x3b5   :  { %v3204_v45 = vrot.slane %v3203_v21, 2  ;;  %v3259_v25 = vadd.f32 %v3258_v0, %v3215_v12  ;;  %v6171_v12 = vld [vmem:[#allocation22 + $0x1e8] sm:$0xff] }
 0x3b6   :  { %v3156_v18 = vpop.f32.mrf.mxu2  ;;  %4101 = vmatpush.bf16.msra.mxu0 %v6155_v54  ;;  %v3159_v54 = vld [vmem:[#allocation20] sm:$0xff] }
 0x3b7   :  { %v3205_v30 = vadd.f32 %v3204_v45, %v3203_v21  ;;  %v3260_v2 = vrot.slane %v3259_v25, 2  ;;  %v6146_v18 = vld [vmem:[#allocation22 + $0x120] sm:$0xff]  ;;  %v3368_v21 = vsub.f32 1.5, %v3367_v11 }
 0x3b8   :  { %4113 = vmatpush.bf16.msra.mxu1 %v6164_v1  ;;  %4127 = vmatpush.bf16.msra.mxu2 %v6171_v12  ;;  %v3445_v1 = vperm.slane %v7035_v17, 0 }
 0x3b9   :  { %v3206_v48 = vrot.slane %v3205_v30, 1  ;;  %v3261_v56 = vadd.f32 %v3260_v2, %v3259_v25  ;;  %4089 = vmatpush.bf16.msrb.mxu3 %v6146_v18  ;;  %v3369_v22 = vmul.f32 %v7120_v6, %v3368_v21  ;;  %v6145_v25 = vld [vmem:[#allocation22 + $0x118] sm:$0xff]  ;;  %v6144_v2 = vld [vmem:[#allocation22 + $0x110] sm:$0xff] }
 0x3ba   :  { %4102 = vmatpush.bf16.msra.mxu0 %v6154_v7  ;;  %v3453_v12 = vmul.f32 %v3445_v1, %v6977_v46 }
 0x3bb   :  { %v3207_v40 = vadd.f32 %v3206_v48, %v3205_v30  ;;  %v3262_v41 = vrot.slane %v3261_v56, 1  ;;  %v3391_v48 = vperm.slane %v7024_v62, 6  ;;  %v3373_v36 = vsel %vm3372_vm3, %v7120_v6, %v3369_v22  ;;  %v6142_v6 = vld [vmem:[#allocation22 + $0x100] sm:$0xff] }
 0x3bc   :  { %4114 = vmatpush.bf16.msra.mxu1 %v6163_v31  ;;  %4128 = vmatpush.bf16.msra.mxu2 %v6170_v20 }
 0x3bd   :  { %v3263_v13 = vadd.f32 %v3262_v41, %v3261_v56  ;;  %v7124_v23 = vmul.f32 0.125, %v3207_v40  ;;  %4090 = vmatpush.bf16.msrb.mxu3 %v6145_v25  ;;  %v6160_v56 = vld [vmem:[#allocation22 + $0x190] sm:$0xff]  ;;  %v6151_v41 = vld [vmem:[#allocation22 + $0x148] sm:$0xff]  ;;  %v3407_v34 = vmul.f32 %v3391_v48, %v3373_v36 }
 0x3be   :  { %4103 = vmatpush.bf16.msra.mxu0 %v6153_v8 }
 0x3bf   :  { %v3279_v53 = vmul.f32 0.125, %v3263_v13  ;;  %v3287_v61 = vmul.f32 %v7124_v23, %v7124_v23  ;;  %v6150_v13 = vld [vmem:[#allocation22 + $0x140] sm:$0xff]  ;;  %v3451_v17 = vperm.slane %v3407_v34, 0 }
 0x3c0   :  { %4115 = vmatpush.bf16.msra.mxu1 %v6162_v16  ;;  %4129 = vmatpush.bf16.msra.mxu2 %v6169_v28 }
 0x3c1   :  { %v3295_v37 = vsub.f32 %v3279_v53, %v3287_v61  ;;  %4091 = vmatpush.bf16.msrb.mxu3 %v6144_v2  ;;  %v3415_v53 = vmul.f32 %v3407_v34, %v7104_v32  ;;  %v3447_v32 = vperm.slane %v7062_v26, 0  ;;  %v3454_v26 = vmul.f32 %v3446_v33, %v6988_v57  ;;  %v6197_v33 = vld [vmem:[%s7176_s16] ss:$0 sm:$0xff]  ;;  %s6602_s16 = smov [#allocation23]  }
 0x3c2   :  { %4104 = vmatpush.bf16.msra.mxu0 %v6152_v49  ;;  %v3459_v20 = vmul.f32 %v3451_v17, %v7087_v58  ;;  %s4145_s17 = sshll.u32 %s6602_s16, 4  ;;  %s4146_s17 = int_to_ptr.vmem [resolvable:$true] %s4145_s17 }
 0x3c3   :  { %v3303_v38 = vadd.f32 0.8, %v3295_v37  ;;  %v3430_v4 = vrot.slane %v3415_v53, 2 }
 0x3c4   :  { %4116 = vmatpush.bf16.msra.mxu1 %v6161_v27  ;;  %4130 = vmatpush.bf16.msra.mxu2 %v6168_v35 }
 0x3c5   :  { %6224 = vrsqrt.f32 %v3303_v38  ;;  %vm3380_vm4 = vweird.f32 %v3303_v38  ;;  %4092 = vmatpush.bf16.msrb.mxu3 %v6143_v51 }
 0x3c6   :  { %4105 = vmatpush.bf16.msra.mxu0 %v6151_v41 }
 0x3c8   :  { %4117 = vmatpush.bf16.msra.mxu1 %v6160_v56  ;;  %4131 = vmatpush.bf16.msra.mxu2 %v6167_v55 }
 0x3c9   :  { %4093 = vmatpush.bf16.msrb.mxu3 %v6142_v6 }
 0x3ca   :  { %4106 = vmatpush.bf16.msra.mxu0 %v6150_v13 }
 0x3cb   :  { %v6225_v0 = vpop.eup %6224 }
 0x3cc   :  { %v3375_v45 = vmul.f32 %v6225_v0, %v3303_v38  ;;  %vm3381_vm8 = vweird.f32 %v6225_v0  ;;  %4118 = vmatpush.bf16.msra.mxu1 %v6159_v50  ;;  %4132 = vmatpush.bf16.msra.mxu2 %v6166_v63  ;;  %v3448_v38 = vperm.slane %v7067_v19, 0  ;;  %v3455_v19 = vmul.f32 %v3447_v32, %v7013_v24 }
 0x3cd   :  { %vm3382_vm5 = vmor %vm3380_vm4, %vm3381_vm8 }
 0x3ce   :  { %v3376_v30 = vmul.f32 %v6225_v0, %v3375_v45  ;;  %v3456_v5 = vmul.f32 %v3448_v38, %v7048_v29 }
 0x3d0   :  { %v3377_v39 = vmul.f32 0.5, %v3376_v30  ;;  %4119 = vmatpush.bf16.msra.mxu1 %v6158_v59 }
 0x3d2   :  { %v3378_v40 = vsub.f32 1.5, %v3377_v39 }
 0x3d4   :  { %v3379_v9 = vmul.f32 %v6225_v0, %v3378_v40 }
 0x3d6   :  { %v3383_v60 = vsel %vm3382_vm5, %v6225_v0, %v3379_v9 }
 0x3d7   :  { %v3408_v61 = vmul.f32 %v3392_v42, %v3383_v60 }
 0x3d9   :  { %v3416_v62 = vmul.f32 %v3408_v61, %v7124_v23  ;;  %v3450_v23 = vperm.slane %v7099_v10, 0  ;;  %v3452_v11 = vperm.slane %v3408_v61, 0  ;;  %v3457_v10 = vmul.f32 %v3449_v44, %v7055_v14 }
 0x3db   :  { %v3431_v37 = vrot.slane %v3416_v62, 1  ;;  %v3458_v16 = vmul.f32 %v3450_v23, %v7080_v43  ;;  %v3460_v21 = vmul.f32 %v3452_v11, %v7113_v52 }
 0x3dd   :  { %v3438_v31 = vsel %vm3437_vm6, %v3430_v4, %v3431_v37 }
 0x3de   :  { %v3440_v3 = vsel %vm3439_vm10, %v7102_v15, %v3438_v31 }
 0x3df   :  { %v3442_v18 = vsel %vm3441_vm11, %v7073_v47, %v3440_v3 }
 0x3e0   :  { %v3444_v7 = vsub.f32 %v3159_v54, %v3442_v18 }
 0x3e2   :  { %v3469_v15 = vperm.slane %v3444_v7, 7  ;;  %v3462_v0 = vperm.slane %v3444_v7, 0  ;;  %v3463_v46 = vperm.slane %v3444_v7, 1  ;;  %v3464_v22 = vperm.slane %v3444_v7, 2 }
 0x3e3   :  { %v3465_v47 = vperm.slane %v3444_v7, 3  ;;  %v3466_v45 = vperm.slane %v3444_v7, 4  ;;  %v3467_v57 = vperm.slane %v3444_v7, 5  ;;  %v3468_v25 = vperm.slane %v3444_v7, 6 }
 0x3e4   :  { %v3485_v24 = vadd.f32 %v3469_v15, %v3460_v21  ;;  %v3478_v8 = vadd.f32 %v3462_v0, %v3453_v12  ;;  %v3479_v29 = vadd.f32 %v3463_v46, %v3454_v26  ;;  %v3480_v27 = vadd.f32 %v3464_v22, %v3455_v19 }
 0x3e5   :  { %v3481_v28 = vadd.f32 %v3465_v47, %v3456_v5  ;;  %v3482_v14 = vadd.f32 %v3466_v45, %v3457_v10  ;;  %v3483_v30 = vadd.f32 %v3467_v57, %v3458_v16  ;;  %v3484_v43 = vadd.f32 %v3468_v25, %v3459_v20 }
 0x3e6   :  { %vm3486_vm7 = vcmp.gt.f32.partialorder %v3478_v8, 0.0  ;;  %v3494_v58 = vmul.f32 0.2, %v3478_v8  ;;  %vm3487_vm9 = vcmp.gt.f32.partialorder %v3479_v29, 0.0  ;;  %v3495_v52 = vmul.f32 0.2, %v3479_v29 }
 0x3e7   :  { %vm3488_vm12 = vcmp.gt.f32.partialorder %v3480_v27, 0.0  ;;  %v3496_v2 = vmul.f32 0.2, %v3480_v27  ;;  %vm3489_vm13 = vcmp.gt.f32.partialorder %v3481_v28, 0.0  ;;  %v3497_v48 = vmul.f32 0.2, %v3481_v28 }
 0x3e8   :  { %v3502_v49 = vsel %vm3486_vm7, %v3478_v8, %v3494_v58  ;;  %v3503_v35 = vsel %vm3487_vm9, %v3479_v29, %v3495_v52  ;;  %v3498_v34 = vmul.f32 0.2, %v3482_v14  ;;  %vm3490_vm14 = vcmp.gt.f32.partialorder %v3482_v14, 0.0 }
 0x3e9   :  { %v3638_v56 = vpack.c.bf16 %v3502_v49, %v3502_v49  ;;  %v3504_v36 = vsel %vm3488_vm12, %v3480_v27, %v3496_v2  ;;  %v3639_v39 = vpack.c.bf16 %v3503_v35, %v3503_v35  ;;  %v3505_v51 = vsel %vm3489_vm13, %v3481_v28, %v3497_v48 }
 0x3ea   :  { %v3640_v40 = vpack.c.bf16 %v3504_v36, %v3504_v36  ;;  %v3641_v41 = vpack.c.bf16 %v3505_v51, %v3505_v51  ;;  %v3499_v42 = vmul.f32 0.2, %v3483_v30  ;;  %v3500_v50 = vmul.f32 0.2, %v3484_v43 }
 0x3eb   :  { %4042 = vmatmul.bf16.vlgmr.msra.gmra.mxu3 %v3638_v56  ;;  %4055 = vmatmul.bf16.vlgmr.msrb.gmra.mxu0 %v3639_v39  ;;  %v3501_v55 = vmul.f32 0.2, %v3485_v24  ;;  %vm3491_vm15 = vcmp.gt.f32.partialorder %v3483_v30, 0.0  ;;  %vm3492_vm0 = vcmp.gt.f32.partialorder %v3484_v43, 0.0  ;;  %vm3493_vm1 = vcmp.gt.f32.partialorder %v3485_v24, 0.0 }
 0x3ec   :  { %4068 = vmatmul.bf16.vlgmr.msrb.gmra.mxu1 %v3640_v40  ;;  %4081 = vmatmul.bf16.vlgmr.msrb.gmra.mxu2 %v3641_v41  ;;  %v3506_v9 = vsel %vm3490_vm14, %v3482_v14, %v3498_v34  ;;  %v3507_v60 = vsel %vm3491_vm15, %v3483_v30, %v3499_v42  ;;  %v3508_v6 = vsel %vm3492_vm0, %v3484_v43, %v3500_v50 }
 0x3ed   :  { %v3509_v13 = vsel %vm3493_vm1, %v3485_v24, %v3501_v55  ;;  %v3642_v53 = vpack.c.bf16 %v3506_v9, %v3506_v9  ;;  %v3643_v61 = vpack.c.bf16 %v3507_v60, %v3507_v60  ;;  %v3644_v59 = vpack.c.bf16 %v3508_v6, %v3508_v6 }
 0x3ee   :  { %v3645_v63 = vpack.c.bf16 %v3509_v13, %v3509_v13 }
 0x3fb   :  { %4094 = vmatmul.bf16.vlgmr.msrb.gmra.mxu3 %v3642_v53  ;;  %4107 = vmatmul.bf16.vlgmr.msra.gmra.mxu0 %v3643_v61 }
 0x3fc   :  { %4120 = vmatmul.bf16.vlgmr.msra.gmra.mxu1 %v3644_v59  ;;  %4133 = vmatmul.bf16.vlgmr.msra.gmra.mxu2 %v3645_v63 }
 0x468   :  { %v4056_v62 = vpop.f32.mrf.mxu0 }
 0x469   :  { %v4069_v1 = vpop.f32.mrf.mxu1 }
 0x46e   :  { %v4043_v4 = vpop.f32.mrf.mxu3 }
 0x46f   :  { %v4082_v37 = vpop.f32.mrf.mxu2  ;;  %v4044_v32 = vadd.f32 %v6197_v33, %v4043_v4 }
 0x470   :  { %v4058_v38 = vpop.f32.mrf.mxu0 }
 0x471   :  { %v4071_v44 = vpop.f32.mrf.mxu1  ;;  %v4057_v23 = vadd.f32 %v4056_v62, %v4044_v32 }
 0x473   :  { %v4070_v31 = vadd.f32 %v4069_v1, %v4057_v23 }
 0x475   :  { %v4083_v12 = vadd.f32 %v4082_v37, %v4070_v31 }
 0x476   :  { %v4045_v17 = vpop.f32.mrf.mxu3 }
 0x477   :  { %v4084_v54 = vpop.f32.mrf.mxu2 }
 0x478   :  { %v4108_v11 = vpop.f32.mrf.mxu0 }
 0x479   :  { %v4121_v3 = vpop.f32.mrf.mxu1 }
 0x47e   :  { %v4095_v18 = vpop.f32.mrf.mxu3 }
 0x47f   :  { %v4096_v26 = vadd.f32 %v4095_v18, %v4083_v12  ;;  %v4134_v19 = vpop.f32.mrf.mxu2 }
 0x480   :  { %v4110_v7 = vpop.f32.mrf.mxu0 }
 0x481   :  { %v4109_v5 = vadd.f32 %v4108_v11, %v4096_v26  ;;  %v4123_v10 = vpop.f32.mrf.mxu1 }
 0x483   :  { %v4122_v16 = vadd.f32 %v4121_v3, %v4109_v5 }
 0x485   :  { %v4135_v20 = vadd.f32 %v4134_v19, %v4122_v16 }
 0x486   :  { %v4097_v21 = vpop.f32.mrf.mxu3 }
 0x487   :  { %6226 = vtanh.f32 %v4135_v20  ;;  %v4136_v15 = vpop.f32.mrf.mxu2 }
 0x48d   :  { %v6227_v0 = vpop.eup %6226 }
 0x48e   :  { %4139 = vst [vmem:[#allocation23] sm:$0xff] %v6227_v0 }
 0x48f   :  { %4150 = dma.vmem_to_hbm [thread:$0]  %s4146_s17, 128, %s4148_s19, [#allocation4]  }
 0x490   :  { %6579 = dma.done.wait [#allocation4], 128  }
 0x491   :  { %6580 = vsyncadd [#allocation4], 4294967168 }
 0x492   :  { %4155 = vsyncpa [#allocation3], 1 }
 0x493   :  { %4156 = vsyncpa [#allocation6], 1 }
 0x494   :  { %4157 = vsyncpa [#allocation9], 1 }
 0x495   :  { %4158 = vsyncpa [#allocation12], 1 }
 0x496   :  { %4159 = vsyncpa [#allocation15], 1 }
 0x497   :  { %4160 = vsyncpa [#allocation18], 1 }
 0x498   :  { %4161 = vsyncpa [#allocation21], 1 }
 0x499   :  { %4162 = vsyncpa [#allocation4], 1 }

</bundles_post_ra>
